<compile_context>
chip_gen: v5e
topology: v5e:2x2
jax: 0.10.0
libtpu: 0.0.40
codegen_flags: <defaults>
</compile_context>

<pallas_src>
import math

import jax
import jax.numpy as jnp
from jax.experimental import pallas as pl
from jax.experimental.pallas import tpu as pltpu

# ---- small hyper-params consistent with the module's structure ----
B = 2                        # batch
C_IN = 3                     # image channels
IMG = 32                     # image spatial
PATCH = 8                    # stand-in encoder patch size
S_MEM = (IMG // PATCH) ** 2  # 16 memory tokens
PATCH_DIM = C_IN * PATCH * PATCH   # 192
P_PAD = 256                  # lane-dense padding of PATCH_DIM
D = 128                      # embedding_dim (d_model)
H = 4                        # num_heads_decoder
DH = D // H                  # per-head dim (32)
L = 2                        # num_transformer_decoder_layers
F = 256                      # ffn_dim
V = 512                      # vocab_size
T = 8                        # caption length
LN_EPS = 1e-5

F32 = jnp.float32
BF16 = jnp.bfloat16

# ---- static column layout of the (128, W128_COLS) bf16 weight slab ----
_W_SA_IN  = 0                      # L * 3D  fused self-attn in-proj (q|k|v)
_W_SA_OUT = _W_SA_IN + L * 3 * D   # L * D   self-attn out-proj
_W_CA_Q   = _W_SA_OUT + L * D      # L * D   cross-attn q-proj
_W_CA_KV  = _W_CA_Q + L * D        # L * 2D  cross-attn fused k|v proj
_W_CA_OUT = _W_CA_KV + L * 2 * D   # L * D   cross-attn out-proj
_W_FF1    = _W_CA_OUT + L * D      # L * F   ffn first layer
_W_FC     = _W_FF1 + L * F         # V       vocab head
W128_COLS = _W_FC + V              # 3072

# ---- static row layout of the (WTALL_ROWS, 128) bf16 weight slab ----
_R_ENC = 0                         # P_PAD rows: patch-embed weight
_R_FF2 = P_PAD                     # L * F rows: ffn second layer
WTALL_ROWS = P_PAD + L * F         # 768

# ---- static column layout of the (1, B_COLS) f32 bias / LN slab ----
_B_ENC    = 0
_B_SA_IN  = _B_ENC + D
_B_SA_OUT = _B_SA_IN + L * 3 * D
_B_CA_Q   = _B_SA_OUT + L * D
_B_CA_KV  = _B_CA_Q + L * D
_B_CA_OUT = _B_CA_KV + L * 2 * D
_B_FF1    = _B_CA_OUT + L * D
_B_FF2    = _B_FF1 + L * F
_B_LN_G   = _B_FF2 + L * D
_B_LN_B   = _B_LN_G + L * 3 * D
_B_FC     = _B_LN_B + L * 3 * D
B_COLS    = _B_FC + V              # 4992


# ------------------------------ kernel helpers --------------------------------
def _layer_norm(x, g, b):
    mu = jnp.mean(x, axis=-1, keepdims=True)
    xc = x - mu
    var = jnp.mean(xc * xc, axis=-1, keepdims=True)
    return xc * jax.lax.rsqrt(var + LN_EPS) * g + b


def _split_heads(z):
    # (Tx, D) f32 -> (H, Tx, DH) bf16.  Static 32-lane slices + leading-axis
    # stack only (no tiled-dim reshape).  Cast to bf16 at the matmul operand.
    zb = z.astype(BF16)
    return jnp.stack([zb[:, h * DH:(h + 1) * DH] for h in range(H)], axis=0)


def _merge_heads(z):
    # (H, Tx, DH) f32 -> (Tx, H*DH) f32 via a tiny lane concat.
    return jnp.concatenate([z[h] for h in range(H)], axis=-1)


def _sdpa(q_h, k_h, v_h):
    """Scaled-dot-product attention batched over heads.

    q_h: (H, Tq, DH) bf16 (scale folded into q weights), k_h/v_h: (H, Tk, DH) bf16
    returns (H, Tq, DH) f32
    """
    s = jnp.einsum('hqe,hke->hqk', q_h, k_h, preferred_element_type=F32)
    m = jnp.max(s, axis=-1, keepdims=True)           # stable softmax (review fix)
    p = jnp.exp(s - m)
    p = p * pl.reciprocal(jnp.sum(p, axis=-1, keepdims=True), approx=True)
    return jnp.einsum('hqk,hke->hqe', p.astype(BF16), v_h,
                      preferred_element_type=F32)


# ------------------------------ fused kernel ----------------------------------
def _fused_kernel(patches_ref, captions_ref, w128_ref, wtall_ref, bias_ref,
                  out_ref):
    """One batch element per grid step (grid=(B,), parallel across cores)."""

    def ln(x, l, n):  # n: 0=norm1, 1=norm2, 2=norm3
        off = (3 * l + n) * D
        g = bias_ref[:, _B_LN_G + off:_B_LN_G + off + D]
        b = bias_ref[:, _B_LN_B + off:_B_LN_B + off + D]
        return _layer_norm(x, g, b)

    # ---- encoder: linear patch embedding (lane-dense 256 -> 128) ----
    pf = patches_ref[...].reshape(S_MEM, P_PAD)                      # bf16 (16,256)
    enc_w = wtall_ref[_R_ENC:_R_ENC + P_PAD, :]                      # (256,128) bf16
    mem = jnp.dot(pf, enc_w, preferred_element_type=F32) \
        + bias_ref[:, _B_ENC:_B_ENC + D]                             # (16,128) f32

    # ---- cross-attention K/V for ALL layers in one 512-wide matmul ----
    kv_w = w128_ref[:, _W_CA_KV:_W_CA_KV + L * 2 * D]                # (128,512) bf16
    kv_b = bias_ref[:, _B_CA_KV:_B_CA_KV + L * 2 * D]                # (1,512)  f32
    kv_mem = jnp.dot(mem.astype(BF16), kv_w,
                     preferred_element_type=F32) + kv_b              # (16,512) f32

    # ---- decoder: post-LN nn.TransformerDecoderLayer (ReLU FFN, eval dropout)
    x = captions_ref[...].astype(F32).reshape(T, D)                  # (8,128) f32

    for l in range(L):                                  # static unroll, L = 2
        # -- self-attention: fused QKV (T,128)@(128,384), heads batched --
        wi = w128_ref[:, _W_SA_IN + l * 3 * D:_W_SA_IN + (l + 1) * 3 * D]
        bi = bias_ref[:, _B_SA_IN + l * 3 * D:_B_SA_IN + (l + 1) * 3 * D]
        qkv = jnp.dot(x.astype(BF16), wi, preferred_element_type=F32) + bi
        ctx = _sdpa(_split_heads(qkv[:, 0:D]),
                    _split_heads(qkv[:, D:2 * D]),
                    _split_heads(qkv[:, 2 * D:3 * D]))               # (H,T,DH)
        wo = w128_ref[:, _W_SA_OUT + l * D:_W_SA_OUT + (l + 1) * D]
        bo = bias_ref[:, _B_SA_OUT + l * D:_B_SA_OUT + (l + 1) * D]
        attn = jnp.dot(_merge_heads(ctx).astype(BF16), wo,
                       preferred_element_type=F32) + bo
        x = ln(x + attn, l, 0)

        # -- cross-attention over encoder memory (K/V precomputed above) --
        wq = w128_ref[:, _W_CA_Q + l * D:_W_CA_Q + (l + 1) * D]
        bq = bias_ref[:, _B_CA_Q + l * D:_B_CA_Q + (l + 1) * D]
        q = jnp.dot(x.astype(BF16), wq, preferred_element_type=F32) + bq
        k_m = kv_mem[:, l * 2 * D:l * 2 * D + D]                     # (16,128)
        v_m = kv_mem[:, l * 2 * D + D:(l + 1) * 2 * D]               # (16,128)
        ctx = _sdpa(_split_heads(q), _split_heads(k_m), _split_heads(v_m))
        wo = w128_ref[:, _W_CA_OUT + l * D:_W_CA_OUT + (l + 1) * D]
        bo = bias_ref[:, _B_CA_OUT + l * D:_B_CA_OUT + (l + 1) * D]
        attn = jnp.dot(_merge_heads(ctx).astype(BF16), wo,
                       preferred_element_type=F32) + bo
        x = ln(x + attn, l, 1)

        # -- feed-forward (lane-dense F = 256) --
        w1 = w128_ref[:, _W_FF1 + l * F:_W_FF1 + (l + 1) * F]
        b1 = bias_ref[:, _B_FF1 + l * F:_B_FF1 + (l + 1) * F]
        h1 = jnp.maximum(
            jnp.dot(x.astype(BF16), w1, preferred_element_type=F32) + b1, 0.0)
        w2 = wtall_ref[_R_FF2 + l * F:_R_FF2 + (l + 1) * F, :]       # (256,128)
        b2 = bias_ref[:, _B_FF2 + l * D:_B_FF2 + (l + 1) * D]
        ff = jnp.dot(h1.astype(BF16), w2, preferred_element_type=F32) + b2
        x = ln(x + ff, l, 2)

    # ---- vocab head (V = 512 lane-dense output) ----
    fc_w = w128_ref[:, _W_FC:_W_FC + V]
    fc_b = bias_ref[:, _B_FC:_B_FC + V]
    logits = jnp.dot(x.astype(BF16), fc_w, preferred_element_type=F32) + fc_b
    out_ref[...] = logits.reshape(1, T, V).astype(out_ref.dtype)


# ------------------------------ parameter init --------------------------------
def init_params(key):
    it = iter(jax.random.split(key, 64))

    def rnd(shape, scale=1.0):
        return 0.02 * scale * jax.random.normal(next(it), shape, F32)

    scale_q = 1.0 / math.sqrt(DH)        # folded into q weights/bias at init

    # ---- bf16 (128, W128_COLS) weight slab, grouped by type / layer-major ----
    sa_in, sa_out, ca_q, ca_kv, ca_out, ff1 = [], [], [], [], [], []
    for _ in range(L):
        w = rnd((D, 3 * D))
        sa_in.append(w.at[:, :D].multiply(scale_q))      # scale the q columns
        sa_out.append(rnd((D, D)))
        ca_q.append(rnd((D, D)) * scale_q)
        ca_kv.append(rnd((D, 2 * D)))
        ca_out.append(rnd((D, D)))
        ff1.append(rnd((D, F)))
    fc_w = rnd((D, V))
    w128 = jnp.concatenate(
        sa_in + sa_out + ca_q + ca_kv + ca_out + ff1 + [fc_w],
        axis=1).astype(BF16)
    assert w128.shape == (D, W128_COLS)

    # ---- bf16 (WTALL_ROWS, 128) weight slab: patch embed + ffn layer-2 ----
    enc_w = jnp.pad(rnd((PATCH_DIM, D)), ((0, P_PAD - PATCH_DIM), (0, 0)))
    ff2 = [rnd((F, D)) for _ in range(L)]
    wtall = jnp.concatenate([enc_w] + ff2, axis=0).astype(BF16)
    assert wtall.shape == (WTALL_ROWS, D)

    # ---- f32 (1, B_COLS) bias / LayerNorm slab ----
    enc_b = rnd((1, D))
    sa_in_b, sa_out_b, ca_q_b, ca_kv_b, ca_out_b, ff1_b, ff2_b = \
        [], [], [], [], [], [], []
    for _ in range(L):
        b = rnd((1, 3 * D))
        sa_in_b.append(b.at[:, :D].multiply(scale_q))
        sa_out_b.append(rnd((1, D)))
        ca_q_b.append(rnd((1, D)) * scale_q)
        ca_kv_b.append(rnd((1, 2 * D)))
        ca_out_b.append(rnd((1, D)))
        ff1_b.append(rnd((1, F)))
        ff2_b.append(rnd((1, D)))
    ln_g = jnp.ones((1, L * 3 * D), F32)      # norm1, norm2, norm3 per layer
    ln_b = jnp.zeros((1, L * 3 * D), F32)
    fc_b = rnd((1, V))
    bias = jnp.concatenate(
        [enc_b] + sa_in_b + sa_out_b + ca_q_b + ca_kv_b + ca_out_b
        + ff1_b + ff2_b + [ln_g, ln_b, fc_b], axis=1)
    assert bias.shape == (1, B_COLS)

    return dict(w128=w128, wtall=wtall, bias=bias)


# ------------------------------ wrapper ---------------------------------------
def _patchify(images):
    # NCHW -> (B, S_MEM, PATCH_DIM) patches, zero-padded to 256 lanes, bf16.
    b, c, hh, ww = images.shape
    p = images.reshape(b, c, hh // PATCH, PATCH, ww // PATCH, PATCH)
    p = p.transpose(0, 2, 4, 1, 3, 5).reshape(b, S_MEM, PATCH_DIM)
    p = jnp.pad(p, ((0, 0), (0, 0), (0, P_PAD - PATCH_DIM)))
    return p.astype(BF16)


@jax.jit
def image_caption_forward(image_features, captions, params):
    patches = _patchify(image_features)
    return pl.pallas_call(
        _fused_kernel,
        out_shape=jax.ShapeDtypeStruct((B, T, V), F32),
        grid=(B,),
        in_specs=[
            pl.BlockSpec((1, S_MEM, P_PAD), lambda b: (b, 0, 0)),   # patches
            pl.BlockSpec((1, T, D), lambda b: (b, 0, 0)),           # captions
            pl.BlockSpec((D, W128_COLS), lambda b: (0, 0)),         # w128 slab
            pl.BlockSpec((WTALL_ROWS, D), lambda b: (0, 0)),        # wtall slab
            pl.BlockSpec((1, B_COLS), lambda b: (0, 0)),            # bias slab
        ],
        out_specs=pl.BlockSpec((1, T, V), lambda b: (b, 0, 0)),
        compiler_params=pltpu.CompilerParams(
            dimension_semantics=("parallel",)),   # batch across cores on v7x
    )(patches, captions.astype(F32),
      params["w128"], params["wtall"], params["bias"])


if __name__ == "__main__":
    key = jax.random.PRNGKey(0)
    kp, ki, kc = jax.random.split(key, 3)
    params = init_params(kp)
    image_features = jax.random.normal(ki, (B, C_IN, IMG, IMG), F32)
    captions = jax.random.normal(kc, (B, T, D), F32)

    logits = image_caption_forward(image_features, captions, params)
    logits = jax.block_until_ready(logits)

    assert logits.shape == (B, T, V), logits.shape
    assert bool(jnp.all(jnp.isfinite(logits)))
    print("KERNEL_OK")
</pallas_src>

<mosaic_0001>
module attributes {stable_mosaic.version = 11 : i64} {
  func.func @_fused_kernel(%arg0: i32, %arg1: memref<1x16x256xbf16, #tpu.memory_space<vmem>>, %arg2: memref<1x8x128xf32, #tpu.memory_space<vmem>>, %arg3: memref<128x3072xbf16, #tpu.memory_space<vmem>>, %arg4: memref<768x128xbf16, #tpu.memory_space<vmem>>, %arg5: memref<1x4992xf32, #tpu.memory_space<vmem>>, %arg6: memref<1x8x512xf32, #tpu.memory_space<vmem>>) attributes {dimension_semantics = [#tpu.dimension_semantics<parallel>], iteration_bounds = array<i64: 2>, scalar_prefetch = 0 : i64, scratch_operands = 0 : i64, tpu.core_type = #tpu.core_type<tc>, window_params = [{transform_indices = @transform_0, window_bounds = array<i64: 1, 16, 256>}, {transform_indices = @transform_1, window_bounds = array<i64: 1, 8, 128>}, {pipeline_mode = #tpu.pipeline_mode<synchronous>, transform_indices = @transform_2, window_bounds = array<i64: 128, 3072>}, {pipeline_mode = #tpu.pipeline_mode<synchronous>, transform_indices = @transform_3, window_bounds = array<i64: 768, 128>}, {pipeline_mode = #tpu.pipeline_mode<synchronous>, transform_indices = @transform_4, window_bounds = array<i64: 1, 4992>}, {transform_indices = @transform_5, window_bounds = array<i64: 1, 8, 512>}]} {
    %c0 = arith.constant 0 : index
    %c0_0 = arith.constant 0 : index
    %c0_1 = arith.constant 0 : index
    %0 = vector.load %arg1[%c0, %c0_0, %c0_1] : memref<1x16x256xbf16, #tpu.memory_space<vmem>>, vector<1x16x256xbf16>
    %1 = vector.shape_cast %0 : vector<1x16x256xbf16> to vector<16x256xbf16>
    %c0_2 = arith.constant 0 : index
    %c0_3 = arith.constant 0 : index
    %2 = vector.load %arg4[%c0_2, %c0_3] : memref<768x128xbf16, #tpu.memory_space<vmem>>, vector<256x128xbf16>
    %cst = arith.constant dense<0.000000e+00> : vector<16x128xf32>
    %3 = tpu.matmul %1, %2, %cst {dimension_numbers = #tpu.dot_dimension_numbers<[1], [0], [0], [1], [0, 0, 1, 1], [], []>} : vector<16x256xbf16>, vector<256x128xbf16>, vector<16x128xf32> -> vector<16x128xf32>
    %c0_4 = arith.constant 0 : index
    %c0_5 = arith.constant 0 : index
    %4 = vector.load %arg5[%c0_4, %c0_5] : memref<1x4992xf32, #tpu.memory_space<vmem>>, vector<1x128xf32>
    %5 = vector.broadcast %4 : vector<1x128xf32> to vector<16x128xf32>
    %6 = arith.addf %3, %5 : vector<16x128xf32>
    %c0_6 = arith.constant 0 : index
    %c1280 = arith.constant 1280 : index
    %7 = vector.load %arg3[%c0_6, %c1280] : memref<128x3072xbf16, #tpu.memory_space<vmem>>, vector<128x512xbf16>
    %c0_7 = arith.constant 0 : index
    %c1408 = arith.constant 1408 : index
    %8 = vector.load %arg5[%c0_7, %c1408] : memref<1x4992xf32, #tpu.memory_space<vmem>>, vector<1x512xf32>
    %9 = arith.truncf %6 : vector<16x128xf32> to vector<16x128xbf16>
    %cst_8 = arith.constant dense<0.000000e+00> : vector<16x512xf32>
    %10 = tpu.matmul %9, %7, %cst_8 {dimension_numbers = #tpu.dot_dimension_numbers<[1], [0], [0], [1], [0, 0, 1, 1], [], []>} : vector<16x128xbf16>, vector<128x512xbf16>, vector<16x512xf32> -> vector<16x512xf32>
    %11 = vector.broadcast %8 : vector<1x512xf32> to vector<16x512xf32>
    %12 = arith.addf %10, %11 : vector<16x512xf32>
    %c0_9 = arith.constant 0 : index
    %c0_10 = arith.constant 0 : index
    %c0_11 = arith.constant 0 : index
    %13 = vector.load %arg2[%c0_9, %c0_10, %c0_11] : memref<1x8x128xf32, #tpu.memory_space<vmem>>, vector<1x8x128xf32>
    %14 = vector.shape_cast %13 : vector<1x8x128xf32> to vector<8x128xf32>
    %c0_12 = arith.constant 0 : index
    %c0_13 = arith.constant 0 : index
    %15 = vector.load %arg3[%c0_12, %c0_13] : memref<128x3072xbf16, #tpu.memory_space<vmem>>, vector<128x384xbf16>
    %c0_14 = arith.constant 0 : index
    %c128 = arith.constant 128 : index
    %16 = vector.load %arg5[%c0_14, %c128] : memref<1x4992xf32, #tpu.memory_space<vmem>>, vector<1x384xf32>
    %17 = arith.truncf %14 : vector<8x128xf32> to vector<8x128xbf16>
    %cst_15 = arith.constant dense<0.000000e+00> : vector<8x384xf32>
    %18 = tpu.matmul %17, %15, %cst_15 {dimension_numbers = #tpu.dot_dimension_numbers<[1], [0], [0], [1], [0, 0, 1, 1], [], []>} : vector<8x128xbf16>, vector<128x384xbf16>, vector<8x384xf32> -> vector<8x384xf32>
    %19 = vector.broadcast %16 : vector<1x384xf32> to vector<8x384xf32>
    %20 = arith.addf %18, %19 : vector<8x384xf32>
    %21 = vector.extract_strided_slice %20 {offsets = [0, 0], sizes = [8, 128], strides = [1, 1]} : vector<8x384xf32> to vector<8x128xf32>
    %22 = arith.truncf %21 : vector<8x128xf32> to vector<8x128xbf16>
    %23 = vector.extract_strided_slice %22 {offsets = [0, 0], sizes = [8, 32], strides = [1, 1]} : vector<8x128xbf16> to vector<8x32xbf16>
    %24 = vector.extract_strided_slice %22 {offsets = [0, 32], sizes = [8, 32], strides = [1, 1]} : vector<8x128xbf16> to vector<8x32xbf16>
    %25 = vector.extract_strided_slice %22 {offsets = [0, 64], sizes = [8, 32], strides = [1, 1]} : vector<8x128xbf16> to vector<8x32xbf16>
    %26 = vector.extract_strided_slice %22 {offsets = [0, 96], sizes = [8, 32], strides = [1, 1]} : vector<8x128xbf16> to vector<8x32xbf16>
    %27 = vector.shape_cast %23 : vector<8x32xbf16> to vector<1x8x32xbf16>
    %28 = vector.shape_cast %24 : vector<8x32xbf16> to vector<1x8x32xbf16>
    %29 = vector.shape_cast %25 : vector<8x32xbf16> to vector<1x8x32xbf16>
    %30 = vector.shape_cast %26 : vector<8x32xbf16> to vector<1x8x32xbf16>
    %31 = tpu.concatenate %27, %28, %29, %30 in 0 : vector<1x8x32xbf16>, vector<1x8x32xbf16>, vector<1x8x32xbf16>, vector<1x8x32xbf16> -> vector<4x8x32xbf16>
    %32 = vector.extract_strided_slice %20 {offsets = [0, 128], sizes = [8, 128], strides = [1, 1]} : vector<8x384xf32> to vector<8x128xf32>
    %33 = arith.truncf %32 : vector<8x128xf32> to vector<8x128xbf16>
    %34 = vector.extract_strided_slice %33 {offsets = [0, 0], sizes = [8, 32], strides = [1, 1]} : vector<8x128xbf16> to vector<8x32xbf16>
    %35 = vector.extract_strided_slice %33 {offsets = [0, 32], sizes = [8, 32], strides = [1, 1]} : vector<8x128xbf16> to vector<8x32xbf16>
    %36 = vector.extract_strided_slice %33 {offsets = [0, 64], sizes = [8, 32], strides = [1, 1]} : vector<8x128xbf16> to vector<8x32xbf16>
    %37 = vector.extract_strided_slice %33 {offsets = [0, 96], sizes = [8, 32], strides = [1, 1]} : vector<8x128xbf16> to vector<8x32xbf16>
    %38 = vector.shape_cast %34 : vector<8x32xbf16> to vector<1x8x32xbf16>
    %39 = vector.shape_cast %35 : vector<8x32xbf16> to vector<1x8x32xbf16>
    %40 = vector.shape_cast %36 : vector<8x32xbf16> to vector<1x8x32xbf16>
    %41 = vector.shape_cast %37 : vector<8x32xbf16> to vector<1x8x32xbf16>
    %42 = tpu.concatenate %38, %39, %40, %41 in 0 : vector<1x8x32xbf16>, vector<1x8x32xbf16>, vector<1x8x32xbf16>, vector<1x8x32xbf16> -> vector<4x8x32xbf16>
    %43 = vector.extract_strided_slice %20 {offsets = [0, 256], sizes = [8, 128], strides = [1, 1]} : vector<8x384xf32> to vector<8x128xf32>
    %44 = arith.truncf %43 : vector<8x128xf32> to vector<8x128xbf16>
    %45 = vector.extract_strided_slice %44 {offsets = [0, 0], sizes = [8, 32], strides = [1, 1]} : vector<8x128xbf16> to vector<8x32xbf16>
    %46 = vector.extract_strided_slice %44 {offsets = [0, 32], sizes = [8, 32], strides = [1, 1]} : vector<8x128xbf16> to vector<8x32xbf16>
    %47 = vector.extract_strided_slice %44 {offsets = [0, 64], sizes = [8, 32], strides = [1, 1]} : vector<8x128xbf16> to vector<8x32xbf16>
    %48 = vector.extract_strided_slice %44 {offsets = [0, 96], sizes = [8, 32], strides = [1, 1]} : vector<8x128xbf16> to vector<8x32xbf16>
    %49 = vector.shape_cast %45 : vector<8x32xbf16> to vector<1x8x32xbf16>
    %50 = vector.shape_cast %46 : vector<8x32xbf16> to vector<1x8x32xbf16>
    %51 = vector.shape_cast %47 : vector<8x32xbf16> to vector<1x8x32xbf16>
    %52 = vector.shape_cast %48 : vector<8x32xbf16> to vector<1x8x32xbf16>
    %53 = tpu.concatenate %49, %50, %51, %52 in 0 : vector<1x8x32xbf16>, vector<1x8x32xbf16>, vector<1x8x32xbf16>, vector<1x8x32xbf16> -> vector<4x8x32xbf16>
    "tpu.trace_start"() <{level = 10 : i32, message = "hqe,hke->hqk"}> : () -> ()
    %cst_16 = arith.constant dense<0.000000e+00> : vector<4x8x8xf32>
    %54 = tpu.matmul %31, %42, %cst_16 {dimension_numbers = #tpu.dot_dimension_numbers<[2], [2], [1], [1], [0, 0, 0, 1, 1, 1], [0], [0]>} : vector<4x8x32xbf16>, vector<4x8x32xbf16>, vector<4x8x8xf32> -> vector<4x8x8xf32>
    "tpu.trace_stop"() : () -> ()
    %cst_17 = arith.constant dense<0xFF800000> : vector<4x8xf32>
    %55 = vector.multi_reduction <maximumf>, %54, %cst_17 [2] : vector<4x8x8xf32> to vector<4x8xf32>
    %56 = vector.shape_cast %55 : vector<4x8xf32> to vector<4x8x1xf32>
    %57 = vector.broadcast %56 : vector<4x8x1xf32> to vector<4x8x8xf32>
    %58 = arith.subf %54, %57 : vector<4x8x8xf32>
    %59 = math.exp %58 : vector<4x8x8xf32>
    %cst_18 = arith.constant dense<0.000000e+00> : vector<4x8xf32>
    %60 = vector.multi_reduction <add>, %59, %cst_18 [2] : vector<4x8x8xf32> to vector<4x8xf32>
    %61 = vector.shape_cast %60 : vector<4x8xf32> to vector<4x8x1xf32>
    %62 = tpu.reciprocal %61 {approx = true} : vector<4x8x1xf32> -> vector<4x8x1xf32>
    %63 = vector.broadcast %62 : vector<4x8x1xf32> to vector<4x8x8xf32>
    %64 = arith.mulf %59, %63 : vector<4x8x8xf32>
    %65 = arith.truncf %64 : vector<4x8x8xf32> to vector<4x8x8xbf16>
    "tpu.trace_start"() <{level = 10 : i32, message = "hqk,hke->hqe"}> : () -> ()
    %cst_19 = arith.constant dense<0.000000e+00> : vector<4x8x32xf32>
    %66 = tpu.matmul %65, %53, %cst_19 {dimension_numbers = #tpu.dot_dimension_numbers<[2], [1], [1], [2], [0, 0, 0, 1, 1, 2], [0], [0]>} : vector<4x8x8xbf16>, vector<4x8x32xbf16>, vector<4x8x32xf32> -> vector<4x8x32xf32>
    "tpu.trace_stop"() : () -> ()
    %c0_20 = arith.constant 0 : index
    %c768 = arith.constant 768 : index
    %67 = vector.load %arg3[%c0_20, %c768] : memref<128x3072xbf16, #tpu.memory_space<vmem>>, vector<128x128xbf16>
    %c0_21 = arith.constant 0 : index
    %c896 = arith.constant 896 : index
    %68 = vector.load %arg5[%c0_21, %c896] : memref<1x4992xf32, #tpu.memory_space<vmem>>, vector<1x128xf32>
    %69 = vector.extract_strided_slice %66 {offsets = [0, 0, 0], sizes = [1, 8, 32], strides = [1, 1, 1]} : vector<4x8x32xf32> to vector<1x8x32xf32>
    %70 = vector.shape_cast %69 : vector<1x8x32xf32> to vector<8x32xf32>
    %71 = vector.extract_strided_slice %66 {offsets = [1, 0, 0], sizes = [1, 8, 32], strides = [1, 1, 1]} : vector<4x8x32xf32> to vector<1x8x32xf32>
    %72 = vector.shape_cast %71 : vector<1x8x32xf32> to vector<8x32xf32>
    %73 = vector.extract_strided_slice %66 {offsets = [2, 0, 0], sizes = [1, 8, 32], strides = [1, 1, 1]} : vector<4x8x32xf32> to vector<1x8x32xf32>
    %74 = vector.shape_cast %73 : vector<1x8x32xf32> to vector<8x32xf32>
    %75 = vector.extract_strided_slice %66 {offsets = [3, 0, 0], sizes = [1, 8, 32], strides = [1, 1, 1]} : vector<4x8x32xf32> to vector<1x8x32xf32>
    %76 = vector.shape_cast %75 : vector<1x8x32xf32> to vector<8x32xf32>
    %77 = tpu.concatenate %70, %72, %74, %76 in 1 : vector<8x32xf32>, vector<8x32xf32>, vector<8x32xf32>, vector<8x32xf32> -> vector<8x128xf32>
    %78 = arith.truncf %77 : vector<8x128xf32> to vector<8x128xbf16>
    %cst_22 = arith.constant dense<0.000000e+00> : vector<8x128xf32>
    %79 = tpu.matmul %78, %67, %cst_22 {dimension_numbers = #tpu.dot_dimension_numbers<[1], [0], [0], [1], [0, 0, 1, 1], [], []>} : vector<8x128xbf16>, vector<128x128xbf16>, vector<8x128xf32> -> vector<8x128xf32>
    %80 = vector.broadcast %68 : vector<1x128xf32> to vector<8x128xf32>
    %81 = arith.addf %79, %80 : vector<8x128xf32>
    %82 = arith.addf %14, %81 : vector<8x128xf32>
    %c0_23 = arith.constant 0 : index
    %c2944 = arith.constant 2944 : index
    %83 = vector.load %arg5[%c0_23, %c2944] : memref<1x4992xf32, #tpu.memory_space<vmem>>, vector<1x128xf32>
    %c0_24 = arith.constant 0 : index
    %c3712 = arith.constant 3712 : index
    %84 = vector.load %arg5[%c0_24, %c3712] : memref<1x4992xf32, #tpu.memory_space<vmem>>, vector<1x128xf32>
    %cst_25 = arith.constant dense<0.000000e+00> : vector<8xf32>
    %85 = vector.multi_reduction <add>, %82, %cst_25 [1] : vector<8x128xf32> to vector<8xf32>
    %86 = vector.shape_cast %85 : vector<8xf32> to vector<8x1xf32>
    %cst_26 = arith.constant 1.280000e+02 : f32
    %87 = vector.broadcast %cst_26 : f32 to vector<8x1xf32>
    %88 = arith.divf %86, %87 : vector<8x1xf32>
    %89 = vector.broadcast %88 : vector<8x1xf32> to vector<8x128xf32>
    %90 = arith.subf %82, %89 : vector<8x128xf32>
    %91 = arith.mulf %90, %90 : vector<8x128xf32>
    %cst_27 = arith.constant dense<0.000000e+00> : vector<8xf32>
    %92 = vector.multi_reduction <add>, %91, %cst_27 [1] : vector<8x128xf32> to vector<8xf32>
    %93 = vector.shape_cast %92 : vector<8xf32> to vector<8x1xf32>
    %cst_28 = arith.constant 1.280000e+02 : f32
    %94 = vector.broadcast %cst_28 : f32 to vector<8x1xf32>
    %95 = arith.divf %93, %94 : vector<8x1xf32>
    %cst_29 = arith.constant 9.99999974E-6 : f32
    %96 = vector.broadcast %cst_29 : f32 to vector<8x1xf32>
    %97 = arith.addf %95, %96 : vector<8x1xf32>
    %98 = math.rsqrt %97 : vector<8x1xf32>
    %99 = vector.broadcast %98 : vector<8x1xf32> to vector<8x128xf32>
    %100 = arith.mulf %90, %99 : vector<8x128xf32>
    %101 = vector.broadcast %83 : vector<1x128xf32> to vector<8x128xf32>
    %102 = arith.mulf %100, %101 : vector<8x128xf32>
    %103 = vector.broadcast %84 : vector<1x128xf32> to vector<8x128xf32>
    %104 = arith.addf %102, %103 : vector<8x128xf32>
    %c0_30 = arith.constant 0 : index
    %c1024 = arith.constant 1024 : index
    %105 = vector.load %arg3[%c0_30, %c1024] : memref<128x3072xbf16, #tpu.memory_space<vmem>>, vector<128x128xbf16>
    %c0_31 = arith.constant 0 : index
    %c1152 = arith.constant 1152 : index
    %106 = vector.load %arg5[%c0_31, %c1152] : memref<1x4992xf32, #tpu.memory_space<vmem>>, vector<1x128xf32>
    %107 = arith.truncf %104 : vector<8x128xf32> to vector<8x128xbf16>
    %cst_32 = arith.constant dense<0.000000e+00> : vector<8x128xf32>
    %108 = tpu.matmul %107, %105, %cst_32 {dimension_numbers = #tpu.dot_dimension_numbers<[1], [0], [0], [1], [0, 0, 1, 1], [], []>} : vector<8x128xbf16>, vector<128x128xbf16>, vector<8x128xf32> -> vector<8x128xf32>
    %109 = vector.broadcast %106 : vector<1x128xf32> to vector<8x128xf32>
    %110 = arith.addf %108, %109 : vector<8x128xf32>
    %111 = vector.extract_strided_slice %12 {offsets = [0, 0], sizes = [16, 128], strides = [1, 1]} : vector<16x512xf32> to vector<16x128xf32>
    %112 = vector.extract_strided_slice %12 {offsets = [0, 128], sizes = [16, 128], strides = [1, 1]} : vector<16x512xf32> to vector<16x128xf32>
    %113 = arith.truncf %110 : vector<8x128xf32> to vector<8x128xbf16>
    %114 = vector.extract_strided_slice %113 {offsets = [0, 0], sizes = [8, 32], strides = [1, 1]} : vector<8x128xbf16> to vector<8x32xbf16>
    %115 = vector.extract_strided_slice %113 {offsets = [0, 32], sizes = [8, 32], strides = [1, 1]} : vector<8x128xbf16> to vector<8x32xbf16>
    %116 = vector.extract_strided_slice %113 {offsets = [0, 64], sizes = [8, 32], strides = [1, 1]} : vector<8x128xbf16> to vector<8x32xbf16>
    %117 = vector.extract_strided_slice %113 {offsets = [0, 96], sizes = [8, 32], strides = [1, 1]} : vector<8x128xbf16> to vector<8x32xbf16>
    %118 = vector.shape_cast %114 : vector<8x32xbf16> to vector<1x8x32xbf16>
    %119 = vector.shape_cast %115 : vector<8x32xbf16> to vector<1x8x32xbf16>
    %120 = vector.shape_cast %116 : vector<8x32xbf16> to vector<1x8x32xbf16>
    %121 = vector.shape_cast %117 : vector<8x32xbf16> to vector<1x8x32xbf16>
    %122 = tpu.concatenate %118, %119, %120, %121 in 0 : vector<1x8x32xbf16>, vector<1x8x32xbf16>, vector<1x8x32xbf16>, vector<1x8x32xbf16> -> vector<4x8x32xbf16>
    %123 = arith.truncf %111 : vector<16x128xf32> to vector<16x128xbf16>
    %124 = vector.extract_strided_slice %123 {offsets = [0, 0], sizes = [16, 32], strides = [1, 1]} : vector<16x128xbf16> to vector<16x32xbf16>
    %125 = vector.extract_strided_slice %123 {offsets = [0, 32], sizes = [16, 32], strides = [1, 1]} : vector<16x128xbf16> to vector<16x32xbf16>
    %126 = vector.extract_strided_slice %123 {offsets = [0, 64], sizes = [16, 32], strides = [1, 1]} : vector<16x128xbf16> to vector<16x32xbf16>
    %127 = vector.extract_strided_slice %123 {offsets = [0, 96], sizes = [16, 32], strides = [1, 1]} : vector<16x128xbf16> to vector<16x32xbf16>
    %128 = vector.shape_cast %124 : vector<16x32xbf16> to vector<1x16x32xbf16>
    %129 = vector.shape_cast %125 : vector<16x32xbf16> to vector<1x16x32xbf16>
    %130 = vector.shape_cast %126 : vector<16x32xbf16> to vector<1x16x32xbf16>
    %131 = vector.shape_cast %127 : vector<16x32xbf16> to vector<1x16x32xbf16>
    %132 = tpu.concatenate %128, %129, %130, %131 in 0 : vector<1x16x32xbf16>, vector<1x16x32xbf16>, vector<1x16x32xbf16>, vector<1x16x32xbf16> -> vector<4x16x32xbf16>
    %133 = arith.truncf %112 : vector<16x128xf32> to vector<16x128xbf16>
    %134 = vector.extract_strided_slice %133 {offsets = [0, 0], sizes = [16, 32], strides = [1, 1]} : vector<16x128xbf16> to vector<16x32xbf16>
    %135 = vector.extract_strided_slice %133 {offsets = [0, 32], sizes = [16, 32], strides = [1, 1]} : vector<16x128xbf16> to vector<16x32xbf16>
    %136 = vector.extract_strided_slice %133 {offsets = [0, 64], sizes = [16, 32], strides = [1, 1]} : vector<16x128xbf16> to vector<16x32xbf16>
    %137 = vector.extract_strided_slice %133 {offsets = [0, 96], sizes = [16, 32], strides = [1, 1]} : vector<16x128xbf16> to vector<16x32xbf16>
    %138 = vector.shape_cast %134 : vector<16x32xbf16> to vector<1x16x32xbf16>
    %139 = vector.shape_cast %135 : vector<16x32xbf16> to vector<1x16x32xbf16>
    %140 = vector.shape_cast %136 : vector<16x32xbf16> to vector<1x16x32xbf16>
    %141 = vector.shape_cast %137 : vector<16x32xbf16> to vector<1x16x32xbf16>
    %142 = tpu.concatenate %138, %139, %140, %141 in 0 : vector<1x16x32xbf16>, vector<1x16x32xbf16>, vector<1x16x32xbf16>, vector<1x16x32xbf16> -> vector<4x16x32xbf16>
    "tpu.trace_start"() <{level = 10 : i32, message = "hqe,hke->hqk"}> : () -> ()
    %cst_33 = arith.constant dense<0.000000e+00> : vector<4x8x16xf32>
    %143 = tpu.matmul %122, %132, %cst_33 {dimension_numbers = #tpu.dot_dimension_numbers<[2], [2], [1], [1], [0, 0, 0, 1, 1, 1], [0], [0]>} : vector<4x8x32xbf16>, vector<4x16x32xbf16>, vector<4x8x16xf32> -> vector<4x8x16xf32>
    "tpu.trace_stop"() : () -> ()
    %cst_34 = arith.constant dense<0xFF800000> : vector<4x8xf32>
    %144 = vector.multi_reduction <maximumf>, %143, %cst_34 [2] : vector<4x8x16xf32> to vector<4x8xf32>
    %145 = vector.shape_cast %144 : vector<4x8xf32> to vector<4x8x1xf32>
    %146 = vector.broadcast %145 : vector<4x8x1xf32> to vector<4x8x16xf32>
    %147 = arith.subf %143, %146 : vector<4x8x16xf32>
    %148 = math.exp %147 : vector<4x8x16xf32>
    %cst_35 = arith.constant dense<0.000000e+00> : vector<4x8xf32>
    %149 = vector.multi_reduction <add>, %148, %cst_35 [2] : vector<4x8x16xf32> to vector<4x8xf32>
    %150 = vector.shape_cast %149 : vector<4x8xf32> to vector<4x8x1xf32>
    %151 = tpu.reciprocal %150 {approx = true} : vector<4x8x1xf32> -> vector<4x8x1xf32>
    %152 = vector.broadcast %151 : vector<4x8x1xf32> to vector<4x8x16xf32>
    %153 = arith.mulf %148, %152 : vector<4x8x16xf32>
    %154 = arith.truncf %153 : vector<4x8x16xf32> to vector<4x8x16xbf16>
    "tpu.trace_start"() <{level = 10 : i32, message = "hqk,hke->hqe"}> : () -> ()
    %cst_36 = arith.constant dense<0.000000e+00> : vector<4x8x32xf32>
    %155 = tpu.matmul %154, %142, %cst_36 {dimension_numbers = #tpu.dot_dimension_numbers<[2], [1], [1], [2], [0, 0, 0, 1, 1, 2], [0], [0]>} : vector<4x8x16xbf16>, vector<4x16x32xbf16>, vector<4x8x32xf32> -> vector<4x8x32xf32>
    "tpu.trace_stop"() : () -> ()
    %c0_37 = arith.constant 0 : index
    %c1792 = arith.constant 1792 : index
    %156 = vector.load %arg3[%c0_37, %c1792] : memref<128x3072xbf16, #tpu.memory_space<vmem>>, vector<128x128xbf16>
    %c0_38 = arith.constant 0 : index
    %c1920 = arith.constant 1920 : index
    %157 = vector.load %arg5[%c0_38, %c1920] : memref<1x4992xf32, #tpu.memory_space<vmem>>, vector<1x128xf32>
    %158 = vector.extract_strided_slice %155 {offsets = [0, 0, 0], sizes = [1, 8, 32], strides = [1, 1, 1]} : vector<4x8x32xf32> to vector<1x8x32xf32>
    %159 = vector.shape_cast %158 : vector<1x8x32xf32> to vector<8x32xf32>
    %160 = vector.extract_strided_slice %155 {offsets = [1, 0, 0], sizes = [1, 8, 32], strides = [1, 1, 1]} : vector<4x8x32xf32> to vector<1x8x32xf32>
    %161 = vector.shape_cast %160 : vector<1x8x32xf32> to vector<8x32xf32>
    %162 = vector.extract_strided_slice %155 {offsets = [2, 0, 0], sizes = [1, 8, 32], strides = [1, 1, 1]} : vector<4x8x32xf32> to vector<1x8x32xf32>
    %163 = vector.shape_cast %162 : vector<1x8x32xf32> to vector<8x32xf32>
    %164 = vector.extract_strided_slice %155 {offsets = [3, 0, 0], sizes = [1, 8, 32], strides = [1, 1, 1]} : vector<4x8x32xf32> to vector<1x8x32xf32>
    %165 = vector.shape_cast %164 : vector<1x8x32xf32> to vector<8x32xf32>
    %166 = tpu.concatenate %159, %161, %163, %165 in 1 : vector<8x32xf32>, vector<8x32xf32>, vector<8x32xf32>, vector<8x32xf32> -> vector<8x128xf32>
    %167 = arith.truncf %166 : vector<8x128xf32> to vector<8x128xbf16>
    %cst_39 = arith.constant dense<0.000000e+00> : vector<8x128xf32>
    %168 = tpu.matmul %167, %156, %cst_39 {dimension_numbers = #tpu.dot_dimension_numbers<[1], [0], [0], [1], [0, 0, 1, 1], [], []>} : vector<8x128xbf16>, vector<128x128xbf16>, vector<8x128xf32> -> vector<8x128xf32>
    %169 = vector.broadcast %157 : vector<1x128xf32> to vector<8x128xf32>
    %170 = arith.addf %168, %169 : vector<8x128xf32>
    %171 = arith.addf %104, %170 : vector<8x128xf32>
    %c0_40 = arith.constant 0 : index
    %c3072 = arith.constant 3072 : index
    %172 = vector.load %arg5[%c0_40, %c3072] : memref<1x4992xf32, #tpu.memory_space<vmem>>, vector<1x128xf32>
    %c0_41 = arith.constant 0 : index
    %c3840 = arith.constant 3840 : index
    %173 = vector.load %arg5[%c0_41, %c3840] : memref<1x4992xf32, #tpu.memory_space<vmem>>, vector<1x128xf32>
    %cst_42 = arith.constant dense<0.000000e+00> : vector<8xf32>
    %174 = vector.multi_reduction <add>, %171, %cst_42 [1] : vector<8x128xf32> to vector<8xf32>
    %175 = vector.shape_cast %174 : vector<8xf32> to vector<8x1xf32>
    %cst_43 = arith.constant 1.280000e+02 : f32
    %176 = vector.broadcast %cst_43 : f32 to vector<8x1xf32>
    %177 = arith.divf %175, %176 : vector<8x1xf32>
    %178 = vector.broadcast %177 : vector<8x1xf32> to vector<8x128xf32>
    %179 = arith.subf %171, %178 : vector<8x128xf32>
    %180 = arith.mulf %179, %179 : vector<8x128xf32>
    %cst_44 = arith.constant dense<0.000000e+00> : vector<8xf32>
    %181 = vector.multi_reduction <add>, %180, %cst_44 [1] : vector<8x128xf32> to vector<8xf32>
    %182 = vector.shape_cast %181 : vector<8xf32> to vector<8x1xf32>
    %cst_45 = arith.constant 1.280000e+02 : f32
    %183 = vector.broadcast %cst_45 : f32 to vector<8x1xf32>
    %184 = arith.divf %182, %183 : vector<8x1xf32>
    %cst_46 = arith.constant 9.99999974E-6 : f32
    %185 = vector.broadcast %cst_46 : f32 to vector<8x1xf32>
    %186 = arith.addf %184, %185 : vector<8x1xf32>
    %187 = math.rsqrt %186 : vector<8x1xf32>
    %188 = vector.broadcast %187 : vector<8x1xf32> to vector<8x128xf32>
    %189 = arith.mulf %179, %188 : vector<8x128xf32>
    %190 = vector.broadcast %172 : vector<1x128xf32> to vector<8x128xf32>
    %191 = arith.mulf %189, %190 : vector<8x128xf32>
    %192 = vector.broadcast %173 : vector<1x128xf32> to vector<8x128xf32>
    %193 = arith.addf %191, %192 : vector<8x128xf32>
    %c0_47 = arith.constant 0 : index
    %c2048 = arith.constant 2048 : index
    %194 = vector.load %arg3[%c0_47, %c2048] : memref<128x3072xbf16, #tpu.memory_space<vmem>>, vector<128x256xbf16>
    %c0_48 = arith.constant 0 : index
    %c2176 = arith.constant 2176 : index
    %195 = vector.load %arg5[%c0_48, %c2176] : memref<1x4992xf32, #tpu.memory_space<vmem>>, vector<1x256xf32>
    %196 = arith.truncf %193 : vector<8x128xf32> to vector<8x128xbf16>
    %cst_49 = arith.constant dense<0.000000e+00> : vector<8x256xf32>
    %197 = tpu.matmul %196, %194, %cst_49 {dimension_numbers = #tpu.dot_dimension_numbers<[1], [0], [0], [1], [0, 0, 1, 1], [], []>} : vector<8x128xbf16>, vector<128x256xbf16>, vector<8x256xf32> -> vector<8x256xf32>
    %198 = vector.broadcast %195 : vector<1x256xf32> to vector<8x256xf32>
    %199 = arith.addf %197, %198 : vector<8x256xf32>
    %cst_50 = arith.constant 0.000000e+00 : f32
    %200 = vector.broadcast %cst_50 : f32 to vector<8x256xf32>
    %201 = arith.maximumf %199, %200 : vector<8x256xf32>
    %c256 = arith.constant 256 : index
    %c0_51 = arith.constant 0 : index
    %202 = vector.load %arg4[%c256, %c0_51] : memref<768x128xbf16, #tpu.memory_space<vmem>>, vector<256x128xbf16>
    %c0_52 = arith.constant 0 : index
    %c2688 = arith.constant 2688 : index
    %203 = vector.load %arg5[%c0_52, %c2688] : memref<1x4992xf32, #tpu.memory_space<vmem>>, vector<1x128xf32>
    %204 = arith.truncf %201 : vector<8x256xf32> to vector<8x256xbf16>
    %cst_53 = arith.constant dense<0.000000e+00> : vector<8x128xf32>
    %205 = tpu.matmul %204, %202, %cst_53 {dimension_numbers = #tpu.dot_dimension_numbers<[1], [0], [0], [1], [0, 0, 1, 1], [], []>} : vector<8x256xbf16>, vector<256x128xbf16>, vector<8x128xf32> -> vector<8x128xf32>
    %206 = vector.broadcast %203 : vector<1x128xf32> to vector<8x128xf32>
    %207 = arith.addf %205, %206 : vector<8x128xf32>
    %208 = arith.addf %193, %207 : vector<8x128xf32>
    %c0_54 = arith.constant 0 : index
    %c3200 = arith.constant 3200 : index
    %209 = vector.load %arg5[%c0_54, %c3200] : memref<1x4992xf32, #tpu.memory_space<vmem>>, vector<1x128xf32>
    %c0_55 = arith.constant 0 : index
    %c3968 = arith.constant 3968 : index
    %210 = vector.load %arg5[%c0_55, %c3968] : memref<1x4992xf32, #tpu.memory_space<vmem>>, vector<1x128xf32>
    %cst_56 = arith.constant dense<0.000000e+00> : vector<8xf32>
    %211 = vector.multi_reduction <add>, %208, %cst_56 [1] : vector<8x128xf32> to vector<8xf32>
    %212 = vector.shape_cast %211 : vector<8xf32> to vector<8x1xf32>
    %cst_57 = arith.constant 1.280000e+02 : f32
    %213 = vector.broadcast %cst_57 : f32 to vector<8x1xf32>
    %214 = arith.divf %212, %213 : vector<8x1xf32>
    %215 = vector.broadcast %214 : vector<8x1xf32> to vector<8x128xf32>
    %216 = arith.subf %208, %215 : vector<8x128xf32>
    %217 = arith.mulf %216, %216 : vector<8x128xf32>
    %cst_58 = arith.constant dense<0.000000e+00> : vector<8xf32>
    %218 = vector.multi_reduction <add>, %217, %cst_58 [1] : vector<8x128xf32> to vector<8xf32>
    %219 = vector.shape_cast %218 : vector<8xf32> to vector<8x1xf32>
    %cst_59 = arith.constant 1.280000e+02 : f32
    %220 = vector.broadcast %cst_59 : f32 to vector<8x1xf32>
    %221 = arith.divf %219, %220 : vector<8x1xf32>
    %cst_60 = arith.constant 9.99999974E-6 : f32
    %222 = vector.broadcast %cst_60 : f32 to vector<8x1xf32>
    %223 = arith.addf %221, %222 : vector<8x1xf32>
    %224 = math.rsqrt %223 : vector<8x1xf32>
    %225 = vector.broadcast %224 : vector<8x1xf32> to vector<8x128xf32>
    %226 = arith.mulf %216, %225 : vector<8x128xf32>
    %227 = vector.broadcast %209 : vector<1x128xf32> to vector<8x128xf32>
    %228 = arith.mulf %226, %227 : vector<8x128xf32>
    %229 = vector.broadcast %210 : vector<1x128xf32> to vector<8x128xf32>
    %230 = arith.addf %228, %229 : vector<8x128xf32>
    %c0_61 = arith.constant 0 : index
    %c384 = arith.constant 384 : index
    %231 = vector.load %arg3[%c0_61, %c384] : memref<128x3072xbf16, #tpu.memory_space<vmem>>, vector<128x384xbf16>
    %c0_62 = arith.constant 0 : index
    %c512 = arith.constant 512 : index
    %232 = vector.load %arg5[%c0_62, %c512] : memref<1x4992xf32, #tpu.memory_space<vmem>>, vector<1x384xf32>
    %233 = arith.truncf %230 : vector<8x128xf32> to vector<8x128xbf16>
    %cst_63 = arith.constant dense<0.000000e+00> : vector<8x384xf32>
    %234 = tpu.matmul %233, %231, %cst_63 {dimension_numbers = #tpu.dot_dimension_numbers<[1], [0], [0], [1], [0, 0, 1, 1], [], []>} : vector<8x128xbf16>, vector<128x384xbf16>, vector<8x384xf32> -> vector<8x384xf32>
    %235 = vector.broadcast %232 : vector<1x384xf32> to vector<8x384xf32>
    %236 = arith.addf %234, %235 : vector<8x384xf32>
    %237 = vector.extract_strided_slice %236 {offsets = [0, 0], sizes = [8, 128], strides = [1, 1]} : vector<8x384xf32> to vector<8x128xf32>
    %238 = arith.truncf %237 : vector<8x128xf32> to vector<8x128xbf16>
    %239 = vector.extract_strided_slice %238 {offsets = [0, 0], sizes = [8, 32], strides = [1, 1]} : vector<8x128xbf16> to vector<8x32xbf16>
    %240 = vector.extract_strided_slice %238 {offsets = [0, 32], sizes = [8, 32], strides = [1, 1]} : vector<8x128xbf16> to vector<8x32xbf16>
    %241 = vector.extract_strided_slice %238 {offsets = [0, 64], sizes = [8, 32], strides = [1, 1]} : vector<8x128xbf16> to vector<8x32xbf16>
    %242 = vector.extract_strided_slice %238 {offsets = [0, 96], sizes = [8, 32], strides = [1, 1]} : vector<8x128xbf16> to vector<8x32xbf16>
    %243 = vector.shape_cast %239 : vector<8x32xbf16> to vector<1x8x32xbf16>
    %244 = vector.shape_cast %240 : vector<8x32xbf16> to vector<1x8x32xbf16>
    %245 = vector.shape_cast %241 : vector<8x32xbf16> to vector<1x8x32xbf16>
    %246 = vector.shape_cast %242 : vector<8x32xbf16> to vector<1x8x32xbf16>
    %247 = tpu.concatenate %243, %244, %245, %246 in 0 : vector<1x8x32xbf16>, vector<1x8x32xbf16>, vector<1x8x32xbf16>, vector<1x8x32xbf16> -> vector<4x8x32xbf16>
    %248 = vector.extract_strided_slice %236 {offsets = [0, 128], sizes = [8, 128], strides = [1, 1]} : vector<8x384xf32> to vector<8x128xf32>
    %249 = arith.truncf %248 : vector<8x128xf32> to vector<8x128xbf16>
    %250 = vector.extract_strided_slice %249 {offsets = [0, 0], sizes = [8, 32], strides = [1, 1]} : vector<8x128xbf16> to vector<8x32xbf16>
    %251 = vector.extract_strided_slice %249 {offsets = [0, 32], sizes = [8, 32], strides = [1, 1]} : vector<8x128xbf16> to vector<8x32xbf16>
    %252 = vector.extract_strided_slice %249 {offsets = [0, 64], sizes = [8, 32], strides = [1, 1]} : vector<8x128xbf16> to vector<8x32xbf16>
    %253 = vector.extract_strided_slice %249 {offsets = [0, 96], sizes = [8, 32], strides = [1, 1]} : vector<8x128xbf16> to vector<8x32xbf16>
    %254 = vector.shape_cast %250 : vector<8x32xbf16> to vector<1x8x32xbf16>
    %255 = vector.shape_cast %251 : vector<8x32xbf16> to vector<1x8x32xbf16>
    %256 = vector.shape_cast %252 : vector<8x32xbf16> to vector<1x8x32xbf16>
    %257 = vector.shape_cast %253 : vector<8x32xbf16> to vector<1x8x32xbf16>
    %258 = tpu.concatenate %254, %255, %256, %257 in 0 : vector<1x8x32xbf16>, vector<1x8x32xbf16>, vector<1x8x32xbf16>, vector<1x8x32xbf16> -> vector<4x8x32xbf16>
    %259 = vector.extract_strided_slice %236 {offsets = [0, 256], sizes = [8, 128], strides = [1, 1]} : vector<8x384xf32> to vector<8x128xf32>
    %260 = arith.truncf %259 : vector<8x128xf32> to vector<8x128xbf16>
    %261 = vector.extract_strided_slice %260 {offsets = [0, 0], sizes = [8, 32], strides = [1, 1]} : vector<8x128xbf16> to vector<8x32xbf16>
    %262 = vector.extract_strided_slice %260 {offsets = [0, 32], sizes = [8, 32], strides = [1, 1]} : vector<8x128xbf16> to vector<8x32xbf16>
    %263 = vector.extract_strided_slice %260 {offsets = [0, 64], sizes = [8, 32], strides = [1, 1]} : vector<8x128xbf16> to vector<8x32xbf16>
    %264 = vector.extract_strided_slice %260 {offsets = [0, 96], sizes = [8, 32], strides = [1, 1]} : vector<8x128xbf16> to vector<8x32xbf16>
    %265 = vector.shape_cast %261 : vector<8x32xbf16> to vector<1x8x32xbf16>
    %266 = vector.shape_cast %262 : vector<8x32xbf16> to vector<1x8x32xbf16>
    %267 = vector.shape_cast %263 : vector<8x32xbf16> to vector<1x8x32xbf16>
    %268 = vector.shape_cast %264 : vector<8x32xbf16> to vector<1x8x32xbf16>
    %269 = tpu.concatenate %265, %266, %267, %268 in 0 : vector<1x8x32xbf16>, vector<1x8x32xbf16>, vector<1x8x32xbf16>, vector<1x8x32xbf16> -> vector<4x8x32xbf16>
    "tpu.trace_start"() <{level = 10 : i32, message = "hqe,hke->hqk"}> : () -> ()
    %cst_64 = arith.constant dense<0.000000e+00> : vector<4x8x8xf32>
    %270 = tpu.matmul %247, %258, %cst_64 {dimension_numbers = #tpu.dot_dimension_numbers<[2], [2], [1], [1], [0, 0, 0, 1, 1, 1], [0], [0]>} : vector<4x8x32xbf16>, vector<4x8x32xbf16>, vector<4x8x8xf32> -> vector<4x8x8xf32>
    "tpu.trace_stop"() : () -> ()
    %cst_65 = arith.constant dense<0xFF800000> : vector<4x8xf32>
    %271 = vector.multi_reduction <maximumf>, %270, %cst_65 [2] : vector<4x8x8xf32> to vector<4x8xf32>
    %272 = vector.shape_cast %271 : vector<4x8xf32> to vector<4x8x1xf32>
    %273 = vector.broadcast %272 : vector<4x8x1xf32> to vector<4x8x8xf32>
    %274 = arith.subf %270, %273 : vector<4x8x8xf32>
    %275 = math.exp %274 : vector<4x8x8xf32>
    %cst_66 = arith.constant dense<0.000000e+00> : vector<4x8xf32>
    %276 = vector.multi_reduction <add>, %275, %cst_66 [2] : vector<4x8x8xf32> to vector<4x8xf32>
    %277 = vector.shape_cast %276 : vector<4x8xf32> to vector<4x8x1xf32>
    %278 = tpu.reciprocal %277 {approx = true} : vector<4x8x1xf32> -> vector<4x8x1xf32>
    %279 = vector.broadcast %278 : vector<4x8x1xf32> to vector<4x8x8xf32>
    %280 = arith.mulf %275, %279 : vector<4x8x8xf32>
    %281 = arith.truncf %280 : vector<4x8x8xf32> to vector<4x8x8xbf16>
    "tpu.trace_start"() <{level = 10 : i32, message = "hqk,hke->hqe"}> : () -> ()
    %cst_67 = arith.constant dense<0.000000e+00> : vector<4x8x32xf32>
    %282 = tpu.matmul %281, %269, %cst_67 {dimension_numbers = #tpu.dot_dimension_numbers<[2], [1], [1], [2], [0, 0, 0, 1, 1, 2], [0], [0]>} : vector<4x8x8xbf16>, vector<4x8x32xbf16>, vector<4x8x32xf32> -> vector<4x8x32xf32>
    "tpu.trace_stop"() : () -> ()
    %c0_68 = arith.constant 0 : index
    %c896_69 = arith.constant 896 : index
    %283 = vector.load %arg3[%c0_68, %c896_69] : memref<128x3072xbf16, #tpu.memory_space<vmem>>, vector<128x128xbf16>
    %c0_70 = arith.constant 0 : index
    %c1024_71 = arith.constant 1024 : index
    %284 = vector.load %arg5[%c0_70, %c1024_71] : memref<1x4992xf32, #tpu.memory_space<vmem>>, vector<1x128xf32>
    %285 = vector.extract_strided_slice %282 {offsets = [0, 0, 0], sizes = [1, 8, 32], strides = [1, 1, 1]} : vector<4x8x32xf32> to vector<1x8x32xf32>
    %286 = vector.shape_cast %285 : vector<1x8x32xf32> to vector<8x32xf32>
    %287 = vector.extract_strided_slice %282 {offsets = [1, 0, 0], sizes = [1, 8, 32], strides = [1, 1, 1]} : vector<4x8x32xf32> to vector<1x8x32xf32>
    %288 = vector.shape_cast %287 : vector<1x8x32xf32> to vector<8x32xf32>
    %289 = vector.extract_strided_slice %282 {offsets = [2, 0, 0], sizes = [1, 8, 32], strides = [1, 1, 1]} : vector<4x8x32xf32> to vector<1x8x32xf32>
    %290 = vector.shape_cast %289 : vector<1x8x32xf32> to vector<8x32xf32>
    %291 = vector.extract_strided_slice %282 {offsets = [3, 0, 0], sizes = [1, 8, 32], strides = [1, 1, 1]} : vector<4x8x32xf32> to vector<1x8x32xf32>
    %292 = vector.shape_cast %291 : vector<1x8x32xf32> to vector<8x32xf32>
    %293 = tpu.concatenate %286, %288, %290, %292 in 1 : vector<8x32xf32>, vector<8x32xf32>, vector<8x32xf32>, vector<8x32xf32> -> vector<8x128xf32>
    %294 = arith.truncf %293 : vector<8x128xf32> to vector<8x128xbf16>
    %cst_72 = arith.constant dense<0.000000e+00> : vector<8x128xf32>
    %295 = tpu.matmul %294, %283, %cst_72 {dimension_numbers = #tpu.dot_dimension_numbers<[1], [0], [0], [1], [0, 0, 1, 1], [], []>} : vector<8x128xbf16>, vector<128x128xbf16>, vector<8x128xf32> -> vector<8x128xf32>
    %296 = vector.broadcast %284 : vector<1x128xf32> to vector<8x128xf32>
    %297 = arith.addf %295, %296 : vector<8x128xf32>
    %298 = arith.addf %230, %297 : vector<8x128xf32>
    %c0_73 = arith.constant 0 : index
    %c3328 = arith.constant 3328 : index
    %299 = vector.load %arg5[%c0_73, %c3328] : memref<1x4992xf32, #tpu.memory_space<vmem>>, vector<1x128xf32>
    %c0_74 = arith.constant 0 : index
    %c4096 = arith.constant 4096 : index
    %300 = vector.load %arg5[%c0_74, %c4096] : memref<1x4992xf32, #tpu.memory_space<vmem>>, vector<1x128xf32>
    %cst_75 = arith.constant dense<0.000000e+00> : vector<8xf32>
    %301 = vector.multi_reduction <add>, %298, %cst_75 [1] : vector<8x128xf32> to vector<8xf32>
    %302 = vector.shape_cast %301 : vector<8xf32> to vector<8x1xf32>
    %cst_76 = arith.constant 1.280000e+02 : f32
    %303 = vector.broadcast %cst_76 : f32 to vector<8x1xf32>
    %304 = arith.divf %302, %303 : vector<8x1xf32>
    %305 = vector.broadcast %304 : vector<8x1xf32> to vector<8x128xf32>
    %306 = arith.subf %298, %305 : vector<8x128xf32>
    %307 = arith.mulf %306, %306 : vector<8x128xf32>
    %cst_77 = arith.constant dense<0.000000e+00> : vector<8xf32>
    %308 = vector.multi_reduction <add>, %307, %cst_77 [1] : vector<8x128xf32> to vector<8xf32>
    %309 = vector.shape_cast %308 : vector<8xf32> to vector<8x1xf32>
    %cst_78 = arith.constant 1.280000e+02 : f32
    %310 = vector.broadcast %cst_78 : f32 to vector<8x1xf32>
    %311 = arith.divf %309, %310 : vector<8x1xf32>
    %cst_79 = arith.constant 9.99999974E-6 : f32
    %312 = vector.broadcast %cst_79 : f32 to vector<8x1xf32>
    %313 = arith.addf %311, %312 : vector<8x1xf32>
    %314 = math.rsqrt %313 : vector<8x1xf32>
    %315 = vector.broadcast %314 : vector<8x1xf32> to vector<8x128xf32>
    %316 = arith.mulf %306, %315 : vector<8x128xf32>
    %317 = vector.broadcast %299 : vector<1x128xf32> to vector<8x128xf32>
    %318 = arith.mulf %316, %317 : vector<8x128xf32>
    %319 = vector.broadcast %300 : vector<1x128xf32> to vector<8x128xf32>
    %320 = arith.addf %318, %319 : vector<8x128xf32>
    %c0_80 = arith.constant 0 : index
    %c1152_81 = arith.constant 1152 : index
    %321 = vector.load %arg3[%c0_80, %c1152_81] : memref<128x3072xbf16, #tpu.memory_space<vmem>>, vector<128x128xbf16>
    %c0_82 = arith.constant 0 : index
    %c1280_83 = arith.constant 1280 : index
    %322 = vector.load %arg5[%c0_82, %c1280_83] : memref<1x4992xf32, #tpu.memory_space<vmem>>, vector<1x128xf32>
    %323 = arith.truncf %320 : vector<8x128xf32> to vector<8x128xbf16>
    %cst_84 = arith.constant dense<0.000000e+00> : vector<8x128xf32>
    %324 = tpu.matmul %323, %321, %cst_84 {dimension_numbers = #tpu.dot_dimension_numbers<[1], [0], [0], [1], [0, 0, 1, 1], [], []>} : vector<8x128xbf16>, vector<128x128xbf16>, vector<8x128xf32> -> vector<8x128xf32>
    %325 = vector.broadcast %322 : vector<1x128xf32> to vector<8x128xf32>
    %326 = arith.addf %324, %325 : vector<8x128xf32>
    %327 = vector.extract_strided_slice %12 {offsets = [0, 256], sizes = [16, 128], strides = [1, 1]} : vector<16x512xf32> to vector<16x128xf32>
    %328 = vector.extract_strided_slice %12 {offsets = [0, 384], sizes = [16, 128], strides = [1, 1]} : vector<16x512xf32> to vector<16x128xf32>
    %329 = arith.truncf %326 : vector<8x128xf32> to vector<8x128xbf16>
    %330 = vector.extract_strided_slice %329 {offsets = [0, 0], sizes = [8, 32], strides = [1, 1]} : vector<8x128xbf16> to vector<8x32xbf16>
    %331 = vector.extract_strided_slice %329 {offsets = [0, 32], sizes = [8, 32], strides = [1, 1]} : vector<8x128xbf16> to vector<8x32xbf16>
    %332 = vector.extract_strided_slice %329 {offsets = [0, 64], sizes = [8, 32], strides = [1, 1]} : vector<8x128xbf16> to vector<8x32xbf16>
    %333 = vector.extract_strided_slice %329 {offsets = [0, 96], sizes = [8, 32], strides = [1, 1]} : vector<8x128xbf16> to vector<8x32xbf16>
    %334 = vector.shape_cast %330 : vector<8x32xbf16> to vector<1x8x32xbf16>
    %335 = vector.shape_cast %331 : vector<8x32xbf16> to vector<1x8x32xbf16>
    %336 = vector.shape_cast %332 : vector<8x32xbf16> to vector<1x8x32xbf16>
    %337 = vector.shape_cast %333 : vector<8x32xbf16> to vector<1x8x32xbf16>
    %338 = tpu.concatenate %334, %335, %336, %337 in 0 : vector<1x8x32xbf16>, vector<1x8x32xbf16>, vector<1x8x32xbf16>, vector<1x8x32xbf16> -> vector<4x8x32xbf16>
    %339 = arith.truncf %327 : vector<16x128xf32> to vector<16x128xbf16>
    %340 = vector.extract_strided_slice %339 {offsets = [0, 0], sizes = [16, 32], strides = [1, 1]} : vector<16x128xbf16> to vector<16x32xbf16>
    %341 = vector.extract_strided_slice %339 {offsets = [0, 32], sizes = [16, 32], strides = [1, 1]} : vector<16x128xbf16> to vector<16x32xbf16>
    %342 = vector.extract_strided_slice %339 {offsets = [0, 64], sizes = [16, 32], strides = [1, 1]} : vector<16x128xbf16> to vector<16x32xbf16>
    %343 = vector.extract_strided_slice %339 {offsets = [0, 96], sizes = [16, 32], strides = [1, 1]} : vector<16x128xbf16> to vector<16x32xbf16>
    %344 = vector.shape_cast %340 : vector<16x32xbf16> to vector<1x16x32xbf16>
    %345 = vector.shape_cast %341 : vector<16x32xbf16> to vector<1x16x32xbf16>
    %346 = vector.shape_cast %342 : vector<16x32xbf16> to vector<1x16x32xbf16>
    %347 = vector.shape_cast %343 : vector<16x32xbf16> to vector<1x16x32xbf16>
    %348 = tpu.concatenate %344, %345, %346, %347 in 0 : vector<1x16x32xbf16>, vector<1x16x32xbf16>, vector<1x16x32xbf16>, vector<1x16x32xbf16> -> vector<4x16x32xbf16>
    %349 = arith.truncf %328 : vector<16x128xf32> to vector<16x128xbf16>
    %350 = vector.extract_strided_slice %349 {offsets = [0, 0], sizes = [16, 32], strides = [1, 1]} : vector<16x128xbf16> to vector<16x32xbf16>
    %351 = vector.extract_strided_slice %349 {offsets = [0, 32], sizes = [16, 32], strides = [1, 1]} : vector<16x128xbf16> to vector<16x32xbf16>
    %352 = vector.extract_strided_slice %349 {offsets = [0, 64], sizes = [16, 32], strides = [1, 1]} : vector<16x128xbf16> to vector<16x32xbf16>
    %353 = vector.extract_strided_slice %349 {offsets = [0, 96], sizes = [16, 32], strides = [1, 1]} : vector<16x128xbf16> to vector<16x32xbf16>
    %354 = vector.shape_cast %350 : vector<16x32xbf16> to vector<1x16x32xbf16>
    %355 = vector.shape_cast %351 : vector<16x32xbf16> to vector<1x16x32xbf16>
    %356 = vector.shape_cast %352 : vector<16x32xbf16> to vector<1x16x32xbf16>
    %357 = vector.shape_cast %353 : vector<16x32xbf16> to vector<1x16x32xbf16>
    %358 = tpu.concatenate %354, %355, %356, %357 in 0 : vector<1x16x32xbf16>, vector<1x16x32xbf16>, vector<1x16x32xbf16>, vector<1x16x32xbf16> -> vector<4x16x32xbf16>
    "tpu.trace_start"() <{level = 10 : i32, message = "hqe,hke->hqk"}> : () -> ()
    %cst_85 = arith.constant dense<0.000000e+00> : vector<4x8x16xf32>
    %359 = tpu.matmul %338, %348, %cst_85 {dimension_numbers = #tpu.dot_dimension_numbers<[2], [2], [1], [1], [0, 0, 0, 1, 1, 1], [0], [0]>} : vector<4x8x32xbf16>, vector<4x16x32xbf16>, vector<4x8x16xf32> -> vector<4x8x16xf32>
    "tpu.trace_stop"() : () -> ()
    %cst_86 = arith.constant dense<0xFF800000> : vector<4x8xf32>
    %360 = vector.multi_reduction <maximumf>, %359, %cst_86 [2] : vector<4x8x16xf32> to vector<4x8xf32>
    %361 = vector.shape_cast %360 : vector<4x8xf32> to vector<4x8x1xf32>
    %362 = vector.broadcast %361 : vector<4x8x1xf32> to vector<4x8x16xf32>
    %363 = arith.subf %359, %362 : vector<4x8x16xf32>
    %364 = math.exp %363 : vector<4x8x16xf32>
    %cst_87 = arith.constant dense<0.000000e+00> : vector<4x8xf32>
    %365 = vector.multi_reduction <add>, %364, %cst_87 [2] : vector<4x8x16xf32> to vector<4x8xf32>
    %366 = vector.shape_cast %365 : vector<4x8xf32> to vector<4x8x1xf32>
    %367 = tpu.reciprocal %366 {approx = true} : vector<4x8x1xf32> -> vector<4x8x1xf32>
    %368 = vector.broadcast %367 : vector<4x8x1xf32> to vector<4x8x16xf32>
    %369 = arith.mulf %364, %368 : vector<4x8x16xf32>
    %370 = arith.truncf %369 : vector<4x8x16xf32> to vector<4x8x16xbf16>
    "tpu.trace_start"() <{level = 10 : i32, message = "hqk,hke->hqe"}> : () -> ()
    %cst_88 = arith.constant dense<0.000000e+00> : vector<4x8x32xf32>
    %371 = tpu.matmul %370, %358, %cst_88 {dimension_numbers = #tpu.dot_dimension_numbers<[2], [1], [1], [2], [0, 0, 0, 1, 1, 2], [0], [0]>} : vector<4x8x16xbf16>, vector<4x16x32xbf16>, vector<4x8x32xf32> -> vector<4x8x32xf32>
    "tpu.trace_stop"() : () -> ()
    %c0_89 = arith.constant 0 : index
    %c1920_90 = arith.constant 1920 : index
    %372 = vector.load %arg3[%c0_89, %c1920_90] : memref<128x3072xbf16, #tpu.memory_space<vmem>>, vector<128x128xbf16>
    %c0_91 = arith.constant 0 : index
    %c2048_92 = arith.constant 2048 : index
    %373 = vector.load %arg5[%c0_91, %c2048_92] : memref<1x4992xf32, #tpu.memory_space<vmem>>, vector<1x128xf32>
    %374 = vector.extract_strided_slice %371 {offsets = [0, 0, 0], sizes = [1, 8, 32], strides = [1, 1, 1]} : vector<4x8x32xf32> to vector<1x8x32xf32>
    %375 = vector.shape_cast %374 : vector<1x8x32xf32> to vector<8x32xf32>
    %376 = vector.extract_strided_slice %371 {offsets = [1, 0, 0], sizes = [1, 8, 32], strides = [1, 1, 1]} : vector<4x8x32xf32> to vector<1x8x32xf32>
    %377 = vector.shape_cast %376 : vector<1x8x32xf32> to vector<8x32xf32>
    %378 = vector.extract_strided_slice %371 {offsets = [2, 0, 0], sizes = [1, 8, 32], strides = [1, 1, 1]} : vector<4x8x32xf32> to vector<1x8x32xf32>
    %379 = vector.shape_cast %378 : vector<1x8x32xf32> to vector<8x32xf32>
    %380 = vector.extract_strided_slice %371 {offsets = [3, 0, 0], sizes = [1, 8, 32], strides = [1, 1, 1]} : vector<4x8x32xf32> to vector<1x8x32xf32>
    %381 = vector.shape_cast %380 : vector<1x8x32xf32> to vector<8x32xf32>
    %382 = tpu.concatenate %375, %377, %379, %381 in 1 : vector<8x32xf32>, vector<8x32xf32>, vector<8x32xf32>, vector<8x32xf32> -> vector<8x128xf32>
    %383 = arith.truncf %382 : vector<8x128xf32> to vector<8x128xbf16>
    %cst_93 = arith.constant dense<0.000000e+00> : vector<8x128xf32>
    %384 = tpu.matmul %383, %372, %cst_93 {dimension_numbers = #tpu.dot_dimension_numbers<[1], [0], [0], [1], [0, 0, 1, 1], [], []>} : vector<8x128xbf16>, vector<128x128xbf16>, vector<8x128xf32> -> vector<8x128xf32>
    %385 = vector.broadcast %373 : vector<1x128xf32> to vector<8x128xf32>
    %386 = arith.addf %384, %385 : vector<8x128xf32>
    %387 = arith.addf %320, %386 : vector<8x128xf32>
    %c0_94 = arith.constant 0 : index
    %c3456 = arith.constant 3456 : index
    %388 = vector.load %arg5[%c0_94, %c3456] : memref<1x4992xf32, #tpu.memory_space<vmem>>, vector<1x128xf32>
    %c0_95 = arith.constant 0 : index
    %c4224 = arith.constant 4224 : index
    %389 = vector.load %arg5[%c0_95, %c4224] : memref<1x4992xf32, #tpu.memory_space<vmem>>, vector<1x128xf32>
    %cst_96 = arith.constant dense<0.000000e+00> : vector<8xf32>
    %390 = vector.multi_reduction <add>, %387, %cst_96 [1] : vector<8x128xf32> to vector<8xf32>
    %391 = vector.shape_cast %390 : vector<8xf32> to vector<8x1xf32>
    %cst_97 = arith.constant 1.280000e+02 : f32
    %392 = vector.broadcast %cst_97 : f32 to vector<8x1xf32>
    %393 = arith.divf %391, %392 : vector<8x1xf32>
    %394 = vector.broadcast %393 : vector<8x1xf32> to vector<8x128xf32>
    %395 = arith.subf %387, %394 : vector<8x128xf32>
    %396 = arith.mulf %395, %395 : vector<8x128xf32>
    %cst_98 = arith.constant dense<0.000000e+00> : vector<8xf32>
    %397 = vector.multi_reduction <add>, %396, %cst_98 [1] : vector<8x128xf32> to vector<8xf32>
    %398 = vector.shape_cast %397 : vector<8xf32> to vector<8x1xf32>
    %cst_99 = arith.constant 1.280000e+02 : f32
    %399 = vector.broadcast %cst_99 : f32 to vector<8x1xf32>
    %400 = arith.divf %398, %399 : vector<8x1xf32>
    %cst_100 = arith.constant 9.99999974E-6 : f32
    %401 = vector.broadcast %cst_100 : f32 to vector<8x1xf32>
    %402 = arith.addf %400, %401 : vector<8x1xf32>
    %403 = math.rsqrt %402 : vector<8x1xf32>
    %404 = vector.broadcast %403 : vector<8x1xf32> to vector<8x128xf32>
    %405 = arith.mulf %395, %404 : vector<8x128xf32>
    %406 = vector.broadcast %388 : vector<1x128xf32> to vector<8x128xf32>
    %407 = arith.mulf %405, %406 : vector<8x128xf32>
    %408 = vector.broadcast %389 : vector<1x128xf32> to vector<8x128xf32>
    %409 = arith.addf %407, %408 : vector<8x128xf32>
    %c0_101 = arith.constant 0 : index
    %c2304 = arith.constant 2304 : index
    %410 = vector.load %arg3[%c0_101, %c2304] : memref<128x3072xbf16, #tpu.memory_space<vmem>>, vector<128x256xbf16>
    %c0_102 = arith.constant 0 : index
    %c2432 = arith.constant 2432 : index
    %411 = vector.load %arg5[%c0_102, %c2432] : memref<1x4992xf32, #tpu.memory_space<vmem>>, vector<1x256xf32>
    %412 = arith.truncf %409 : vector<8x128xf32> to vector<8x128xbf16>
    %cst_103 = arith.constant dense<0.000000e+00> : vector<8x256xf32>
    %413 = tpu.matmul %412, %410, %cst_103 {dimension_numbers = #tpu.dot_dimension_numbers<[1], [0], [0], [1], [0, 0, 1, 1], [], []>} : vector<8x128xbf16>, vector<128x256xbf16>, vector<8x256xf32> -> vector<8x256xf32>
    %414 = vector.broadcast %411 : vector<1x256xf32> to vector<8x256xf32>
    %415 = arith.addf %413, %414 : vector<8x256xf32>
    %cst_104 = arith.constant 0.000000e+00 : f32
    %416 = vector.broadcast %cst_104 : f32 to vector<8x256xf32>
    %417 = arith.maximumf %415, %416 : vector<8x256xf32>
    %c512_105 = arith.constant 512 : index
    %c0_106 = arith.constant 0 : index
    %418 = vector.load %arg4[%c512_105, %c0_106] : memref<768x128xbf16, #tpu.memory_space<vmem>>, vector<256x128xbf16>
    %c0_107 = arith.constant 0 : index
    %c2816 = arith.constant 2816 : index
    %419 = vector.load %arg5[%c0_107, %c2816] : memref<1x4992xf32, #tpu.memory_space<vmem>>, vector<1x128xf32>
    %420 = arith.truncf %417 : vector<8x256xf32> to vector<8x256xbf16>
    %cst_108 = arith.constant dense<0.000000e+00> : vector<8x128xf32>
    %421 = tpu.matmul %420, %418, %cst_108 {dimension_numbers = #tpu.dot_dimension_numbers<[1], [0], [0], [1], [0, 0, 1, 1], [], []>} : vector<8x256xbf16>, vector<256x128xbf16>, vector<8x128xf32> -> vector<8x128xf32>
    %422 = vector.broadcast %419 : vector<1x128xf32> to vector<8x128xf32>
    %423 = arith.addf %421, %422 : vector<8x128xf32>
    %424 = arith.addf %409, %423 : vector<8x128xf32>
    %c0_109 = arith.constant 0 : index
    %c3584 = arith.constant 3584 : index
    %425 = vector.load %arg5[%c0_109, %c3584] : memref<1x4992xf32, #tpu.memory_space<vmem>>, vector<1x128xf32>
    %c0_110 = arith.constant 0 : index
    %c4352 = arith.constant 4352 : index
    %426 = vector.load %arg5[%c0_110, %c4352] : memref<1x4992xf32, #tpu.memory_space<vmem>>, vector<1x128xf32>
    %cst_111 = arith.constant dense<0.000000e+00> : vector<8xf32>
    %427 = vector.multi_reduction <add>, %424, %cst_111 [1] : vector<8x128xf32> to vector<8xf32>
    %428 = vector.shape_cast %427 : vector<8xf32> to vector<8x1xf32>
    %cst_112 = arith.constant 1.280000e+02 : f32
    %429 = vector.broadcast %cst_112 : f32 to vector<8x1xf32>
    %430 = arith.divf %428, %429 : vector<8x1xf32>
    %431 = vector.broadcast %430 : vector<8x1xf32> to vector<8x128xf32>
    %432 = arith.subf %424, %431 : vector<8x128xf32>
    %433 = arith.mulf %432, %432 : vector<8x128xf32>
    %cst_113 = arith.constant dense<0.000000e+00> : vector<8xf32>
    %434 = vector.multi_reduction <add>, %433, %cst_113 [1] : vector<8x128xf32> to vector<8xf32>
    %435 = vector.shape_cast %434 : vector<8xf32> to vector<8x1xf32>
    %cst_114 = arith.constant 1.280000e+02 : f32
    %436 = vector.broadcast %cst_114 : f32 to vector<8x1xf32>
    %437 = arith.divf %435, %436 : vector<8x1xf32>
    %cst_115 = arith.constant 9.99999974E-6 : f32
    %438 = vector.broadcast %cst_115 : f32 to vector<8x1xf32>
    %439 = arith.addf %437, %438 : vector<8x1xf32>
    %440 = math.rsqrt %439 : vector<8x1xf32>
    %441 = vector.broadcast %440 : vector<8x1xf32> to vector<8x128xf32>
    %442 = arith.mulf %432, %441 : vector<8x128xf32>
    %443 = vector.broadcast %425 : vector<1x128xf32> to vector<8x128xf32>
    %444 = arith.mulf %442, %443 : vector<8x128xf32>
    %445 = vector.broadcast %426 : vector<1x128xf32> to vector<8x128xf32>
    %446 = arith.addf %444, %445 : vector<8x128xf32>
    %c0_116 = arith.constant 0 : index
    %c2560 = arith.constant 2560 : index
    %447 = vector.load %arg3[%c0_116, %c2560] : memref<128x3072xbf16, #tpu.memory_space<vmem>>, vector<128x512xbf16>
    %c0_117 = arith.constant 0 : index
    %c4480 = arith.constant 4480 : index
    %448 = vector.load %arg5[%c0_117, %c4480] : memref<1x4992xf32, #tpu.memory_space<vmem>>, vector<1x512xf32>
    %449 = arith.truncf %446 : vector<8x128xf32> to vector<8x128xbf16>
    %cst_118 = arith.constant dense<0.000000e+00> : vector<8x512xf32>
    %450 = tpu.matmul %449, %447, %cst_118 {dimension_numbers = #tpu.dot_dimension_numbers<[1], [0], [0], [1], [0, 0, 1, 1], [], []>} : vector<8x128xbf16>, vector<128x512xbf16>, vector<8x512xf32> -> vector<8x512xf32>
    %451 = vector.broadcast %448 : vector<1x512xf32> to vector<8x512xf32>
    %452 = arith.addf %450, %451 : vector<8x512xf32>
    %453 = vector.shape_cast %452 : vector<8x512xf32> to vector<1x8x512xf32>
    %c0_119 = arith.constant 0 : index
    %c0_120 = arith.constant 0 : index
    %c0_121 = arith.constant 0 : index
    %454 = vector.load %arg6[%c0_119, %c0_120, %c0_121] : memref<1x8x512xf32, #tpu.memory_space<vmem>>, vector<1x8x512xf32>
    tpu.vector_store %arg6[%c0_119, %c0_120, %c0_121], %453 {strides = array<i32>} : memref<1x8x512xf32, #tpu.memory_space<vmem>>, vector<1x8x512xf32>,
    return
  }
  func.func @transform_0(%arg0: i32) -> (i32, i32, i32) {
    %c0_i32 = arith.constant 0 : i32
    %c0_i32_0 = arith.constant 0 : i32
    %c0_i32_1 = arith.constant 0 : i32
    return %arg0, %c0_i32, %c0_i32_0 : i32, i32, i32
  }
  func.func @transform_1(%arg0: i32) -> (i32, i32, i32) {
    %c0_i32 = arith.constant 0 : i32
    %c0_i32_0 = arith.constant 0 : i32
    %c0_i32_1 = arith.constant 0 : i32
    return %arg0, %c0_i32, %c0_i32_0 : i32, i32, i32
  }
  func.func @transform_2(%arg0: i32) -> (i32, i32) {
    %c0_i32 = arith.constant 0 : i32
    %c0_i32_0 = arith.constant 0 : i32
    %c0_i32_1 = arith.constant 0 : i32
    return %c0_i32, %c0_i32_0 : i32, i32
  }
  func.func @transform_3(%arg0: i32) -> (i32, i32) {
    %c0_i32 = arith.constant 0 : i32
    %c0_i32_0 = arith.constant 0 : i32
    %c0_i32_1 = arith.constant 0 : i32
    return %c0_i32, %c0_i32_0 : i32, i32
  }
  func.func @transform_4(%arg0: i32) -> (i32, i32) {
    %c0_i32 = arith.constant 0 : i32
    %c0_i32_0 = arith.constant 0 : i32
    %c0_i32_1 = arith.constant 0 : i32
    return %c0_i32, %c0_i32_0 : i32, i32
  }
  func.func @transform_5(%arg0: i32) -> (i32, i32, i32) {
    %c0_i32 = arith.constant 0 : i32
    %c0_i32_0 = arith.constant 0 : i32
    %c0_i32_1 = arith.constant 0 : i32
    return %arg0, %c0_i32, %c0_i32_0 : i32, i32, i32
  }
}

</mosaic_0001>

<bundles_post_ra>
// kernel: image_caption_forward.1
= control target key start
LH: loop header
LB: loop body
LE: loop exit
PB: predicated region body
PF: predicated region fallthrough
CT: control target
= control target key end

     0   :  { %10 = vsyncpa [#allocation3], 0  ;;  %s7039_s0 = inlined_call_operand.vmem [shape: bf16[2,16,256], index: 0, kind: input, shape index: {}]   ;;  %s7040_s1 = inlined_call_operand.vmem [shape: f32[2,8,128], index: 1, kind: input, shape index: {}]   ;;  %s7041_s2 = inlined_call_operand.vmem [shape: bf16[128,3072], index: 2, kind: input, shape index: {}]   ;;  %s7042_s3 = inlined_call_operand.vmem [shape: bf16[768,128], index: 3, kind: input, shape index: {}]   ;;  %s7043_s4 = inlined_call_operand.vmem [shape: f32[1,4992], index: 4, kind: input, shape index: {}]   ;;  %s7044_s5 = inlined_call_operand.hbm [shape: f32[2,8,512], index: 5, kind: output, shape index: {}]  }
   0x1   :  { %12 = vsyncpa [#allocation3 + $0x1], 0  ;;  %s5227_s18 = smov 0   ;;  %s5229_s19 = smov 0  }
   0x2   :  { %s5231_s20 = smov 0   ;;  %s5233_s21 = smov 0  }
   0x3 LB: > { %s5248_s22 = sadd.s32 4294967295, %s5191_s21   ;;  %s3729_s23 = sadd.s32 4294967294, %s5191_s21   ;;  %s5191_s21 = sphi %s5233_s21, %s7050_s21   ;;  %s5187_s20 = sphi %s5231_s20, %s7049_s20   ;;  %s5183_s19 = sphi %s5229_s19, %s7048_s19   ;;  %s5179_s18 = sphi %s5227_s18, %s7047_s18  }
   0x4   : > { %s5252_s24 = sadd.s32 1, %s5191_s21   ;;  %s140_s25 = sadd.s32 1, %s5187_s20 }
   0x5   : > { %s137_s26 = ssub.s32 %s5191_s21, %s5252_s24  ;;  %p150_p0 = scmp.ne.s32.totalorder %s5187_s20, %s5183_s19 }
   0x6   : > { %p138_p1 = scmp.eq.s32.totalorder %s137_s26, 0  ;;  %p151_p2 = scmp.eq.s32.totalorder %s5248_s22, 1 }
   0x7   : > { %p156_p3 = scmp.ne.s32.totalorder %s5183_s19, %s5179_s18  ;;  %p157_p4 = scmp.eq.s32.totalorder %s3729_s23, 1 }
   0x8   : > { %s5263_s27 = scalar_select %p138_p1, %s5187_s20, %s140_s25  }
   0x9   : > { %p5265_p5 = por %p151_p2, %p150_p0  ;;  %p5269_p6 = por %p157_p4, %p156_p3 }
   0xa   : > { %p3732_p7 = scmp.ge.s32.totalorder %s5191_s21, 1  ;;  %p199_p8 = scmp.lt.s32.totalorder %s5191_s21, 3 }
   0xc   : > { %p200_p9 = pnand %p3732_p7, %p199_p8 }
   0xd   : > { %p231_p10 = scmp.lt.s32.totalorder (!%p200_p9), %s5248_s22, 1  ;;  %s5193_s15 = smov (!%p200_p9), 64  }
   0xe   : > { %203 = sbr.rel (%p200_p9) target bundleno = 6700 (0x1a2c), region = 40  ;;  %s5194_s16 = smov (!%p200_p9), 96  }
   0xf   : > { %s5195_s17 = smov (!%p200_p9), 32   ;;  %s228_s26 = sand.u32 (!%p200_p9), 1, %s5183_s19  }
  0x10   : > { %s3733_s8 = sshll.u32 (!%p200_p9), %s228_s26, 5  ;;  %s4985_s9 = sshll.u32 (!%p200_p9), %s5248_s22, 5 }
  0x11   : > { %s3653_s10 = scalar_lea.hbm (!%p200_p9), %s7044_s5, %s4985_s9 }
  0x13   : > { %v4752_v0 = vld [vmem:[%s7042_s3 + $0x38] sm:$0xff]  ;;  %v4751_v2 = vld [vmem:[%s7042_s3 + $0x30] sm:$0xff]  ;;  %v3923_v4 = vld [vmem:[%s7041_s2 + $0x568] sm:$0xf]  ;;  %s5349_s30 = scalar_select %p231_p10, %s5248_s22, 1  ;;  %vm905_vm0 = vcmask 261120  }
  0x14   : > { %v4760_v1 = vld [vmem:[%s7042_s3 + $0x78] sm:$0xff]  ;;  %385 = vmatpush.bf16.msra.mxu0 %v4752_v0  ;;  %v4759_v3 = vld [vmem:[%s7042_s3 + $0x70] sm:$0xff]  ;;  %v4791_v5 = vld [vmem:[%s7041_s2 + $0x5c4] sm:$0xf0]  ;;  %vm982_vm1 = vcmask 64512   ;;  %vm1034_vm2 = vcmask 1043456  }
  0x15   : > { %399 = vmatpush.bf16.msra.mxu1 %v4760_v1  ;;  %v4750_v6 = vld [vmem:[%s7042_s3 + $0x28] sm:$0xff]  ;;  %v3924_v8 = vor.u32 %v4791_v5, %v3923_v4  ;;  %v4749_v19 = vld [vmem:[%s7042_s3 + $0x20] sm:$0xff]  ;;  %v4748_v27 = vld [vmem:[%s7042_s3 + $0x18] sm:$0xff]  ;;  %s4742_s23 = sshll.u32 %s5349_s30, 4  ;;  %vm1138_vm3 = vcmask 523264   ;;  %vm1140_vm4 = vcmask 785408  }
  0x16   : > { %v4758_v7 = vld [vmem:[%s7042_s3 + $0x68] sm:$0xff]  ;;  %v4757_v20 = vld [vmem:[%s7042_s3 + $0x60] sm:$0xff]  ;;  %v4756_v28 = vld [vmem:[%s7042_s3 + $0x58] sm:$0xff]  ;;  %s235_s14 = scalar_lea.vmem %s7039_s0, %s4742_s23  ;;  %s3736_s23 = sshll.u32 %s5349_s30, 3  ;;  %vm1455_vm9 = vcmask 130048  }
  0x17   : > { %v4789_v9 = vld [vmem:[%s7041_s2 + $0x56c] sm:$0xf]  ;;  %616 = vmatpush.bf16.msra.mxu2 %v3924_v8  ;;  %v3907_v12 = vld [vmem:[%s7041_s2 + $0x4a8] sm:$0xf]  ;;  %v4747_v35 = vld [vmem:[%s7042_s3 + $0x10] sm:$0xff]  ;;  %s239_s12 = scalar_lea.vmem %s7040_s1, %s3736_s23  ;;  %s3642_s22 = scalar_lea.sflag [#allocation3], %s228_s26 }
  0x18   : > { %386 = vmatpush.bf16.msra.mxu0 %v4751_v2  ;;  %v3925_v10 = vld [vmem:[%s7041_s2 + $0x5c8] sm:$0xf0]  ;;  %v4787_v13 = vld [vmem:[%s7041_s2 + $0x504] sm:$0xf0]  ;;  %v4755_v36 = vld [vmem:[%s7042_s3 + $0x50] sm:$0xff] }
  0x19   : > { %400 = vmatpush.bf16.msra.mxu1 %v4759_v3  ;;  %v3928_v11 = vor.u32 %v4789_v9, %v3925_v10  ;;  %v4785_v14 = vld [vmem:[%s7041_s2 + $0x4ac] sm:$0xf]  ;;  %v3908_v15 = vor.u32 %v4787_v13, %v3907_v12  ;;  %v3891_v17 = vld [vmem:[%s7041_s2 + $0x3e8] sm:$0xf]  ;;  %v3931_v45 = vld [vmem:[%s7041_s2 + $0x570] sm:$0xf] }
  0x1a   : > { %v3909_v16 = vld [vmem:[%s7041_s2 + $0x508] sm:$0xf0]  ;;  %v4783_v18 = vld [vmem:[%s7041_s2 + $0x444] sm:$0xf0]  ;;  %v4792_v46 = vld [vmem:[%s7041_s2 + $0x5cc] sm:$0xf0] }
  0x1b   : > { %630 = vmatpush.bf16.msra.mxu3 %v3928_v11  ;;  %v3912_v21 = vor.u32 %v4785_v14, %v3909_v16  ;;  %617 = vmatpush.bf16.msra.mxu2 %v3908_v15  ;;  %v3892_v22 = vor.u32 %v4783_v18, %v3891_v17  ;;  %v4781_v23 = vld [vmem:[%s7041_s2 + $0x3ec] sm:$0xf]  ;;  %v3875_v25 = vld [vmem:[%s7041_s2 + $0x328] sm:$0xf]  ;;  %v4790_v47 = vld [vmem:[%s7041_s2 + $0x574] sm:$0xf]  ;;  %v3932_v1 = vor.u32 %v4792_v46, %v3931_v45 }
  0x1c   : > { %387 = vmatpush.bf16.msra.mxu0 %v4750_v6  ;;  %v3893_v24 = vld [vmem:[%s7041_s2 + $0x448] sm:$0xf0]  ;;  %v4779_v26 = vld [vmem:[%s7041_s2 + $0x384] sm:$0xf0]  ;;  %v3933_v48 = vld [vmem:[%s7041_s2 + $0x5d0] sm:$0xf0] }
  0x1d   : > { %401 = vmatpush.bf16.msra.mxu1 %v4758_v7  ;;  %v3896_v29 = vor.u32 %v4781_v23, %v3893_v24  ;;  %v3876_v30 = vor.u32 %v4779_v26, %v3875_v25  ;;  %v4777_v31 = vld [vmem:[%s7041_s2 + $0x32c] sm:$0xf]  ;;  %v3859_v33 = vld [vmem:[%s7041_s2 + $0x268] sm:$0xf]  ;;  %v4745_v54 = vld [vmem:[%s7042_s3] sm:$0xff]  ;;  %v3936_v2 = vor.u32 %v4790_v47, %v3933_v48 }
  0x1e   : > { %v3877_v32 = vld [vmem:[%s7041_s2 + $0x388] sm:$0xf0]  ;;  %v4775_v34 = vld [vmem:[%s7041_s2 + $0x2c4] sm:$0xf0]  ;;  %v4753_v55 = vld [vmem:[%s7042_s3 + $0x40] sm:$0xff] }
  0x1f   : > { %631 = vmatpush.bf16.msra.mxu3 %v3912_v21  ;;  %618 = vmatpush.bf16.msra.mxu2 %v3892_v22  ;;  %v3880_v37 = vor.u32 %v4777_v31, %v3877_v32  ;;  %v4746_v38 = vld [vmem:[%s7042_s3 + $0x8] sm:$0xff]  ;;  %v3860_v39 = vor.u32 %v4775_v34, %v3859_v33  ;;  %v3739_v56 = vld [vmem:[%s235_s14] sm:$0xf]  ;;  %v4743_v58 = vld [vmem:[%s235_s14 + $0x4] sm:$0xf] }
  0x20   : > { %388 = vmatpush.bf16.msra.mxu0 %v4749_v19  ;;  %v4773_v40 = vld [vmem:[%s7041_s2 + $0x26c] sm:$0xf]  ;;  %v3843_v43 = vld [vmem:[%s7041_s2 + $0x1a8] sm:$0xf]  ;;  %v3915_v61 = vld [vmem:[%s7041_s2 + $0x4b0] sm:$0xf] }
  0x21   : > { %402 = vmatpush.bf16.msra.mxu1 %v4757_v20  ;;  %v3861_v41 = vld [vmem:[%s7041_s2 + $0x2c8] sm:$0xf0]  ;;  %v4771_v44 = vld [vmem:[%s7041_s2 + $0x204] sm:$0xf0]  ;;  %v4788_v62 = vld [vmem:[%s7041_s2 + $0x50c] sm:$0xf0] }
  0x22   : > { %v4754_v42 = vld [vmem:[%s7042_s3 + $0x48] sm:$0xff]  ;;  %v3864_v49 = vor.u32 %v4773_v40, %v3861_v41  ;;  %v3844_v60 = vor.u32 %v4771_v44, %v3843_v43  ;;  %v4786_v63 = vld [vmem:[%s7041_s2 + $0x4b4] sm:$0xf]  ;;  %v3916_v11 = vor.u32 %v4788_v62, %v3915_v61  ;;  %v3899_v13 = vld [vmem:[%s7041_s2 + $0x3f0] sm:$0xf] }
  0x23   : > { %632 = vmatpush.bf16.msra.mxu3 %v3896_v29  ;;  %619 = vmatpush.bf16.msra.mxu2 %v3876_v30  ;;  %v4769_v50 = vld [vmem:[%s7041_s2 + $0x1ac] sm:$0xf]  ;;  %v3827_v52 = vld [vmem:[%s7041_s2 + $0xe8] sm:$0xf]  ;;  %v3917_v0 = vld [vmem:[%s7041_s2 + $0x510] sm:$0xf0] }
  0x24   : > { %389 = vmatpush.bf16.msra.mxu0 %v4748_v27  ;;  %v3845_v51 = vld [vmem:[%s7041_s2 + $0x208] sm:$0xf0]  ;;  %v4767_v53 = vld [vmem:[%s7041_s2 + $0x144] sm:$0xf0]  ;;  %v3920_v12 = vor.u32 %v4786_v63, %v3917_v0  ;;  %v4784_v14 = vld [vmem:[%s7041_s2 + $0x44c] sm:$0xf0] }
  0x25   : > { %403 = vmatpush.bf16.msra.mxu1 %v4756_v28  ;;  %v4744_v57 = vld [vmem:[%s235_s14 + $0x4] sm:$0xf0]  ;;  %v3741_v59 = vld [vmem:[%s235_s14 + $0x8] sm:$0xf0]  ;;  %v3848_v7 = vor.u32 %v4769_v50, %v3845_v51  ;;  %v3828_v8 = vor.u32 %v4767_v53, %v3827_v52  ;;  %v4782_v15 = vld [vmem:[%s7041_s2 + $0x3f4] sm:$0xf]  ;;  %v3900_v21 = vor.u32 %v4784_v14, %v3899_v13 }
  0x26   : > { %v4765_v3 = vld [vmem:[%s7041_s2 + $0xec] sm:$0xf]  ;;  %v3811_v5 = vld [vmem:[%s7041_s2 + $0x28] sm:$0xf]  ;;  %v3740_v9 = vor.u32 %v4744_v57, %v3739_v56  ;;  %v3744_v10 = vor.u32 %v4743_v58, %v3741_v59  ;;  %v3901_v16 = vld [vmem:[%s7041_s2 + $0x450] sm:$0xf0] }
  0x27   : > { %633 = vmatpush.bf16.msra.mxu3 %v3880_v37  ;;  %620 = vmatpush.bf16.msra.mxu2 %v3860_v39  ;;  %v3829_v4 = vld [vmem:[%s7041_s2 + $0x148] sm:$0xf0]  ;;  %v4763_v6 = vld [vmem:[%s7041_s2 + $0x84] sm:$0xf0]  ;;  %v3904_v22 = vor.u32 %v4782_v15, %v3901_v16  ;;  %v3883_v23 = vld [vmem:[%s7041_s2 + $0x330] sm:$0xf] }
  0x28   : > { %390 = vmatpush.bf16.msra.mxu0 %v4747_v35  ;;  %v3832_v17 = vor.u32 %v4765_v3, %v3829_v4  ;;  %v3812_v18 = vor.u32 %v4763_v6, %v3811_v5  ;;  %v4761_v19 = vld [vmem:[%s7041_s2 + $0x2c] sm:$0xf]  ;;  %v4780_v24 = vld [vmem:[%s7041_s2 + $0x38c] sm:$0xf0]  ;;  %v4778_v25 = vld [vmem:[%s7041_s2 + $0x334] sm:$0xf] }
  0x29   : > { %404 = vmatpush.bf16.msra.mxu1 %v4755_v36  ;;  %v3813_v20 = vld [vmem:[%s7041_s2 + $0x88] sm:$0xf0]  ;;  %v3885_v26 = vld [vmem:[%s7041_s2 + $0x390] sm:$0xf0]  ;;  %v3884_v28 = vor.u32 %v4780_v24, %v3883_v23  ;;  %v3867_v30 = vld [vmem:[%s7041_s2 + $0x270] sm:$0xf] }
  0x2a   : > { %v3816_v27 = vor.u32 %v4761_v19, %v3813_v20  ;;  %v3888_v29 = vor.u32 %v4778_v25, %v3885_v26  ;;  %v4776_v31 = vld [vmem:[%s7041_s2 + $0x2cc] sm:$0xf0]  ;;  %v4774_v32 = vld [vmem:[%s7041_s2 + $0x274] sm:$0xf]  ;;  %v4023_v35 = vld [vmem:[%s7041_s2 + $0x540] sm:$0xf] }
  0x2b   : > { %634 = vmatpush.bf16.msra.mxu3 %v3864_v49  ;;  %621 = vmatpush.bf16.msra.mxu2 %v3844_v60  ;;  %v3868_v33 = vor.u32 %v4776_v31, %v3867_v30  ;;  %v3869_v34 = vld [vmem:[%s7041_s2 + $0x2d0] sm:$0xf0]  ;;  %v4815_v36 = vld [vmem:[%s7041_s2 + $0x59c] sm:$0xf0]  ;;  %v4814_v39 = vld [vmem:[%s7041_s2 + $0x544] sm:$0xf] }
  0x2c   : > { %391 = vmatpush.bf16.msra.mxu0 %v4746_v38  ;;  %v3872_v37 = vor.u32 %v4774_v32, %v3869_v34  ;;  %v4024_v38 = vor.u32 %v4815_v36, %v4023_v35  ;;  %v4025_v40 = vld [vmem:[%s7041_s2 + $0x5a0] sm:$0xf0]  ;;  %v4772_v43 = vld [vmem:[%s7041_s2 + $0x20c] sm:$0xf0]  ;;  %v4770_v44 = vld [vmem:[%s7041_s2 + $0x1b4] sm:$0xf] }
  0x2d   : > { %405 = vmatpush.bf16.msra.mxu1 %v4754_v42  ;;  %v4028_v41 = vor.u32 %v4814_v39, %v4025_v40  ;;  %v3851_v42 = vld [vmem:[%s7041_s2 + $0x1b0] sm:$0xf]  ;;  %v3853_v46 = vld [vmem:[%s7041_s2 + $0x210] sm:$0xf0]  ;;  %v4011_v47 = vld [vmem:[%s7041_s2 + $0x480] sm:$0xf] }
  0x2e   : > { %v3852_v45 = vor.u32 %v4772_v43, %v3851_v42  ;;  %v4812_v48 = vld [vmem:[%s7041_s2 + $0x4dc] sm:$0xf0]  ;;  %v3856_v49 = vor.u32 %v4770_v44, %v3853_v46  ;;  %v4811_v51 = vld [vmem:[%s7041_s2 + $0x484] sm:$0xf]  ;;  %v4766_v56 = vld [vmem:[%s7041_s2 + $0xf4] sm:$0xf] }
  0x2f   : > { %635 = vmatpush.bf16.msra.mxu3 %v3848_v7  ;;  %622 = vmatpush.bf16.msra.mxu2 %v3828_v8  ;;  %v4012_v50 = vor.u32 %v4812_v48, %v4011_v47  ;;  %v4013_v52 = vld [vmem:[%s7041_s2 + $0x4e0] sm:$0xf0]  ;;  %v3837_v58 = vld [vmem:[%s7041_s2 + $0x150] sm:$0xf0]  ;;  %v3999_v59 = vld [vmem:[%s7041_s2 + $0x3c0] sm:$0xf] }
  0x30   : > { %392 = vmatpush.bf16.msra.mxu0 %v4745_v54  ;;  %v4016_v53 = vor.u32 %v4811_v51, %v4013_v52  ;;  %v3835_v54 = vld [vmem:[%s7041_s2 + $0xf0] sm:$0xf]  ;;  %v4809_v60 = vld [vmem:[%s7041_s2 + $0x41c] sm:$0xf0]  ;;  %v3840_v61 = vor.u32 %v4766_v56, %v3837_v58  ;;  %v4808_v63 = vld [vmem:[%s7041_s2 + $0x3c4] sm:$0xf] }
  0x31   : > { %406 = vmatpush.bf16.msra.mxu1 %v4753_v55  ;;  %v4768_v55 = vld [vmem:[%s7041_s2 + $0x14c] sm:$0xf0]  ;;  %v4000_v62 = vor.u32 %v4809_v60, %v3999_v59  ;;  %v4001_v0 = vld [vmem:[%s7041_s2 + $0x420] sm:$0xf0]  ;;  %v4762_v4 = vld [vmem:[%s7041_s2 + $0x34] sm:$0xf] }
  0x32   : > { %v3836_v57 = vor.u32 %v4768_v55, %v3835_v54  ;;  %v4764_v3 = vld [vmem:[%s7041_s2 + $0x8c] sm:$0xf0]  ;;  %v3821_v6 = vld [vmem:[%s7041_s2 + $0x90] sm:$0xf0]  ;;  %v3987_v7 = vld [vmem:[%s7041_s2 + $0x300] sm:$0xf] }
  0x33   : > { %393 = vmatmul.bf16.vlgmr.msra.gmra.mxu0 %v3740_v9  ;;  %636 = vmatpush.bf16.msra.mxu3 %v3832_v17  ;;  %v4806_v8 = vld [vmem:[%s7041_s2 + $0x35c] sm:$0xf0]  ;;  %v3824_v9 = vor.u32 %v4762_v4, %v3821_v6  ;;  %v4802_v16 = vld [vmem:[%s7041_s2 + $0x244] sm:$0xf]  ;;  %v4019_v4 = vld [vmem:[%s7041_s2 + $0x488] sm:$0xf] }
  0x34   : > { %644 = vmatpush.bf16.msrb.mxu0 %v3932_v1  ;;  %407 = vmatmul.bf16.vlgmr.msra.gmra.mxu1 %v3744_v10  ;;  %v4004_v1 = vor.u32 %v4808_v63, %v4001_v0  ;;  %v3988_v10 = vor.u32 %v4806_v8, %v3987_v7  ;;  %v3975_v14 = vld [vmem:[%s7041_s2 + $0x240] sm:$0xf]  ;;  %v3965_v24 = vld [vmem:[%s7041_s2 + $0x1e0] sm:$0xf0]  ;;  %v4813_v6 = vld [vmem:[%s7041_s2 + $0x4e4] sm:$0xf0] }
  0x35   : > { %658 = vmatpush.bf16.msrb.mxu1 %v3936_v2  ;;  %623 = vmatpush.bf16.msra.mxu2 %v3812_v18  ;;  %v3819_v2 = vld [vmem:[%s7041_s2 + $0x30] sm:$0xf]  ;;  %v4803_v15 = vld [vmem:[%s7041_s2 + $0x29c] sm:$0xf0]  ;;  %v3977_v18 = vld [vmem:[%s7041_s2 + $0x2a0] sm:$0xf0]  ;;  %v4020_v7 = vor.u32 %v4813_v6, %v4019_v4 }
  0x36   : > { %v3820_v5 = vor.u32 %v4764_v3, %v3819_v2  ;;  %v3976_v17 = vor.u32 %v4803_v15, %v3975_v14  ;;  %v3980_v19 = vor.u32 %v4802_v16, %v3977_v18  ;;  %v3963_v20 = vld [vmem:[%s7041_s2 + $0x180] sm:$0xf]  ;;  %v4793_v34 = vld [vmem:[%s7041_s2 + $0x4] sm:$0xf]  ;;  %v4031_v2 = vld [vmem:[%s7041_s2 + $0x548] sm:$0xf] }
  0x37   : > { %637 = vmatpush.bf16.msra.mxu3 %v3816_v27  ;;  %v3951_v26 = vld [vmem:[%s7041_s2 + $0xc0] sm:$0xf]  ;;  %v3941_v35 = vld [vmem:[%s7041_s2 + $0x60] sm:$0xf0]  ;;  %v4816_v3 = vld [vmem:[%s7041_s2 + $0x5a4] sm:$0xf0] }
  0x38   : > { %645 = vmatpush.bf16.msrb.mxu0 %v3916_v11  ;;  %v4805_v11 = vld [vmem:[%s7041_s2 + $0x304] sm:$0xf]  ;;  %v4797_v27 = vld [vmem:[%s7041_s2 + $0x11c] sm:$0xf0]  ;;  %v3995_v16 = vld [vmem:[%s7041_s2 + $0x308] sm:$0xf] }
  0x39   : > { %659 = vmatpush.bf16.msrb.mxu1 %v3920_v12  ;;  %842 = vmatpush.bf16.msrb.mxu2 %v4024_v38  ;;  %v3989_v12 = vld [vmem:[%s7041_s2 + $0x360] sm:$0xf0]  ;;  %v3952_v30 = vor.u32 %v4797_v27, %v3951_v26  ;;  %v3939_v32 = vld [vmem:[%s7041_s2] sm:$0xf]  ;;  %v3971_v27 = vld [vmem:[%s7041_s2 + $0x188] sm:$0xf] }
  0x3a   : > { %v3992_v13 = vor.u32 %v4805_v11, %v3989_v12  ;;  %v5029_v40 = vld [vmem:[%s7043_s4] ss:$0 sm:$0xff]  ;;  %v5645_v54 = vld [vmem:[%s7043_s4 + $0x1] sm:$0x7]  ;;  %v4810_v11 = vld [vmem:[%s7041_s2 + $0x424] sm:$0xf0] }
  0x3b   : > { %855 = vmatpush.bf16.msrb.mxu3 %v4028_v41  ;;  %v5626_v48 = vld [vmem:[%s239_s12] sm:$0xff]  ;;  %v708_v55 = vperm.slane %v5645_v54, 0  ;;  %v709_v56 = vperm.slane %v5645_v54, 1  ;;  %s5149_s14 = scalar_lea.hbm %s7044_s5, 64 }
  0x3c   : > { %646 = vmatpush.bf16.msrb.mxu0 %v3900_v21  ;;  %v4800_v21 = vld [vmem:[%s7041_s2 + $0x1dc] sm:$0xf0] }
  0x3d   : > { %660 = vmatpush.bf16.msrb.mxu1 %v3904_v22  ;;  %843 = vmatpush.bf16.msrb.mxu2 %v4012_v50  ;;  %v4799_v22 = vld [vmem:[%s7041_s2 + $0x184] sm:$0xf]  ;;  %v3964_v23 = vor.u32 %v4800_v21, %v3963_v20 }
  0x3e   : > { %v3968_v25 = vor.u32 %v4799_v22, %v3965_v24  ;;  %v3983_v22 = vld [vmem:[%s7041_s2 + $0x248] sm:$0xf] }
  0x3f   : > { %856 = vmatpush.bf16.msrb.mxu3 %v4016_v53 }
  0x40   : > { %647 = vmatpush.bf16.msrb.mxu0 %v3884_v28  ;;  %v4796_v28 = vld [vmem:[%s7041_s2 + $0xc4] sm:$0xf] }
  0x41   : > { %661 = vmatpush.bf16.msrb.mxu1 %v3888_v29  ;;  %844 = vmatpush.bf16.msrb.mxu2 %v4000_v62  ;;  %v3953_v29 = vld [vmem:[%s7041_s2 + $0x120] sm:$0xf0] }
  0x42   : > { %v3956_v31 = vor.u32 %v4796_v28, %v3953_v29  ;;  %v4801_v28 = vld [vmem:[%s7041_s2 + $0x1e4] sm:$0xf0] }
  0x43   : > { %857 = vmatpush.bf16.msrb.mxu3 %v4004_v1  ;;  %v3972_v29 = vor.u32 %v4801_v28, %v3971_v27 }
  0x44   : > { %648 = vmatpush.bf16.msrb.mxu0 %v3868_v33  ;;  %v4794_v33 = vld [vmem:[%s7041_s2 + $0x5c] sm:$0xf0] }
  0x45   : > { %662 = vmatpush.bf16.msrb.mxu1 %v3872_v37  ;;  %845 = vmatpush.bf16.msrb.mxu2 %v3988_v10  ;;  %v3940_v36 = vor.u32 %v4794_v33, %v3939_v32  ;;  %v3944_v37 = vor.u32 %v4793_v34, %v3941_v35  ;;  %v4007_v10 = vld [vmem:[%s7041_s2 + $0x3c8] sm:$0xf] }
  0x46   : > { %v4008_v15 = vor.u32 %v4810_v11, %v4007_v10  ;;  %v4798_v32 = vld [vmem:[%s7041_s2 + $0x124] sm:$0xf0] }
  0x47   : > { %858 = vmatpush.bf16.msrb.mxu3 %v3992_v13  ;;  %v3947_v35 = vld [vmem:[%s7041_s2 + $0x8] sm:$0xf] }
  0x48   : > { %649 = vmatpush.bf16.msrb.mxu0 %v3852_v45 }
  0x49   : > { %663 = vmatpush.bf16.msrb.mxu1 %v3856_v49  ;;  %846 = vmatpush.bf16.msrb.mxu2 %v3976_v17  ;;  %v5630_v49 = vpack.c.bf16 %v5626_v48, %v5626_v48  ;;  %v4807_v17 = vld [vmem:[%s7041_s2 + $0x364] sm:$0xf0] }
  0x4b   : > { %859 = vmatpush.bf16.msrb.mxu3 %v3980_v19  ;;  %v3996_v19 = vor.u32 %v4807_v17, %v3995_v16 }
  0x4c   : > { %650 = vmatpush.bf16.msrb.mxu0 %v3836_v57 }
  0x4d   : > { %664 = vmatpush.bf16.msrb.mxu1 %v3840_v61  ;;  %847 = vmatpush.bf16.msrb.mxu2 %v3964_v23  ;;  %v4804_v23 = vld [vmem:[%s7041_s2 + $0x2a4] sm:$0xf0] }
  0x4f   : > { %860 = vmatpush.bf16.msrb.mxu3 %v3968_v25  ;;  %v3984_v25 = vor.u32 %v4804_v23, %v3983_v22  ;;  %v4824_v22 = vld [vmem:[%s7041_s2 + $0x5b4] sm:$0xf0] }
  0x50   : > { %651 = vmatpush.bf16.msrb.mxu0 %v3820_v5  ;;  %v4032_v5 = vor.u32 %v4816_v3, %v4031_v2  ;;  %v4067_v23 = vld [vmem:[%s7041_s2 + $0x498] sm:$0xf] }
  0x51   : > { %665 = vmatpush.bf16.msrb.mxu1 %v3824_v9  ;;  %848 = vmatpush.bf16.msrb.mxu2 %v3952_v30 }
  0x53   : > { %861 = vmatpush.bf16.msrb.mxu3 %v3956_v31  ;;  %v3959_v31 = vld [vmem:[%s7041_s2 + $0xc8] sm:$0xf] }
  0x54   : > { %868 = vmatpush.bf16.msra.mxu0 %v4032_v5  ;;  %v3960_v33 = vor.u32 %v4798_v32, %v3959_v31 }
  0x55   : > { %849 = vmatpush.bf16.msrb.mxu2 %v3940_v36  ;;  %v4795_v36 = vld [vmem:[%s7041_s2 + $0x64] sm:$0xf0] }
  0x57   : > { %862 = vmatpush.bf16.msrb.mxu3 %v3944_v37  ;;  %v3948_v37 = vor.u32 %v4795_v36, %v3947_v35  ;;  %v4821_v35 = vld [vmem:[%s7041_s2 + $0x374] sm:$0xf0] }
  0x58   : > { %869 = vmatpush.bf16.msra.mxu0 %v4020_v7 }
  0x5c   : > { %870 = vmatpush.bf16.msra.mxu0 %v4008_v15 }
  0x60   : > { %871 = vmatpush.bf16.msra.mxu0 %v3996_v19  ;;  %v445_v19 = vld [vmem:[%s7043_s4 + $0xb] sm:$0xf] }
  0x64   : > { %872 = vmatpush.bf16.msra.mxu0 %v3984_v25  ;;  %v4823_v25 = vld [vmem:[%s7041_s2 + $0x4f4] sm:$0xf0] }
  0x65   : > { %v4068_v28 = vor.u32 %v4823_v25, %v4067_v23 }
  0x68   : > { %873 = vmatpush.bf16.msra.mxu0 %v3972_v29  ;;  %v4063_v29 = vld [vmem:[%s7041_s2 + $0x3d8] sm:$0xf] }
  0x6c   : > { %874 = vmatpush.bf16.msra.mxu0 %v3960_v33 }
  0x70   : > { %875 = vmatpush.bf16.msra.mxu0 %v3948_v37  ;;  %v4820_v37 = vld [vmem:[%s7041_s2 + $0x2b4] sm:$0xf0] }
  0xb0   : > { %v394_v38 = vpop.f32.mrf.mxu0 }
  0xb1   : > { %v408_v39 = vpop.f32.mrf.mxu1  ;;  %v395_v41 = vadd.f32 %v5029_v40, %v394_v38 }
  0xb3   : > { %v409_v45 = vadd.f32 %v408_v39, %v395_v41 }
  0xb8   : > { %v396_v42 = vpop.f32.mrf.mxu0 }
  0xb9   : > { %v397_v43 = vadd.f32 %v5029_v40, %v396_v42  ;;  %v410_v44 = vpop.f32.mrf.mxu1 }
  0xbb   : > { %v411_v46 = vadd.f32 %v410_v44, %v397_v43 }
  0xbd   : > { %v446_v47 = vpack.c.bf16 %v411_v46, %v409_v45 }
  0xbf   : > { %624 = vmatmul.bf16.vlgmr.msra.gmra.mxu2 %v446_v47  ;;  %638 = vmatmul.bf16.vlgmr.msra.gmra.mxu3 %v446_v47 }
  0xc0   : > { %652 = vmatmul.bf16.vlgmr.msrb.gmra.mxu0 %v446_v47  ;;  %666 = vmatmul.bf16.vlgmr.msrb.gmra.mxu1 %v446_v47 }
  0xcf   : > { %850 = vmatmul.bf16.vlgmr.msrb.gmra.mxu2 %v5630_v49  ;;  %863 = vmatmul.bf16.vlgmr.msrb.gmra.mxu3 %v5630_v49 }
  0xd0   : > { %876 = vmatmul.bf16.vlgmr.msra.gmra.mxu0 %v5630_v49 }
 0x13d   : > { %v5677_v14 = vpop.f32.mrf.mxu1  ;;  %v5716_v39 = vpop.f32.mrf.mxu0 }
 0x142   : > { %v5634_v50 = vpop.f32.mrf.mxu2  ;;  %v5636_v51 = vpop.f32.mrf.mxu3 }
 0x145   : > { %v5693_v26 = vpop.f32.mrf.mxu1  ;;  %v5720_v44 = vpop.f32.mrf.mxu0 }
 0x14a   : > { %v5638_v52 = vpop.f32.mrf.mxu2  ;;  %v5640_v53 = vpop.f32.mrf.mxu3 }
 0x152   : > { %v851_v57 = vpop.f32.mrf.mxu2  ;;  %v864_v58 = vpop.f32.mrf.mxu3 }
 0x153   : > { %v852_v59 = vadd.f32 %v851_v57, %v708_v55  ;;  %v865_v60 = vadd.f32 %v864_v58, %v709_v56  ;;  %v877_v55 = vpop.f32.mrf.mxu0 }
 0x155   : > { %v881_v61 = vpack.c.bf16 %v852_v59, %v852_v59  ;;  %v889_v62 = vpack.c.bf16 %v865_v60, %v865_v60  ;;  %v710_v59 = vperm.slane %v5645_v54, 2 }
 0x157   : > { %893 = vrot.lane.b32.xlu1 %v889_v62, %s5193_s15  ;;  %891 = vrot.lane.b32.xlu0 %v889_v62, %s5194_s16  ;;  %v910_v63 = vsel %vm905_vm0, %v889_v62, 0  ;;  %v878_v60 = vadd.f32 %v877_v55, %v710_v59  ;;  %v449_v59 = vperm.slane %v445_v19, 1 }
 0x158   : > { %885 = vrot.lane.b32.xlu2 %v881_v61, %s5193_s15  ;;  %919 = vmatpush.bf16.xpose.msra.mxu1 %v910_v63 }
 0x15a   : > { %v853_v0 = vpop.f32.mrf.mxu2  ;;  %v866_v1 = vpop.f32.mrf.mxu3 }
 0x15b   : > { %v879_v57 = vpop.f32.mrf.mxu0 }
 0x15f   : > { %895 = vrot.lane.b32.xlu1 %v889_v62, %s5195_s17  ;;  %883 = vrot.lane.b32.xlu0 %v881_v61, %s5194_s16 }
 0x160   : > { %887 = vrot.lane.b32.xlu2 %v881_v61, %s5195_s17  ;;  %4033 = vmatmul.msk.bf16.vlgmr.msra.gmra.mxu1 %vm905_vm0, %v881_v61  ;;  %v897_v61 = vpack.c.bf16 %v878_v60, %v878_v60  ;;  %v642_v60 = vadd.f32 %v5640_v53, %v449_v59 }
 0x162   : > { %v1036_v16 = vsel %vm1034_vm2, %v897_v61, 0 }
 0x163   : > { %1045 = vmatpush.bf16.msra.mxu2 %v1036_v16 }
 0x1b2   : > { %v886_v18 = vpop.permute.xlu2 %885 }
 0x1ba   : > { %v888_v30 = vpop.permute.xlu2 %887 }
 0x1c9   : > { %v894_v8 = vpop.permute.xlu1 %893  ;;  %v892_v9 = vpop.permute.xlu0 %891 }
 0x1ca   : > { %v948_v12 = vsel %vm905_vm0, %v894_v8, 0  ;;  %v929_v13 = vsel %vm905_vm0, %v892_v9, 0 }
 0x1cb   : > { %938 = vmatpush.bf16.xpose.msra.mxu3 %v929_v13 }
 0x1d1   : > { %v896_v20 = vpop.permute.xlu1 %895  ;;  %v884_v21 = vpop.permute.xlu0 %883 }
 0x1d2   : > { %v967_v24 = vsel %vm905_vm0, %v896_v20, 0  ;;  %4034 = vmatmul.msk.bf16.vlgmr.msra.gmra.mxu3 %vm905_vm0, %v884_v21  ;;  %v448_v20 = vperm.slane %v445_v19, 0  ;;  %v4071_v21 = vld [vmem:[%s7041_s2 + $0x558] sm:$0xf] }
 0x1d3   : > { %957 = vmatpush.bf16.xpose.msrb.mxu3 %v948_v12  ;;  %976 = vmatpush.bf16.xpose.msrb.mxu1 %v967_v24  ;;  %v4072_v24 = vor.u32 %v4824_v22, %v4071_v21 }
 0x1d4   : > { %v626_v27 = vadd.f32 %v5634_v50, %v448_v20  ;;  %v628_v50 = vadd.f32 %v5638_v52, %v448_v20  ;;  %v4055_v52 = vld [vmem:[%s7041_s2 + $0x258] sm:$0xf] }
 0x1d5   : > { %1194 = vmatpush.bf16.msrb.mxu2 %v4072_v24 }
 0x1d6   : > { %v5766_v31 = vpack.c.bf16 %v626_v27, %v626_v27  ;;  %v5774_v33 = vpack.c.bf16 %v628_v50, %v628_v50 }
 0x1d8   : > { %v1368_v20 = vunpack.c.l.b16 %v5774_v33  ;;  %v1367_v22 = vunpack.c.l.b16 %v5766_v31 }
 0x1d9   : > { %1195 = vmatpush.bf16.msrb.mxu2 %v4068_v28 }
 0x1da   : > { %4036 = vmatmul.msk.bf16.vlgmr.msrb.gmra.mxu1 %vm905_vm0, %v888_v30  ;;  %v4822_v30 = vld [vmem:[%s7041_s2 + $0x434] sm:$0xf0]  ;;  %v1369_v24 = vpack.c.b16 %v1368_v20, %v1367_v22 }
 0x1db   : > { %v4064_v32 = vor.u32 %v4822_v30, %v4063_v29 }
 0x1dc   : > { %v1374_v30 = vsel %vm905_vm0, %v1369_v24, 0  ;;  %v4830_v24 = vld [vmem:[%s7041_s2 + $0x43c] sm:$0xf0] }
 0x1dd   : > { %v921_v34 = vpop.f32.mrf.mxu1  ;;  %1196 = vmatpush.bf16.msrb.mxu2 %v4064_v32 }
 0x1de   : > { %v983_v47 = vsel %vm982_vm1, %v921_v34, -inf }
 0x1e2   : > { %4035 = vmatmul.msk.bf16.vlgmr.msrb.gmra.mxu3 %vm905_vm0, %v886_v18 }
 0x1e5   : > { %v923_v38 = vpop.f32.mrf.mxu1 }
 0x1e6   : > { %v4056_v38 = vor.u32 %v4820_v37, %v4055_v52 }
 0x255   : > { %v940_v40 = vpop.f32.mrf.mxu3 }
 0x256   : > { %v986_v41 = vsel %vm982_vm1, %v940_v40, -inf }
 0x257   : > { %987 = vmax.xlane.f32.xlu0 %v986_v41  ;;  %v978_v42 = vpop.f32.mrf.mxu1  ;;  %v4051_v41 = vld [vmem:[%s7041_s2 + $0x198] sm:$0xf] }
 0x258   : > { %v992_v43 = vsel %vm982_vm1, %v978_v42, -inf }
 0x259   : > { %993 = vmax.xlane.f32.xlu2 %v992_v43 }
 0x25d   : > { %v942_v45 = vpop.f32.mrf.mxu3 }
 0x25f   : > { %v980_v46 = vpop.f32.mrf.mxu1 }
 0x260   : > { %v4047_v46 = vld [vmem:[%s7041_s2 + $0xd8] sm:$0xf] }
 0x261   : > { %984 = vmax.xlane.f32.xlu2 %v983_v47  ;;  %v4818_v47 = vld [vmem:[%s7041_s2 + $0x134] sm:$0xf0] }
 0x262   : > { %v4048_v55 = vor.u32 %v4818_v47, %v4047_v46 }
 0x265   : > { %v959_v49 = vpop.f32.mrf.mxu3 }
 0x266   : > { %v989_v56 = vsel %vm982_vm1, %v959_v49, -inf }
 0x267   : > { %990 = vmax.xlane.f32.xlu1 %v989_v56  ;;  %v4817_v56 = vld [vmem:[%s7041_s2 + $0x74] sm:$0xf0] }
 0x26d   : > { %v961_v58 = vpop.f32.mrf.mxu3 }
 0x279   : > { %899 = vrot.lane.b32.xlu2 %v897_v61, %s5194_s16 }
 0x2ca   : > { %v988_v62 = vpop.xlane.xlu0 %987 }
 0x2cb   : > { %v996_v1 = vsub.f32 %v940_v40, %v988_v62 }
 0x2cc   : > { %v994_v63 = vpop.xlane.xlu2 %993 }
 0x2cd   : > { %v998_v0 = vsub.f32 %v978_v42, %v994_v63  ;;  %v1001_v3 = vmul.f32 1.442695, %v996_v1  ;;  %v4819_v42 = vld [vmem:[%s7041_s2 + $0x1f4] sm:$0xf0]  ;;  %v640_v63 = vadd.f32 %v5636_v51, %v449_v59 }
 0x2ce   : > { %v4052_v45 = vor.u32 %v4819_v42, %v4051_v41 }
 0x2cf   : > { %v1005_v2 = vmul.f32 1.442695, %v998_v0  ;;  %v5813_v0 = vpack.c.bf16 %v642_v60, %v642_v60  ;;  %v5815_v1 = vpack.c.bf16 %v640_v63, %v640_v63  ;;  %v5196_v60 = vmov 128.0  }
 0x2d1   : > { %5050 = vpow2.f32 %v1005_v2 }
 0x2d2   : > { %5052 = vpow2.f32 %v1001_v3 }
 0x2d4   : > { %v985_v4 = vpop.xlane.xlu2 %984 }
 0x2d5   : > { %v995_v5 = vsub.f32 %v921_v34, %v985_v4  ;;  %v4059_v34 = vld [vmem:[%s7041_s2 + $0x318] sm:$0xf] }
 0x2d6   : > { %v4060_v36 = vor.u32 %v4821_v35, %v4059_v34 }
 0x2d7   : > { %v5726_v6 = vpop.eup %5050  ;;  %v999_v7 = vmul.f32 1.442695, %v995_v5 }
 0x2d8   : > { %v1016_v54 = vsel %vm982_vm1, %v5726_v6, 0.0  ;;  %v5730_v10 = vpop.eup %5052  ;;  %1197 = vmatpush.bf16.msrb.mxu2 %v4060_v36 }
 0x2d9   : > { %5054 = vpow2.f32 %v999_v7  ;;  %1017 = vadd.xlane.f32.xlu0 %v1016_v54  ;;  %v1010_v13 = vsel %vm982_vm1, %v5730_v10, 0.0  ;;  %v1505_v7 = vunpack.c.l.b16 %v5813_v0  ;;  %v1504_v54 = vunpack.c.l.b16 %v5815_v1 }
 0x2da   : > { %v991_v8 = vpop.xlane.xlu1 %990 }
 0x2db   : > { %v997_v9 = vsub.f32 %v959_v49, %v991_v8  ;;  %v4043_v49 = vld [vmem:[%s7041_s2 + $0x18] sm:$0xf] }
 0x2dc   : > { %1198 = vmatpush.bf16.msrb.mxu2 %v4056_v38  ;;  %v900_v40 = vpop.permute.xlu2 %899  ;;  %v4044_v57 = vor.u32 %v4817_v56, %v4043_v49  ;;  %v5030_v49 = vld [vmem:[%s7043_s4 + $0x7] ss:$0 sm:$0xff] }
 0x2dd   : > { %v1003_v11 = vmul.f32 1.442695, %v997_v9  ;;  %v1055_v43 = vsel %vm1034_vm2, %v900_v40, 0  ;;  %v1506_v9 = vpack.c.b16 %v1505_v7, %v1504_v54 }
 0x2de   : > { %1064 = vmatpush.bf16.msra.mxu3 %v1055_v43 }
 0x2df   : > { %v5732_v12 = vpop.eup %5054  ;;  %5056 = vpow2.f32 %v1003_v11 }
 0x2e0   : > { %v1007_v15 = vsel %vm982_vm1, %v5732_v12, 0.0  ;;  %1199 = vmatpush.bf16.msrb.mxu2 %v4052_v45 }
 0x2e1   : > { %1011 = vadd.xlane.f32.xlu0 %v1010_v13  ;;  %1008 = vadd.xlane.f32.xlu2 %v1007_v15 }
 0x2e4   : > { %1200 = vmatpush.bf16.msrb.mxu2 %v4048_v55 }
 0x2e5   : > { %v5739_v17 = vpop.eup %5056 }
 0x2e6   : > { %v1013_v18 = vsel %vm982_vm1, %v5739_v17, 0.0 }
 0x2e7   : > { %1014 = vadd.xlane.f32.xlu1 %v1013_v18 }
 0x2e8   : > { %1201 = vmatpush.bf16.msrb.mxu2 %v4044_v57 }
 0x2f5   : > { %903 = vrot.lane.b32.xlu0 %v897_v61, %s5195_s17 }
 0x2f9   : > { %1339 = vrot.lane.b32.xlu2 %v5766_v31, %s5194_s16 }
 0x300   : > { %901 = vrot.lane.b32.xlu1 %v897_v61, %s5193_s15 }
 0x301   : > { %1343 = vrot.lane.b32.xlu2 %v5766_v31, %s5193_s15 }
 0x309   : > { %1345 = vrot.lane.b32.xlu2 %v5774_v33, %s5193_s15 }
 0x311   : > { %1349 = vrot.lane.b32.xlu2 %v5774_v33, %s5195_s17 }
 0x34c   : > { %v1018_v58 = vpop.xlane.xlu0 %1017 }
 0x354   : > { %v1012_v61 = vpop.xlane.xlu0 %1011  ;;  %v1009_v62 = vpop.xlane.xlu2 %1008 }
 0x355   : > { %5058 = vrcp.f32 %v1012_v61 }
 0x356   : > { %5060 = vrcp.f32 %v1009_v62 }
 0x357   : > { %5062 = vrcp.f32 %v1018_v58 }
 0x35b   : > { %v5059_v2 = vpop.eup %5058 }
 0x35c   : > { %v5061_v3 = vpop.eup %5060  ;;  %v1024_v4 = vmul.f32 %v5059_v2, %v5730_v10  ;;  %v5818_v5 = vpop.permute.xlu2 %1339 }
 0x35d   : > { %v1023_v53 = vmul.f32 %v5061_v3, %v5732_v12  ;;  %v5063_v11 = vpop.eup %5062  ;;  %v1015_v10 = vpop.xlane.xlu1 %1014 }
 0x35e   : > { %v1028_v8 = vpack.c.bf16 %v1024_v4, %v1024_v4  ;;  %v1026_v15 = vmul.f32 %v5063_v11, %v5726_v6  ;;  %5064 = vrcp.f32 %v1015_v10 }
 0x35f   : > { %v1027_v51 = vpack.c.bf16 %v1023_v53, %v1023_v53  ;;  %5066 = vrcp.f32 %v5196_v60  ;;  %v5032_v60 = vld [vmem:[%s7043_s4 + $0x1d] ss:$0 sm:$0xff] }
 0x360   : > { %4038 = vmatmul.msk.bf16.vlgmr.msra.gmra.mxu3 %vm982_vm1, %v1028_v8  ;;  %v1030_v12 = vpack.c.bf16 %v1026_v15, %v1026_v15 }
 0x361   : > { %4037 = vmatmul.msk.bf16.vlgmr.msra.gmra.mxu2 %vm982_vm1, %v1027_v51 }
 0x362   : > { %1518 = vmatpush.bf16.msra.mxu2 %v1506_v9  ;;  %v1389_v9 = vunpack.c.l.b16 %v5818_v5  ;;  %v4831_v5 = vld [vmem:[%s7041_s2 + $0x4fc] sm:$0xf0] }
 0x364   : > { %v1344_v13 = vpop.permute.xlu2 %1343  ;;  %v5065_v21 = vpop.eup %5064 }
 0x365   : > { %v1025_v25 = vmul.f32 %v5065_v21, %v5739_v17  ;;  %v1411_v27 = vunpack.c.l.b16 %v1344_v13  ;;  %v5067_v61 = vpop.eup %5066  ;;  %v4099_v21 = vld [vmem:[%s7041_s2 + $0x4a0] sm:$0xf] }
 0x366   : > { %v1213_v62 = vmul.f32 128.0, %v5067_v61  ;;  %vm1217_vm5 = vweird.f32 %v5067_v61  ;;  %v4100_v22 = vor.u32 %v4831_v5, %v4099_v21 }
 0x367   : > { %v904_v16 = vpop.permute.xlu0 %903  ;;  %v1029_v32 = vpack.c.bf16 %v1025_v25, %v1025_v25 }
 0x368   : > { %v1093_v18 = vsel %vm1034_vm2, %v904_v16, 0  ;;  %v1214_v63 = vsub.f32 1.0, %v1213_v62 }
 0x369   : > { %1102 = vmatpush.bf16.msra.mxu1 %v1093_v18 }
 0x36a   : > { %v1215_v2 = vmul.f32 %v5067_v61, %v1214_v63 }
 0x36c   : > { %4040 = vmatmul.msk.bf16.vlgmr.msra.gmra.mxu1 %vm982_vm1, %v1030_v12  ;;  %v1346_v19 = vpop.permute.xlu2 %1345  ;;  %v1216_v3 = vadd.f32 %v5067_v61, %v1215_v2  ;;  %v5033_v2 = vld [vmem:[%s7043_s4 + $0x9] ss:$0 sm:$0xff] }
 0x36d   : > { %v1412_v23 = vunpack.c.l.b16 %v1346_v19 }
 0x36e   : > { %v5849_v4 = vsel %vm1217_vm5, %v5067_v61, %v1216_v3 }
 0x36f   : > { %v1413_v28 = vpack.c.b16 %v1412_v23, %v1411_v27  ;;  %v4095_v23 = vld [vmem:[%s7041_s2 + $0x3e0] sm:$0xf] }
 0x370   : > { %v4096_v25 = vor.u32 %v4830_v24, %v4095_v23  ;;  %v4091_v27 = vld [vmem:[%s7041_s2 + $0x320] sm:$0xf] }
 0x371   : > { %v1418_v50 = vsel %vm905_vm0, %v1413_v28, 0 }
 0x372   : > { %v902_v6 = vpop.permute.xlu1 %901 }
 0x373   : > { %v1074_v29 = vsel %vm1034_vm2, %v902_v6, 0  ;;  %v4829_v6 = vld [vmem:[%s7041_s2 + $0x37c] sm:$0xf0] }
 0x374   : > { %1083 = vmatpush.bf16.msrb.mxu0 %v1074_v29  ;;  %v1350_v15 = vpop.permute.xlu2 %1349  ;;  %v4092_v28 = vor.u32 %v4829_v6, %v4091_v27  ;;  %v4087_v29 = vld [vmem:[%s7041_s2 + $0x260] sm:$0xf] }
 0x375   : > { %v1434_v18 = vunpack.c.l.b16 %v1350_v15 }
 0x377   : > { %4039 = vmatmul.msk.bf16.vlgmr.msrb.gmra.mxu0 %vm982_vm1, %v1029_v32 }
 0x378   : > { %1383 = vmatpush.bf16.xpose.msra.mxu0 %v1374_v30  ;;  %v4828_v30 = vld [vmem:[%s7041_s2 + $0x2bc] sm:$0xf0] }
 0x379   : > { %v4088_v32 = vor.u32 %v4828_v30, %v4087_v29 }
 0x380   : > { %1427 = vmatpush.bf16.xpose.msrb.mxu0 %v1418_v50  ;;  %v4083_v50 = vld [vmem:[%s7041_s2 + $0x1a0] sm:$0xf] }
 0x3e3   : > { %v1066_v34 = vpop.f32.mrf.mxu3 }
 0x3e4   : > { %v1047_v35 = vpop.f32.mrf.mxu2  ;;  %1126 = vrot.lane.b32.xlu1 %v1066_v34, %s5195_s17  ;;  %v4827_v34 = vld [vmem:[%s7041_s2 + $0x1fc] sm:$0xf0] }
 0x3e9   : > { %v1104_v17 = vpop.f32.mrf.mxu1 }
 0x3eb   : > { %v1068_v36 = vpop.f32.mrf.mxu3 }
 0x3ec   : > { %v1049_v52 = vpop.f32.mrf.mxu2  ;;  %1134 = vrot.lane.b32.xlu1 %v1104_v17, %s5194_s16  ;;  %v4079_v17 = vld [vmem:[%s7041_s2 + $0xe0] sm:$0xf] }
 0x3ed   : > { %v4826_v36 = vld [vmem:[%s7041_s2 + $0x13c] sm:$0xf0] }
 0x3ee   : > { %v4075_v52 = vld [vmem:[%s7041_s2 + $0x20] sm:$0xf] }
 0x3f1   : > { %v1106_v37 = vpop.f32.mrf.mxu1 }
 0x3f2   : > { %v4080_v37 = vor.u32 %v4826_v36, %v4079_v17 }
 0x3f4   : > { %v1085_v38 = vpop.f32.mrf.mxu0 }
 0x3f5   : > { %1130 = vrot.lane.b32.xlu0 %v1085_v38, %s5193_s15  ;;  %v4825_v38 = vld [vmem:[%s7041_s2 + $0x7c] sm:$0xf0] }
 0x3fc   : > { %v1087_v40 = vpop.f32.mrf.mxu0 }
 0x3fd   : > { %v4076_v40 = vor.u32 %v4825_v38, %v4075_v52 }
 0x456   : > { %v1127_v41 = vpop.permute.xlu1 %1126 }
 0x457   : > { %v1137_v42 = vsel %vm905_vm0, %v1047_v35, %v1127_v41  ;;  %v4084_v35 = vor.u32 %v4827_v34, %v4083_v50 }
 0x45e   : > { %v1135_v45 = vpop.permute.xlu1 %1134 }
 0x467   : > { %v1131_v43 = vpop.permute.xlu0 %1130 }
 0x468   : > { %v1139_v46 = vsel %vm1138_vm3, %v1137_v42, %v1131_v43 }
 0x469   : > { %v1141_v47 = vsel %vm1140_vm4, %v1139_v46, %v1135_v45 }
 0x46a   : > { %v1142_v55 = vpack.c.bf16 %v1141_v47, %v1141_v47 }
 0x46c   : > { %1202 = vmatmul.bf16.vlgmr.msrb.gmra.mxu2 %v1142_v55 }
 0x4ef   : > { %v1203_v56 = vpop.f32.mrf.mxu2 }
 0x4f0   : > { %v1204_v57 = vadd.f32 %v5030_v49, %v1203_v56 }
 0x4f2   : > { %v1207_v58 = vadd.f32 %v1204_v57, %v5626_v48  ;;  %v5031_v57 = vld [vmem:[%s7043_s4 + $0x17] ss:$0 sm:$0xff] }
 0x4f4   : > { %1210 = vadd.xlane.f32.xlu0 %v1207_v58 }
 0x4f7   : > { %v1205_v59 = vpop.f32.mrf.mxu2 }
 0x508   : > { %1341 = vrot.lane.b32.xlu0 %v5774_v33, %s5194_s16  ;;  %v4103_v33 = vld [vmem:[%s7041_s2 + $0x560] sm:$0xf] }
 0x510   : > { %1347 = vrot.lane.b32.xlu0 %v5766_v31, %s5195_s17  ;;  %v4832_v31 = vld [vmem:[%s7041_s2 + $0x5bc] sm:$0xf0] }
 0x511   : > { %v4104_v53 = vor.u32 %v4832_v31, %v4103_v33 }
 0x513   : > { %1314 = vmatpush.bf16.msrb.mxu3 %v4104_v53 }
 0x517   : > { %1315 = vmatpush.bf16.msrb.mxu3 %v4100_v22 }
 0x51b   : > { %1316 = vmatpush.bf16.msrb.mxu3 %v4096_v25 }
 0x51f   : > { %1317 = vmatpush.bf16.msrb.mxu3 %v4092_v28 }
 0x523   : > { %1318 = vmatpush.bf16.msrb.mxu3 %v4088_v32 }
 0x527   : > { %1319 = vmatpush.bf16.msrb.mxu3 %v4084_v35 }
 0x52b   : > { %1320 = vmatpush.bf16.msrb.mxu3 %v4080_v37 }
 0x52f   : > { %1321 = vmatpush.bf16.msrb.mxu3 %v4076_v40 }
 0x567   : > { %v1211_v7 = vpop.xlane.xlu0 %1210 }
 0x568   : > { %v1219_v48 = vmul.f32 %v5849_v4, %v1211_v7 }
 0x56a   : > { %v1220_v54 = vsub.f32 %v1207_v58, %v1219_v48 }
 0x56c   : > { %v1221_v8 = vmul.f32 %v1220_v54, %v1220_v54 }
 0x56e   : > { %1222 = vadd.xlane.f32.xlu1 %v1221_v8 }
 0x57a   : > { %v1342_v51 = vpop.permute.xlu0 %1341 }
 0x57b   : > { %v1390_v11 = vunpack.c.l.b16 %v1342_v51 }
 0x57d   : > { %v1391_v13 = vpack.c.b16 %v1390_v11, %v1389_v9 }
 0x57f   : > { %v1396_v10 = vsel %vm905_vm0, %v1391_v13, 0 }
 0x580   : > { %1405 = vmatpush.bf16.xpose.msrb.mxu1 %v1396_v10 }
 0x582   : > { %v1348_v16 = vpop.permute.xlu0 %1347 }
 0x583   : > { %v1433_v12 = vunpack.c.l.b16 %v1348_v16 }
 0x585   : > { %v1435_v19 = vpack.c.b16 %v1434_v18, %v1433_v12 }
 0x587   : > { %v1440_v20 = vsel %vm905_vm0, %v1435_v19, 0 }
 0x588   : > { %1449 = vmatpush.bf16.xpose.msra.mxu1 %v1440_v20 }
 0x5e1   : > { %v1223_v41 = vpop.xlane.xlu1 %1222 }
 0x5e2   : > { %v1224_v42 = vmul.f32 %v1223_v41, %v5849_v4 }
 0x5e4   : > { %v1225_v43 = vadd.f32 1e-05, %v1224_v42 }
 0x5e6   : > { %5068 = vrsqrt.f32 %v1225_v43  ;;  %vm1232_vm7 = vweird.f32 %v1225_v43 }
 0x5ec   : > { %v5069_v45 = vpop.eup %5068 }
 0x5ed   : > { %v1227_v46 = vmul.f32 %v5069_v45, %v1225_v43  ;;  %vm1233_vm6 = vweird.f32 %v5069_v45 }
 0x5ee   : > { %vm1234_vm8 = vmor %vm1232_vm7, %vm1233_vm6 }
 0x5ef   : > { %v1228_v47 = vmul.f32 %v5069_v45, %v1227_v46 }
 0x5f1   : > { %v1229_v55 = vmul.f32 0.5, %v1228_v47 }
 0x5f3   : > { %v1230_v49 = vsub.f32 1.5, %v1229_v55 }
 0x5f5   : > { %v1231_v56 = vmul.f32 %v5069_v45, %v1230_v49 }
 0x5f7   : > { %v1235_v58 = vsel %vm1234_vm8, %v5069_v45, %v1231_v56 }
 0x5f8   : > { %v1236_v59 = vmul.f32 %v1235_v58, %v1220_v54 }
 0x5fa   : > { %v1240_v61 = vmul.f32 %v5031_v57, %v1236_v59 }
 0x5fc   : > { %v5910_v62 = vadd.f32 %v5032_v60, %v1240_v61 }
 0x5fe   : > { %v1262_v63 = vpack.c.bf16 %v5910_v62, %v5910_v62 }
 0x600   : > { %1322 = vmatmul.bf16.vlgmr.msrb.gmra.mxu3 %v1262_v63 }
 0x683   : > { %v1323_v3 = vpop.f32.mrf.mxu3 }
 0x684   : > { %v1324_v7 = vadd.f32 %v5033_v2, %v1323_v3 }
 0x686   : > { %v1327_v48 = vpack.c.bf16 %v1324_v7, %v1324_v7 }
 0x688   : > { %1329 = vrot.lane.b32.xlu1 %v1327_v48, %s5194_s16  ;;  %1331 = vrot.lane.b32.xlu0 %v1327_v48, %s5193_s15 }
 0x689   : > { %4105 = vmatmul.msk.bf16.vlgmr.msra.gmra.mxu0 %vm905_vm0, %v1327_v48 }
 0x68b   : > { %v1325_v33 = vpop.f32.mrf.mxu3 }
 0x690   : > { %1333 = vrot.lane.b32.xlu1 %v1327_v48, %s5195_s17 }
 0x6fa   : > { %v1330_v31 = vpop.permute.xlu1 %1329  ;;  %v1332_v53 = vpop.permute.xlu0 %1331 }
 0x6fb   : > { %4106 = vmatmul.msk.bf16.vlgmr.msrb.gmra.mxu1 %vm905_vm0, %v1330_v31  ;;  %4107 = vmatmul.msk.bf16.vlgmr.msrb.gmra.mxu0 %vm905_vm0, %v1332_v53 }
 0x702   : > { %v1334_v8 = vpop.permute.xlu1 %1333 }
 0x706   : > { %v1385_v54 = vpop.f32.mrf.mxu0 }
 0x707   : > { %v1456_v18 = vsel %vm1455_vm9, %v1385_v54, -inf }
 0x70b   : > { %4108 = vmatmul.msk.bf16.vlgmr.msra.gmra.mxu1 %vm905_vm0, %v1334_v8 }
 0x70e   : > { %v1387_v51 = vpop.f32.mrf.mxu0 }
 0x778   : > { %v1407_v9 = vpop.f32.mrf.mxu1  ;;  %v1429_v11 = vpop.f32.mrf.mxu0 }
 0x779   : > { %v1459_v13 = vsel %vm1455_vm9, %v1407_v9, -inf  ;;  %v1462_v10 = vsel %vm1455_vm9, %v1429_v11, -inf }
 0x77a   : > { %1460 = vmax.xlane.f32.xlu2 %v1459_v13  ;;  %1463 = vmax.xlane.f32.xlu0 %v1462_v10 }
 0x780   : > { %v1409_v15 = vpop.f32.mrf.mxu1  ;;  %v1431_v16 = vpop.f32.mrf.mxu0 }
 0x781   : > { %v4143_v15 = vld [vmem:[%s7041_s2 + $0x578] sm:$0xf] }
 0x782   : > { %1457 = vmax.xlane.f32.xlu2 %v1456_v18  ;;  %v4840_v16 = vld [vmem:[%s7041_s2 + $0x5d4] sm:$0xf0] }
 0x783   : > { %v4144_v18 = vor.u32 %v4840_v16, %v4143_v15  ;;  %v4187_v15 = vld [vmem:[%s7041_s2 + $0x400] sm:$0xf] }
 0x784   : > { %v4852_v16 = vld [vmem:[%s7041_s2 + $0x45c] sm:$0xf0] }
 0x785   : > { %1668 = vmatpush.bf16.msrb.mxu2 %v4144_v18  ;;  %v4851_v18 = vld [vmem:[%s7041_s2 + $0x404] sm:$0xf] }
 0x788   : > { %v1451_v12 = vpop.f32.mrf.mxu1 }
 0x789   : > { %v1465_v19 = vsel %vm1455_vm9, %v1451_v12, -inf }
 0x78a   : > { %1466 = vmax.xlane.f32.xlu1 %v1465_v19 }
 0x790   : > { %v1453_v20 = vpop.f32.mrf.mxu1 }
 0x79a   : > { %1357 = vrot.lane.b32.xlu2 %v5813_v0, %s5194_s16 }
 0x7a2   : > { %1363 = vrot.lane.b32.xlu2 %v5815_v1, %s5195_s17 }
 0x7a3   : > { %1355 = vrot.lane.b32.xlu1 %v5815_v1, %s5194_s16 }
 0x7ab   : > { %1361 = vrot.lane.b32.xlu1 %v5813_v0, %s5193_s15 }
 0x7b3   : > { %1365 = vrot.lane.b32.xlu1 %v5813_v0, %s5195_s17 }
 0x7ed   : > { %v1461_v21 = vpop.xlane.xlu2 %1460  ;;  %v1464_v5 = vpop.xlane.xlu0 %1463 }
 0x7ee   : > { %v1469_v22 = vsub.f32 %v1407_v9, %v1461_v21  ;;  %v1470_v24 = vsub.f32 %v1429_v11, %v1464_v5 }
 0x7f0   : > { %v1474_v23 = vmul.f32 1.442695, %v1469_v22  ;;  %v1476_v25 = vmul.f32 1.442695, %v1470_v24  ;;  %v4139_v24 = vld [vmem:[%s7041_s2 + $0x4b8] sm:$0xf] }
 0x7f2   : > { %5070 = vpow2.f32 %v1474_v23 }
 0x7f3   : > { %5072 = vpow2.f32 %v1476_v25  ;;  %v4839_v25 = vld [vmem:[%s7041_s2 + $0x514] sm:$0xf0] }
 0x7f5   : > { %v1458_v27 = vpop.xlane.xlu2 %1457 }
 0x7f6   : > { %v1468_v6 = vsub.f32 %v1385_v54, %v1458_v27  ;;  %v4135_v27 = vld [vmem:[%s7041_s2 + $0x3f8] sm:$0xf] }
 0x7f8   : > { %v5071_v28 = vpop.eup %5070  ;;  %v1472_v29 = vmul.f32 1.442695, %v1468_v6  ;;  %v4140_v6 = vor.u32 %v4839_v25, %v4139_v24  ;;  %v4181_v24 = vld [vmem:[%s7041_s2 + $0x3a0] sm:$0xf0] }
 0x7f9   : > { %v1483_v30 = vsel %vm1455_vm9, %v5071_v28, 0.0  ;;  %v5073_v50 = vpop.eup %5072 }
 0x7fa   : > { %5074 = vpow2.f32 %v1472_v29  ;;  %1484 = vadd.xlane.f32.xlu0 %v1483_v30  ;;  %v1486_v36 = vsel %vm1455_vm9, %v5073_v50, 0.0  ;;  %1669 = vmatpush.bf16.msrb.mxu2 %v4140_v6  ;;  %v4131_v30 = vld [vmem:[%s7041_s2 + $0x338] sm:$0xf]  ;;  %v4848_v6 = vld [vmem:[%s7041_s2 + $0x2dc] sm:$0xf0] }
 0x7fd   : > { %v1467_v32 = vpop.xlane.xlu1 %1466  ;;  %v1358_v38 = vpop.permute.xlu2 %1357 }
 0x7fe   : > { %v1471_v34 = vsub.f32 %v1451_v12, %v1467_v32  ;;  %v1525_v41 = vunpack.c.l.b16 %v1358_v38  ;;  %v4837_v32 = vld [vmem:[%s7041_s2 + $0x394] sm:$0xf0] }
 0x7ff   : > { %v4834_v38 = vld [vmem:[%s7041_s2 + $0x154] sm:$0xf0] }
 0x800   : > { %v5075_v0 = vpop.eup %5074  ;;  %v1478_v35 = vmul.f32 1.442695, %v1471_v34  ;;  %v4132_v34 = vor.u32 %v4837_v32, %v4131_v30  ;;  %v4173_v30 = vld [vmem:[%s7041_s2 + $0x2e0] sm:$0xf0] }
 0x801   : > { %v1480_v17 = vsel %vm1455_vm9, %v5075_v0, 0.0 }
 0x802   : > { %5076 = vpow2.f32 %v1478_v35  ;;  %1481 = vadd.xlane.f32.xlu2 %v1480_v17  ;;  %1487 = vadd.xlane.f32.xlu0 %v1486_v36  ;;  %v4123_v17 = vld [vmem:[%s7041_s2 + $0x1b8] sm:$0xf] }
 0x803   : > { %v4835_v36 = vld [vmem:[%s7041_s2 + $0x214] sm:$0xf0] }
 0x805   : > { %v1364_v46 = vpop.permute.xlu2 %1363 }
 0x806   : > { %v1564_v55 = vunpack.c.l.b16 %v1364_v46 }
 0x808   : > { %v5077_v52 = vpop.eup %5076 }
 0x809   : > { %v1489_v37 = vsel %vm1455_vm9, %v5077_v52, 0.0 }
 0x80a   : > { %1490 = vadd.xlane.f32.xlu0 %v1489_v37  ;;  %v4119_v37 = vld [vmem:[%s7041_s2 + $0xf8] sm:$0xf] }
 0x815   : > { %v1356_v40 = vpop.permute.xlu1 %1355 }
 0x816   : > { %v1524_v42 = vunpack.c.l.b16 %v1356_v40  ;;  %v4120_v40 = vor.u32 %v4834_v38, %v4119_v37  ;;  %v4844_v37 = vld [vmem:[%s7041_s2 + $0x15c] sm:$0xf0]  ;;  %v4843_v38 = vld [vmem:[%s7041_s2 + $0x104] sm:$0xf] }
 0x818   : > { %v1526_v43 = vpack.c.b16 %v1525_v41, %v1524_v42  ;;  %v4115_v41 = vld [vmem:[%s7041_s2 + $0x38] sm:$0xf] }
 0x819   : > { %v4833_v42 = vld [vmem:[%s7041_s2 + $0x94] sm:$0xf0] }
 0x81a   : > { %1538 = vmatpush.bf16.msra.mxu3 %v1526_v43  ;;  %v4116_v43 = vor.u32 %v4833_v42, %v4115_v41  ;;  %v4157_v41 = vld [vmem:[%s7041_s2 + $0x160] sm:$0xf0]  ;;  %v4147_v42 = vld [vmem:[%s7041_s2 + $0x40] sm:$0xf] }
 0x81d   : > { %v1362_v45 = vpop.permute.xlu1 %1361 }
 0x81e   : > { %1359 = vrot.lane.b32.xlu0 %v5815_v1, %s5193_s15  ;;  %v1545_v8 = vunpack.c.l.b16 %v1362_v45 }
 0x825   : > { %v1366_v47 = vpop.permute.xlu1 %1365 }
 0x826   : > { %v1565_v49 = vunpack.c.l.b16 %v1366_v47 }
 0x828   : > { %v1566_v56 = vpack.c.b16 %v1565_v49, %v1564_v55 }
 0x82a   : > { %1578 = vmatpush.bf16.msrb.mxu1 %v1566_v56 }
 0x86d   : > { %v1485_v57 = vpop.xlane.xlu0 %1484 }
 0x86e   : > { %5078 = vrcp.f32 %v1485_v57 }
 0x874   : > { %v5079_v58 = vpop.eup %5078 }
 0x875   : > { %v1497_v59 = vmul.f32 %v5079_v58, %v5071_v28  ;;  %v1482_v60 = vpop.xlane.xlu2 %1481  ;;  %v1488_v61 = vpop.xlane.xlu0 %1487  ;;  %v4838_v28 = vld [vmem:[%s7041_s2 + $0x454] sm:$0xf0]  ;;  %v5034_v58 = vld [vmem:[%s7043_s4 + $0xf] ss:$0 sm:$0xff] }
 0x876   : > { %5080 = vrcp.f32 %v1482_v60  ;;  %v4136_v29 = vor.u32 %v4838_v28, %v4135_v27  ;;  %v4171_v27 = vld [vmem:[%s7041_s2 + $0x280] sm:$0xf]  ;;  %v4847_v28 = vld [vmem:[%s7041_s2 + $0x284] sm:$0xf] }
 0x877   : > { %v1501_v63 = vpack.c.bf16 %v1497_v59, %v1497_v59  ;;  %v4176_v32 = vor.u32 %v4847_v28, %v4173_v30 }
 0x878   : > { %1670 = vmatpush.bf16.msrb.mxu2 %v4136_v29  ;;  %v4172_v29 = vor.u32 %v4848_v6, %v4171_v27 }
 0x879   : > { %4110 = vmatmul.msk.bf16.vlgmr.msra.gmra.mxu3 %vm1455_vm9, %v1501_v63 }
 0x87c   : > { %v5081_v2 = vpop.eup %5080  ;;  %1671 = vmatpush.bf16.msrb.mxu2 %v4132_v34  ;;  %v4846_v34 = vld [vmem:[%s7041_s2 + $0x21c] sm:$0xf0] }
 0x87d   : > { %v1496_v3 = vmul.f32 %v5081_v2, %v5075_v0  ;;  %v1491_v7 = vpop.xlane.xlu0 %1490  ;;  %v4836_v0 = vld [vmem:[%s7041_s2 + $0x2d4] sm:$0xf0]  ;;  %v4203_v2 = vld [vmem:[%s7041_s2 + $0x580] sm:$0xf] }
 0x87e   : > { %5082 = vrcp.f32 %v1491_v7  ;;  %v4855_v7 = vld [vmem:[%s7041_s2 + $0x584] sm:$0xf] }
 0x87f   : > { %v1500_v1 = vpack.c.bf16 %v1496_v3, %v1496_v3  ;;  %5084 = vrcp.f32 %v1488_v61  ;;  %v4856_v3 = vld [vmem:[%s7041_s2 + $0x5dc] sm:$0xf0] }
 0x881   : > { %4109 = vmatmul.msk.bf16.vlgmr.msra.gmra.mxu2 %vm1455_vm9, %v1500_v1  ;;  %v4204_v1 = vor.u32 %v4856_v3, %v4203_v2  ;;  %v4870_v2 = vld [vmem:[%s7042_s3 + $0xe8] sm:$0xff] }
 0x882   : > { %v4862_v3 = vld [vmem:[%s7042_s3 + $0xa8] sm:$0xff] }
 0x883   : > { %1815 = vmatpush.bf16.msrb.mxu3 %v4204_v1  ;;  %v4861_v1 = vld [vmem:[%s7042_s3 + $0xa0] sm:$0xff] }
 0x884   : > { %v5083_v48 = vpop.eup %5082 }
 0x885   : > { %v1499_v33 = vmul.f32 %v5083_v48, %v5077_v52  ;;  %v5085_v53 = vpop.eup %5084  ;;  %v4124_v52 = vor.u32 %v4835_v36, %v4123_v17  ;;  %v4205_v48 = vld [vmem:[%s7041_s2 + $0x5e0] sm:$0xf0] }
 0x886   : > { %v1498_v9 = vmul.f32 %v5085_v53, %v5073_v50  ;;  %v4127_v50 = vld [vmem:[%s7041_s2 + $0x278] sm:$0xf]  ;;  %v4165_v17 = vld [vmem:[%s7041_s2 + $0x220] sm:$0xf0] }
 0x887   : > { %v1503_v31 = vpack.c.bf16 %v1499_v33, %v1499_v33  ;;  %v4128_v35 = vor.u32 %v4836_v0, %v4127_v50  ;;  %v4163_v50 = vld [vmem:[%s7041_s2 + $0x1c0] sm:$0xf]  ;;  %v4845_v0 = vld [vmem:[%s7041_s2 + $0x1c4] sm:$0xf] }
 0x888   : > { %v1502_v13 = vpack.c.bf16 %v1498_v9, %v1498_v9  ;;  %v4853_v9 = vld [vmem:[%s7041_s2 + $0x4c4] sm:$0xf]  ;;  %v4168_v36 = vor.u32 %v4845_v0, %v4165_v17  ;;  %v5037_v17 = vld [vmem:[%s7043_s4 + $0x15] ss:$0 sm:$0xff] }
 0x889   : > { %4112 = vmatmul.msk.bf16.vlgmr.msrb.gmra.mxu1 %vm1455_vm9, %v1503_v31  ;;  %1672 = vmatpush.bf16.msrb.mxu2 %v4128_v35  ;;  %v4164_v35 = vor.u32 %v4846_v34, %v4163_v50 }
 0x88d   : > { %1673 = vmatpush.bf16.msrb.mxu2 %v4124_v52  ;;  %v4155_v52 = vld [vmem:[%s7041_s2 + $0x100] sm:$0xf] }
 0x890   : > { %v1360_v54 = vpop.permute.xlu0 %1359 }
 0x891   : > { %v1544_v51 = vunpack.c.l.b16 %v1360_v54  ;;  %1674 = vmatpush.bf16.msrb.mxu2 %v4120_v40  ;;  %v4156_v40 = vor.u32 %v4844_v37, %v4155_v52 }
 0x893   : > { %v1546_v11 = vpack.c.b16 %v1545_v8, %v1544_v51  ;;  %v4195_v8 = vld [vmem:[%s7041_s2 + $0x4c0] sm:$0xf] }
 0x894   : > { %v4854_v51 = vld [vmem:[%s7041_s2 + $0x51c] sm:$0xf0] }
 0x895   : > { %1558 = vmatpush.bf16.msra.mxu0 %v1546_v11  ;;  %1675 = vmatpush.bf16.msrb.mxu2 %v4116_v43  ;;  %v4196_v11 = vor.u32 %v4854_v51, %v4195_v8  ;;  %v4842_v43 = vld [vmem:[%s7041_s2 + $0x9c] sm:$0xf0]  ;;  %v4867_v51 = vld [vmem:[%s7042_s3 + $0xd0] sm:$0xff] }
 0x897   : > { %1816 = vmatpush.bf16.msrb.mxu3 %v4196_v11 }
 0x898   : > { %4111 = vmatmul.msk.bf16.vlgmr.msra.gmra.mxu0 %vm1455_vm9, %v1502_v13  ;;  %v4197_v13 = vld [vmem:[%s7041_s2 + $0x520] sm:$0xf0] }
 0x8fc   : > { %v1540_v10 = vpop.f32.mrf.mxu3 }
 0x8fd   : > { %1602 = vrot.lane.b32.xlu1 %v1540_v10, %s5195_s17  ;;  %v4200_v10 = vor.u32 %v4853_v9, %v4197_v13  ;;  %v5035_v13 = vld [vmem:[%s7043_s4 + $0x18] ss:$0 sm:$0xff] }
 0x904   : > { %v1520_v12 = vpop.f32.mrf.mxu2  ;;  %v1542_v19 = vpop.f32.mrf.mxu3 }
 0x905   : > { %v4189_v19 = vld [vmem:[%s7041_s2 + $0x460] sm:$0xf0] }
 0x906   : > { %v1580_v20 = vpop.f32.mrf.mxu1 }
 0x907   : > { %1610 = vrot.lane.b32.xlu1 %v1580_v20, %s5194_s16  ;;  %v4192_v20 = vor.u32 %v4851_v18, %v4189_v19 }
 0x90c   : > { %v1522_v21 = vpop.f32.mrf.mxu2 }
 0x90d   : > { %v4179_v21 = vld [vmem:[%s7041_s2 + $0x340] sm:$0xf] }
 0x90e   : > { %v1582_v5 = vpop.f32.mrf.mxu1 }
 0x90f   : > { %v4850_v5 = vld [vmem:[%s7041_s2 + $0x39c] sm:$0xf0] }
 0x915   : > { %v1560_v22 = vpop.f32.mrf.mxu0 }
 0x916   : > { %1606 = vrot.lane.b32.xlu0 %v1560_v22, %s5193_s15  ;;  %v4849_v22 = vld [vmem:[%s7041_s2 + $0x344] sm:$0xf] }
 0x917   : > { %v4184_v25 = vor.u32 %v4849_v22, %v4181_v24  ;;  %v4857_v22 = vld [vmem:[%s7042_s3 + $0x80] sm:$0xff] }
 0x91d   : > { %v1562_v23 = vpop.f32.mrf.mxu0 }
 0x91e   : > { %v4180_v23 = vor.u32 %v4850_v5, %v4179_v21  ;;  %v4859_v21 = vld [vmem:[%s7042_s3 + $0x90] sm:$0xff]  ;;  %v4858_v5 = vld [vmem:[%s7042_s3 + $0x88] sm:$0xff] }
 0x96f   : > { %v1603_v45 = vpop.permute.xlu1 %1602 }
 0x970   : > { %v1613_v46 = vsel %vm905_vm0, %v1520_v12, %v1603_v45  ;;  %v4188_v12 = vor.u32 %v4852_v16, %v4187_v15  ;;  %v4160_v45 = vor.u32 %v4843_v38, %v4157_v41  ;;  %v5036_v16 = vld [vmem:[%s7043_s4 + $0x1e] ss:$0 sm:$0xff] }
 0x972   : > { %1817 = vmatpush.bf16.msrb.mxu3 %v4188_v12 }
 0x976   : > { %1818 = vmatpush.bf16.msrb.mxu3 %v4180_v23  ;;  %v1728_v23 = vld [vmem:[%s7043_s4 + $0x11] sm:$0x3] }
 0x977   : > { %v1732_v24 = vperm.slane %v1728_v23, 1  ;;  %v1731_v28 = vperm.slane %v1728_v23, 0 }
 0x979   : > { %v1611_v55 = vpop.permute.xlu1 %1610 }
 0x97a   : > { %1819 = vmatpush.bf16.msrb.mxu3 %v4172_v29 }
 0x97e   : > { %1820 = vmatpush.bf16.msrb.mxu3 %v4164_v35 }
 0x982   : > { %1821 = vmatpush.bf16.msrb.mxu3 %v4156_v40 }
 0x988   : > { %v1607_v47 = vpop.permute.xlu0 %1606 }
 0x989   : > { %v1614_v49 = vsel %vm1138_vm3, %v1613_v46, %v1607_v47  ;;  %v4841_v46 = vld [vmem:[%s7041_s2 + $0x44] sm:$0xf] }
 0x98a   : > { %v1615_v56 = vsel %vm1140_vm4, %v1614_v49, %v1611_v55  ;;  %v4149_v47 = vld [vmem:[%s7041_s2 + $0xa0] sm:$0xf0]  ;;  %v4148_v55 = vor.u32 %v4842_v43, %v4147_v42  ;;  %v4359_v43 = vld [vmem:[%s7041_s2 + $0x54c] sm:$0xf] }
 0x98b   : > { %v1616_v57 = vpack.c.bf16 %v1615_v56, %v1615_v56  ;;  %v4152_v49 = vor.u32 %v4841_v46, %v4149_v47  ;;  %v4872_v56 = vld [vmem:[%s7042_s3 + $0xf8] sm:$0xff]  ;;  %v4894_v46 = vld [vmem:[%s7041_s2 + $0x550] sm:$0xf] }
 0x98c   : > { %1822 = vmatpush.bf16.msrb.mxu3 %v4148_v55  ;;  %1990 = vmatpush.bf16.msra.mxu2 %v4872_v56  ;;  %v4361_v55 = vld [vmem:[%s7041_s2 + $0x5ac] sm:$0xf0]  ;;  %v4896_v56 = vld [vmem:[%s7041_s2 + $0x5b0] sm:$0xf0] }
 0x98d   : > { %1676 = vmatmul.bf16.vlgmr.msrb.gmra.mxu2 %v1616_v57  ;;  %v4864_v57 = vld [vmem:[%s7042_s3 + $0xb8] sm:$0xff] }
 0x98e   : > { %1977 = vmatpush.bf16.msra.mxu1 %v4864_v57  ;;  %v4364_v57 = vor.u32 %v4894_v46, %v4361_v55  ;;  %v4295_v55 = vld [vmem:[%s7041_s2 + $0xd4] sm:$0xf] }
 0xa10   : > { %v1677_v59 = vpop.f32.mrf.mxu2 }
 0xa11   : > { %v1678_v60 = vadd.f32 %v5034_v58, %v1677_v59 }
 0xa13   : > { %v1681_v61 = vadd.f32 %v1678_v60, %v5910_v62  ;;  %v4208_v62 = vor.u32 %v4855_v7, %v4205_v48  ;;  %v4871_v60 = vld [vmem:[%s7042_s3 + $0xf0] sm:$0xff]  ;;  %v4869_v7 = vld [vmem:[%s7042_s3 + $0xe0] sm:$0xff] }
 0xa14   : > { %1991 = vmatpush.bf16.msra.mxu2 %v4871_v60 }
 0xa15   : > { %1684 = vadd.xlane.f32.xlu0 %v1681_v61  ;;  %1828 = vmatpush.bf16.msrb.mxu0 %v4208_v62 }
 0xa18   : > { %v1679_v63 = vpop.f32.mrf.mxu2  ;;  %1992 = vmatpush.bf16.msra.mxu2 %v4870_v2  ;;  %v4347_v2 = vld [vmem:[%s7041_s2 + $0x48c] sm:$0xf] }
 0xa19   : > { %1829 = vmatpush.bf16.msrb.mxu0 %v4200_v10 }
 0xa1c   : > { %1993 = vmatpush.bf16.msra.mxu2 %v4869_v7  ;;  %v4891_v7 = vld [vmem:[%s7041_s2 + $0x490] sm:$0xf] }
 0xa1d   : > { %1830 = vmatpush.bf16.msrb.mxu0 %v4192_v20  ;;  %v4866_v20 = vld [vmem:[%s7042_s3 + $0xc8] sm:$0xff] }
 0xa21   : > { %1831 = vmatpush.bf16.msrb.mxu0 %v4184_v25 }
 0xa25   : > { %1832 = vmatpush.bf16.msrb.mxu0 %v4176_v32 }
 0xa29   : > { %1833 = vmatpush.bf16.msrb.mxu0 %v4168_v36 }
 0xa2d   : > { %1834 = vmatpush.bf16.msrb.mxu0 %v4160_v45  ;;  %v4895_v45 = vld [vmem:[%s7041_s2 + $0x5a8] sm:$0xf0] }
 0xa2e   : > { %v4360_v47 = vor.u32 %v4895_v45, %v4359_v43  ;;  %v4877_v43 = vld [vmem:[%s7041_s2 + $0x128] sm:$0xf0]  ;;  %v4876_v45 = vld [vmem:[%s7041_s2 + $0xd0] sm:$0xf] }
 0xa30   : > { %2203 = vmatpush.bf16.msra.mxu3 %v4360_v47  ;;  %v4289_v47 = vld [vmem:[%s7041_s2 + $0x12c] sm:$0xf0] }
 0xa31   : > { %1835 = vmatpush.bf16.msrb.mxu0 %v4152_v49  ;;  %v4367_v49 = vld [vmem:[%s7041_s2 + $0x554] sm:$0xf] }
 0xa35   : > { %2216 = vmatpush.bf16.msra.mxu0 %v4364_v57 }
 0xa88   : > { %v1685_v33 = vpop.xlane.xlu0 %1684 }
 0xa89   : > { %v1686_v31 = vmul.f32 %v1685_v33, %v5849_v4  ;;  %v4868_v33 = vld [vmem:[%s7042_s3 + $0xd8] sm:$0xff] }
 0xa8a   : > { %1994 = vmatpush.bf16.msra.mxu2 %v4868_v33  ;;  %v4893_v33 = vld [vmem:[%s7041_s2 + $0x4f0] sm:$0xf0] }
 0xa8b   : > { %v6019_v53 = vsub.f32 %v1681_v61, %v1686_v31  ;;  %v4863_v61 = vld [vmem:[%s7042_s3 + $0xb0] sm:$0xff]  ;;  %v4860_v31 = vld [vmem:[%s7042_s3 + $0x98] sm:$0xff] }
 0xa8c   : > { %1978 = vmatpush.bf16.msra.mxu1 %v4863_v61 }
 0xa8d   : > { %v1688_v54 = vmul.f32 %v6019_v53, %v6019_v53 }
 0xa8e   : > { %1995 = vmatpush.bf16.msra.mxu2 %v4867_v51  ;;  %v4889_v51 = vld [vmem:[%s7041_s2 + $0x428] sm:$0xf0] }
 0xa8f   : > { %1689 = vadd.xlane.f32.xlu1 %v1688_v54 }
 0xa90   : > { %1979 = vmatpush.bf16.msra.mxu1 %v4862_v3  ;;  %v4892_v3 = vld [vmem:[%s7041_s2 + $0x4e8] sm:$0xf0] }
 0xa92   : > { %1996 = vmatpush.bf16.msra.mxu2 %v4866_v20  ;;  %v4885_v20 = vld [vmem:[%s7041_s2 + $0x310] sm:$0xf] }
 0xa94   : > { %1980 = vmatpush.bf16.msra.mxu1 %v4861_v1  ;;  %v4348_v1 = vor.u32 %v4892_v3, %v4347_v2  ;;  %v4277_v2 = vld [vmem:[%s7041_s2 + $0x6c] sm:$0xf0]  ;;  %v4283_v3 = vld [vmem:[%s7041_s2 + $0x14] sm:$0xf] }
 0xa96   : > { %2204 = vmatpush.bf16.msra.mxu3 %v4348_v1 }
 0xa98   : > { %1981 = vmatpush.bf16.msra.mxu1 %v4860_v31 }
 0xa9c   : > { %1982 = vmatpush.bf16.msra.mxu1 %v4859_v21 }
 0xaa0   : > { %1983 = vmatpush.bf16.msra.mxu1 %v4858_v5  ;;  %v4331_v5 = vld [vmem:[%s7041_s2 + $0x314] sm:$0xf] }
 0xaa4   : > { %1984 = vmatpush.bf16.msra.mxu1 %v4857_v22  ;;  %v4887_v22 = vld [vmem:[%s7041_s2 + $0x370] sm:$0xf0] }
 0xb02   : > { %v1690_v58 = vpop.xlane.xlu1 %1689 }
 0xb03   : > { %v1691_v59 = vmul.f32 %v1690_v58, %v5849_v4  ;;  %v4368_v58 = vor.u32 %v4896_v56, %v4367_v49  ;;  %v4878_v49 = vld [vmem:[%s7041_s2 + $0x130] sm:$0xf0]  ;;  %v4292_v56 = vor.u32 %v4876_v45, %v4289_v47 }
 0xb04   : > { %v4296_v57 = vor.u32 %v4878_v49, %v4295_v55 }
 0xb05   : > { %v1692_v63 = vadd.f32 1e-05, %v1691_v59  ;;  %2229 = vmatpush.bf16.msrb.mxu1 %v4368_v58  ;;  %v4275_v58 = vld [vmem:[%s7041_s2 + $0xc] sm:$0xf] }
 0xb07   : > { %5086 = vrsqrt.f32 %v1692_v63  ;;  %vm1699_vm11 = vweird.f32 %v1692_v63 }
 0xb0d   : > { %v5087_v48 = vpop.eup %5086 }
 0xb0e   : > { %v1694_v62 = vmul.f32 %v5087_v48, %v1692_v63  ;;  %vm1700_vm10 = vweird.f32 %v5087_v48 }
 0xb0f   : > { %vm1701_vm12 = vmor %vm1699_vm11, %vm1700_vm10 }
 0xb10   : > { %v1695_v54 = vmul.f32 %v5087_v48, %v1694_v62  ;;  %v4355_v62 = vld [vmem:[%s7041_s2 + $0x494] sm:$0xf] }
 0xb12   : > { %v1696_v8 = vmul.f32 0.5, %v1695_v54  ;;  %v4356_v54 = vor.u32 %v4893_v33, %v4355_v62 }
 0xb14   : > { %v1697_v9 = vsub.f32 1.5, %v1696_v8  ;;  %2230 = vmatpush.bf16.msrb.mxu1 %v4356_v54  ;;  %v4335_v8 = vld [vmem:[%s7041_s2 + $0x3cc] sm:$0xf] }
 0xb16   : > { %v1698_v11 = vmul.f32 %v5087_v48, %v1697_v9  ;;  %v4888_v9 = vld [vmem:[%s7041_s2 + $0x3d0] sm:$0xf] }
 0xb18   : > { %v1702_v10 = vsel %vm1701_vm12, %v5087_v48, %v1698_v11  ;;  %v4349_v48 = vld [vmem:[%s7041_s2 + $0x4ec] sm:$0xf0]  ;;  %v4336_v11 = vor.u32 %v4889_v51, %v4335_v8 }
 0xb19   : > { %v1703_v15 = vmul.f32 %v1702_v10, %v6019_v53  ;;  %v4865_v53 = vld [vmem:[%s7042_s3 + $0xc0] sm:$0xff]  ;;  %v4352_v31 = vor.u32 %v4891_v7, %v4349_v48  ;;  %v4343_v10 = vld [vmem:[%s7041_s2 + $0x3d4] sm:$0xf] }
 0xb1a   : > { %1997 = vmatpush.bf16.msra.mxu2 %v4865_v53  ;;  %2205 = vmatpush.bf16.msra.mxu3 %v4336_v11  ;;  %v4325_v53 = vld [vmem:[%s7041_s2 + $0x36c] sm:$0xf0]  ;;  %v4875_v7 = vld [vmem:[%s7041_s2 + $0x70] sm:$0xf0] }
 0xb1b   : > { %v1707_v18 = vmul.f32 %v5035_v13, %v1703_v15  ;;  %2217 = vmatpush.bf16.msra.mxu0 %v4352_v31  ;;  %v4337_v13 = vld [vmem:[%s7041_s2 + $0x42c] sm:$0xf0]  ;;  %v4890_v15 = vld [vmem:[%s7041_s2 + $0x430] sm:$0xf0]  ;;  %v4328_v23 = vor.u32 %v4885_v20, %v4325_v53  ;;  %v4284_v48 = vor.u32 %v4875_v7, %v4283_v3 }
 0xb1d   : > { %v1711_v12 = vadd.f32 %v5036_v16, %v1707_v18  ;;  %v4340_v16 = vor.u32 %v4888_v9, %v4337_v13  ;;  %v4344_v18 = vor.u32 %v4890_v15, %v4343_v10  ;;  %v5038_v10 = vld [vmem:[%s7043_s4 + $0x19] ss:$0 sm:$0xff] }
 0xb1f   : > { %v1729_v19 = vpack.c.bf16 %v1711_v12, %v1711_v12  ;;  %2218 = vmatpush.bf16.msra.mxu0 %v4340_v16  ;;  %2231 = vmatpush.bf16.msrb.mxu1 %v4344_v18  ;;  %v5039_v18 = vld [vmem:[%s7043_s4 + $0x1f] ss:$0 sm:$0xff] }
 0xb21   : > { %1823 = vmatmul.bf16.vlgmr.msrb.gmra.mxu3 %v1729_v19  ;;  %1836 = vmatmul.bf16.vlgmr.msrb.gmra.mxu0 %v1729_v19  ;;  %v4886_v19 = vld [vmem:[%s7041_s2 + $0x368] sm:$0xf0] }
 0xb23   : > { %2219 = vmatpush.bf16.msra.mxu0 %v4328_v23 }
 0xb9e   : > { %v1837_v25 = vpop.f32.mrf.mxu0 }
 0xb9f   : > { %v1838_v27 = vadd.f32 %v1837_v25, %v1732_v24  ;;  %v4332_v24 = vor.u32 %v4887_v22, %v4331_v5  ;;  %v4311_v25 = vld [vmem:[%s7041_s2 + $0x24c] sm:$0xf] }
 0xba1   : > { %v1842_v6 = vmax.f32 %v1838_v27, 0.0  ;;  %2232 = vmatpush.bf16.msrb.mxu1 %v4332_v24  ;;  %v4883_v27 = vld [vmem:[%s7041_s2 + $0x2a8] sm:$0xf0] }
 0xba3   : > { %v1877_v29 = vpack.c.bf16 %v1842_v6, %v1842_v6  ;;  %v4882_v6 = vld [vmem:[%s7041_s2 + $0x250] sm:$0xf] }
 0xba4   : > { %v1824_v30 = vpop.f32.mrf.mxu3 }
 0xba5   : > { %v1825_v32 = vadd.f32 %v1824_v30, %v1731_v28  ;;  %1998 = vmatmul.bf16.vlgmr.msra.gmra.mxu2 %v1877_v29  ;;  %v4312_v28 = vor.u32 %v4883_v27, %v4311_v25  ;;  %v4313_v29 = vld [vmem:[%s7041_s2 + $0x2ac] sm:$0xf0]  ;;  %v4319_v30 = vld [vmem:[%s7041_s2 + $0x254] sm:$0xf] }
 0xba6   : > { %v1839_v50 = vpop.f32.mrf.mxu0 }
 0xba7   : > { %v1841_v34 = vmax.f32 %v1825_v32, 0.0  ;;  %v4884_v32 = vld [vmem:[%s7041_s2 + $0x2b0] sm:$0xf0]  ;;  %v4316_v50 = vor.u32 %v4882_v6, %v4313_v29 }
 0xba9   : > { %v1876_v0 = vpack.c.bf16 %v1841_v34, %v1841_v34  ;;  %v4320_v34 = vor.u32 %v4884_v32, %v4319_v30  ;;  %2220 = vmatpush.bf16.msra.mxu0 %v4316_v50 }
 0xbab   : > { %1985 = vmatmul.bf16.vlgmr.msra.gmra.mxu1 %v1876_v0  ;;  %v4299_v0 = vld [vmem:[%s7041_s2 + $0x18c] sm:$0xf] }
 0xbac   : > { %v1826_v35 = vpop.f32.mrf.mxu3  ;;  %2233 = vmatpush.bf16.msrb.mxu1 %v4320_v34 }
 0xbad   : > { %v4880_v35 = vld [vmem:[%s7041_s2 + $0x1e8] sm:$0xf0] }
 0xc28   : > { %v1986_v36 = vpop.f32.mrf.mxu1  ;;  %v1999_v52 = vpop.f32.mrf.mxu2 }
 0xc29   : > { %v1987_v37 = vadd.f32 %v5037_v17, %v1986_v36  ;;  %v4879_v17 = vld [vmem:[%s7041_s2 + $0x190] sm:$0xf]  ;;  %v4300_v36 = vor.u32 %v4880_v35, %v4299_v0 }
 0xc2b   : > { %v2000_v38 = vadd.f32 %v1999_v52, %v1987_v37  ;;  %v4301_v52 = vld [vmem:[%s7041_s2 + $0x1ec] sm:$0xf0]  ;;  %v4307_v37 = vld [vmem:[%s7041_s2 + $0x194] sm:$0xf] }
 0xc2d   : > { %v2003_v40 = vadd.f32 %v2000_v38, %v1711_v12  ;;  %v4323_v12 = vld [vmem:[%s7041_s2 + $0x30c] sm:$0xf]  ;;  %v4881_v38 = vld [vmem:[%s7041_s2 + $0x1f0] sm:$0xf0] }
 0xc2e   : > { %v4324_v21 = vor.u32 %v4886_v19, %v4323_v12 }
 0xc2f   : > { %2006 = vadd.xlane.f32.xlu2 %v2003_v40 }
 0xc30   : > { %v1988_v41 = vpop.f32.mrf.mxu1  ;;  %v2001_v42 = vpop.f32.mrf.mxu2  ;;  %2206 = vmatpush.bf16.msra.mxu3 %v4324_v21  ;;  %v2066_v21 = vld [vmem:[%s7043_s4 + $0x4] sm:$0x7] }
 0xc31   : > { %v4308_v41 = vor.u32 %v4881_v38, %v4307_v37  ;;  %v4287_v42 = vld [vmem:[%s7041_s2 + $0xcc] sm:$0xf]  ;;  %v2070_v53 = vperm.slane %v2066_v21, 1  ;;  %v2071_v5 = vperm.slane %v2066_v21, 2  ;;  %v2069_v27 = vperm.slane %v2066_v21, 0 }
 0xc32   : > { %v4288_v46 = vor.u32 %v4877_v43, %v4287_v42 }
 0xc33   : > { %2234 = vmatpush.bf16.msrb.mxu1 %v4308_v41 }
 0xc34   : > { %2207 = vmatpush.bf16.msra.mxu3 %v4312_v28 }
 0xc37   : > { %2235 = vmatpush.bf16.msrb.mxu1 %v4296_v57 }
 0xc38   : > { %2208 = vmatpush.bf16.msra.mxu3 %v4300_v36 }
 0xc3b   : > { %2236 = vmatpush.bf16.msrb.mxu1 %v4284_v48 }
 0xc3c   : > { %2209 = vmatpush.bf16.msra.mxu3 %v4288_v46 }
 0xca2   : > { %v2007_v59 = vpop.xlane.xlu2 %2006 }
 0xca3   : > { %v2008_v60 = vmul.f32 %v2007_v59, %v5849_v4  ;;  %v4874_v59 = vld [vmem:[%s7041_s2 + $0x68] sm:$0xf0] }
 0xca5   : > { %v6188_v61 = vsub.f32 %v2003_v40, %v2008_v60  ;;  %v4304_v40 = vor.u32 %v4879_v17, %v4301_v52  ;;  %v4873_v60 = vld [vmem:[%s7041_s2 + $0x10] sm:$0xf] }
 0xca6   : > { %v4280_v1 = vor.u32 %v4873_v60, %v4277_v2 }
 0xca7   : > { %v2010_v63 = vmul.f32 %v6188_v61, %v6188_v61  ;;  %2221 = vmatpush.bf16.msra.mxu0 %v4304_v40 }
 0xca9   : > { %2011 = vadd.xlane.f32.xlu2 %v2010_v63  ;;  %v4276_v63 = vor.u32 %v4874_v59, %v4275_v58 }
 0xcab   : > { %2222 = vmatpush.bf16.msra.mxu0 %v4292_v56  ;;  %2210 = vmatpush.bf16.msra.mxu3 %v4276_v63 }
 0xcaf   : > { %2223 = vmatpush.bf16.msra.mxu0 %v4280_v1 }
 0xd1c   : > { %v2012_v62 = vpop.xlane.xlu2 %2011 }
 0xd1d   : > { %v2013_v33 = vmul.f32 %v2012_v62, %v5849_v4 }
 0xd1f   : > { %v2014_v31 = vadd.f32 1e-05, %v2013_v33 }
 0xd21   : > { %5088 = vrsqrt.f32 %v2014_v31  ;;  %vm2021_vm14 = vweird.f32 %v2014_v31 }
 0xd27   : > { %v5089_v54 = vpop.eup %5088 }
 0xd28   : > { %v2016_v8 = vmul.f32 %v5089_v54, %v2014_v31  ;;  %vm2022_vm13 = vweird.f32 %v5089_v54 }
 0xd29   : > { %vm2023_vm15 = vmor %vm2021_vm14, %vm2022_vm13 }
 0xd2a   : > { %v2017_v51 = vmul.f32 %v5089_v54, %v2016_v8 }
 0xd2c   : > { %v2018_v9 = vmul.f32 0.5, %v2017_v51 }
 0xd2e   : > { %v2019_v11 = vsub.f32 1.5, %v2018_v9 }
 0xd30   : > { %v2020_v13 = vmul.f32 %v5089_v54, %v2019_v11 }
 0xd32   : > { %v2024_v15 = vsel %vm2023_vm15, %v5089_v54, %v2020_v13 }
 0xd33   : > { %v2025_v16 = vmul.f32 %v2024_v15, %v6188_v61 }
 0xd35   : > { %v2029_v12 = vmul.f32 %v5038_v10, %v2025_v16 }
 0xd37   : > { %v6326_v19 = vadd.f32 %v5039_v18, %v2029_v12 }
 0xd39   : > { %v2067_v20 = vpack.c.bf16 %v6326_v19, %v6326_v19 }
 0xd3b   : > { %2211 = vmatmul.bf16.vlgmr.msra.gmra.mxu3 %v2067_v20  ;;  %2224 = vmatmul.bf16.vlgmr.msra.gmra.mxu0 %v2067_v20 }
 0xd3c   : > { %2237 = vmatmul.bf16.vlgmr.msrb.gmra.mxu1 %v2067_v20 }
 0xdb8   : > { %v2225_v61 = vpop.f32.mrf.mxu0 }
 0xdb9   : > { %v2226_v22 = vadd.f32 %v2225_v61, %v2070_v53  ;;  %v2238_v23 = vpop.f32.mrf.mxu1  ;;  %v5128_v61 = vld [vmem:[%s7043_s4 + $0xb] sm:$0xf] }
 0xdba   : > { %v2239_v24 = vadd.f32 %v2238_v23, %v2071_v5  ;;  %v4407_v23 = vld [vmem:[%s7041_s2 + $0x55c] sm:$0xf] }
 0xdbb   : > { %v2250_v25 = vpack.c.bf16 %v2226_v22, %v2226_v22  ;;  %v450_v22 = vperm.slane %v5128_v61, 2 }
 0xdbc   : > { %v6333_v6 = vpack.c.bf16 %v2239_v24, %v2239_v24  ;;  %v4904_v24 = vld [vmem:[%s7041_s2 + $0x5b8] sm:$0xf0] }
 0xdbd   : > { %2254 = vrot.lane.b32.xlu1 %v2250_v25, %s5193_s15  ;;  %2252 = vrot.lane.b32.xlu0 %v2250_v25, %s5194_s16  ;;  %v2270_v28 = vsel %vm905_vm0, %v2250_v25, 0 }
 0xdbe   : > { %v2212_v29 = vpop.f32.mrf.mxu3  ;;  %2279 = vmatpush.bf16.xpose.msrb.mxu2 %v2270_v28  ;;  %v2394_v30 = vsel %vm1034_vm2, %v6333_v6, 0  ;;  %v4903_v28 = vld [vmem:[%s7041_s2 + $0x4f8] sm:$0xf0] }
 0xdbf   : > { %v2213_v32 = vadd.f32 %v2212_v29, %v2069_v27  ;;  %v4408_v27 = vor.u32 %v4904_v24, %v4407_v23  ;;  %v654_v29 = vadd.f32 %v5716_v39, %v450_v22  ;;  %v656_v39 = vadd.f32 %v5720_v44, %v450_v22  ;;  %v4391_v44 = vld [vmem:[%s7041_s2 + $0x25c] sm:$0xf] }
 0xdc0   : > { %v2227_v50 = vpop.f32.mrf.mxu0 }
 0xdc1   : > { %v2242_v34 = vpack.c.bf16 %v2213_v32, %v2213_v32  ;;  %v2240_v0 = vpop.f32.mrf.mxu1  ;;  %v4399_v32 = vld [vmem:[%s7041_s2 + $0x3dc] sm:$0xf] }
 0xdc2   : > { %v4902_v50 = vld [vmem:[%s7041_s2 + $0x438] sm:$0xf0] }
 0xdc3   : > { %2244 = vrot.lane.b32.xlu2 %v2242_v34, %s5194_s16  ;;  %v4400_v0 = vor.u32 %v4902_v50, %v4399_v32 }
 0xdc5   : > { %2256 = vrot.lane.b32.xlu0 %v2250_v25, %s5195_s17  ;;  %4369 = vmatmul.msk.bf16.vlgmr.msrb.gmra.mxu2 %vm905_vm0, %v2242_v34  ;;  %v4403_v25 = vld [vmem:[%s7041_s2 + $0x49c] sm:$0xf] }
 0xdc6   : > { %2403 = vmatpush.bf16.msra.mxu2 %v2394_v30  ;;  %v2214_v35 = vpop.f32.mrf.mxu3  ;;  %v4404_v30 = vor.u32 %v4903_v28, %v4403_v25 }
 0xdc7   : > { %v6407_v35 = vpack.c.bf16 %v656_v39, %v656_v39 }
 0xdca   : > { %2550 = vmatpush.bf16.msrb.mxu2 %v4408_v27 }
 0xdcb   : > { %2246 = vrot.lane.b32.xlu2 %v2242_v34, %s5193_s15 }
 0xdcd   : > { %2248 = vrot.lane.b32.xlu0 %v2242_v34, %s5195_s17  ;;  %v6398_v34 = vpack.c.bf16 %v654_v29, %v654_v29 }
 0xdce   : > { %2551 = vmatpush.bf16.msrb.mxu2 %v4404_v30 }
 0xdd2   : > { %2552 = vmatpush.bf16.msrb.mxu2 %v4400_v0 }
 0xe1d   : > { %v2245_v17 = vpop.permute.xlu2 %2244 }
 0xe25   : > { %v2247_v40 = vpop.permute.xlu2 %2246 }
 0xe2f   : > { %v2255_v36 = vpop.permute.xlu1 %2254  ;;  %v2253_v52 = vpop.permute.xlu0 %2252 }
 0xe30   : > { %v2308_v37 = vsel %vm905_vm0, %v2255_v36, 0  ;;  %v2289_v38 = vsel %vm905_vm0, %v2253_v52, 0  ;;  %v4901_v36 = vld [vmem:[%s7041_s2 + $0x378] sm:$0xf0] }
 0xe31   : > { %2298 = vmatpush.bf16.xpose.msrb.mxu3 %v2289_v38  ;;  %2317 = vmatpush.bf16.xpose.msrb.mxu0 %v2308_v37  ;;  %v4387_v38 = vld [vmem:[%s7041_s2 + $0x19c] sm:$0xf] }
 0xe37   : > { %v2257_v41 = vpop.permute.xlu0 %2256 }
 0xe38   : > { %v2327_v42 = vsel %vm905_vm0, %v2257_v41, 0  ;;  %4370 = vmatmul.msk.bf16.vlgmr.msrb.gmra.mxu3 %vm905_vm0, %v2245_v17  ;;  %4371 = vmatmul.msk.bf16.vlgmr.msrb.gmra.mxu0 %vm905_vm0, %v2247_v40  ;;  %v4395_v17 = vld [vmem:[%s7041_s2 + $0x31c] sm:$0xf] }
 0xe39   : > { %2336 = vmatpush.bf16.xpose.msra.mxu1 %v2327_v42  ;;  %v4396_v52 = vor.u32 %v4901_v36, %v4395_v17  ;;  %v4899_v40 = vld [vmem:[%s7041_s2 + $0x1f8] sm:$0xf0] }
 0xe3a   : > { %v4388_v41 = vor.u32 %v4899_v40, %v4387_v38  ;;  %v4383_v42 = vld [vmem:[%s7041_s2 + $0xdc] sm:$0xf] }
 0xe3b   : > { %2553 = vmatpush.bf16.msrb.mxu2 %v4396_v52 }
 0xe3f   : > { %v2249_v43 = vpop.permute.xlu0 %2248 }
 0xe40   : > { %4372 = vmatmul.msk.bf16.vlgmr.msra.gmra.mxu1 %vm905_vm0, %v2249_v43  ;;  %v4898_v43 = vld [vmem:[%s7041_s2 + $0x138] sm:$0xf0] }
 0xe48   : > { %v2281_v45 = vpop.f32.mrf.mxu2 }
 0xe49   : > { %v2342_v60 = vsel %vm982_vm1, %v2281_v45, -inf }
 0xe50   : > { %v2283_v46 = vpop.f32.mrf.mxu2 }
 0xe51   : > { %v4379_v46 = vld [vmem:[%s7041_s2 + $0x1c] sm:$0xf] }
 0xeb5   : > { %v2319_v47 = vpop.f32.mrf.mxu0 }
 0xeb6   : > { %v2348_v55 = vsel %vm982_vm1, %v2319_v47, -inf }
 0xeb7   : > { %2349 = vmax.xlane.f32.xlu2 %v2348_v55 }
 0xebb   : > { %v2300_v49 = vpop.f32.mrf.mxu3 }
 0xebc   : > { %v2345_v56 = vsel %vm982_vm1, %v2300_v49, -inf }
 0xebd   : > { %v2338_v57 = vpop.f32.mrf.mxu1  ;;  %2346 = vmax.xlane.f32.xlu1 %v2345_v56  ;;  %v2321_v58 = vpop.f32.mrf.mxu0 }
 0xebe   : > { %v2351_v59 = vsel %vm982_vm1, %v2338_v57, -inf }
 0xebf   : > { %2352 = vmax.xlane.f32.xlu0 %v2351_v59  ;;  %2343 = vmax.xlane.f32.xlu2 %v2342_v60 }
 0xec3   : > { %v2302_v63 = vpop.f32.mrf.mxu3 }
 0xec5   : > { %v2340_v2 = vpop.f32.mrf.mxu1 }
 0xec6   : > { %v2717_v2 = vunpack.c.l.b16 %v6407_v35 }
 0xed7   : > { %2260 = vrot.lane.b32.xlu2 %v6333_v6, %s5194_s16 }
 0xf2a   : > { %v2350_v3 = vpop.xlane.xlu2 %2349 }
 0xf2b   : > { %v2356_v7 = vsub.f32 %v2319_v47, %v2350_v3  ;;  %v4897_v47 = vld [vmem:[%s7041_s2 + $0x78] sm:$0xf0] }
 0xf2c   : > { %v4380_v55 = vor.u32 %v4897_v47, %v4379_v46 }
 0xf2d   : > { %v2362_v1 = vmul.f32 1.442695, %v2356_v7 }
 0xf2f   : > { %5090 = vpow2.f32 %v2362_v1  ;;  %v2716_v1 = vunpack.c.l.b16 %v6398_v34 }
 0xf30   : > { %v2347_v48 = vpop.xlane.xlu1 %2346 }
 0xf31   : > { %v2355_v51 = vsub.f32 %v2300_v49, %v2347_v48  ;;  %v451_v49 = vperm.slane %v5128_v61, 3 }
 0xf32   : > { %v2353_v62 = vpop.xlane.xlu0 %2352  ;;  %v2344_v33 = vpop.xlane.xlu2 %2343 }
 0xf33   : > { %v2357_v31 = vsub.f32 %v2338_v57, %v2353_v62  ;;  %v2354_v54 = vsub.f32 %v2281_v45, %v2344_v33  ;;  %v2360_v10 = vmul.f32 1.442695, %v2355_v51  ;;  %v4384_v45 = vor.u32 %v4898_v43, %v4383_v42  ;;  %v5040_v42 = vld [vmem:[%s7043_s4 + $0x8] ss:$0 sm:$0xff] }
 0xf34   : > { %v670_v57 = vadd.f32 %v5693_v26, %v451_v49  ;;  %v668_v60 = vadd.f32 %v5677_v14, %v451_v49  ;;  %v2718_v14 = vpack.c.b16 %v2717_v2, %v2716_v1 }
 0xf35   : > { %v6357_v8 = vpop.eup %5090  ;;  %v2364_v9 = vmul.f32 1.442695, %v2357_v31  ;;  %v2358_v11 = vmul.f32 1.442695, %v2354_v54 }
 0xf36   : > { %v2372_v13 = vsel %vm982_vm1, %v6357_v8, 0.0  ;;  %v6445_v63 = vpack.c.bf16 %v670_v57, %v670_v57  ;;  %v6448_v3 = vpack.c.bf16 %v668_v60, %v668_v60  ;;  %v4912_v57 = vld [vmem:[%s7041_s2 + $0x5c0] sm:$0xf0] }
 0xf37   : > { %5092 = vpow2.f32 %v2364_v9  ;;  %2373 = vadd.xlane.f32.xlu0 %v2372_v13 }
 0xf38   : > { %5094 = vpow2.f32 %v2358_v11  ;;  %v2853_v33 = vunpack.c.l.b16 %v6445_v63  ;;  %v2852_v54 = vunpack.c.l.b16 %v6448_v3 }
 0xf39   : > { %5096 = vpow2.f32 %v2360_v10 }
 0xf3a   : > { %v2261_v15 = vpop.permute.xlu2 %2260  ;;  %v2854_v10 = vpack.c.b16 %v2853_v33, %v2852_v54  ;;  %v4435_v54 = vld [vmem:[%s7041_s2 + $0x4a4] sm:$0xf] }
 0xf3b   : > { %v2413_v16 = vsel %vm1034_vm2, %v2261_v15, 0  ;;  %v2723_v15 = vsel %vm905_vm0, %v2718_v14, 0 }
 0xf3c   : > { %2422 = vmatpush.bf16.msra.mxu3 %v2413_v16 }
 0xf3d   : > { %v6362_v18 = vpop.eup %5092 }
 0xf3e   : > { %v6364_v12 = vpop.eup %5094  ;;  %v2375_v20 = vsel %vm982_vm1, %v6362_v18, 0.0 }
 0xf3f   : > { %2376 = vadd.xlane.f32.xlu1 %v2375_v20  ;;  %v2366_v21 = vsel %vm982_vm1, %v6364_v12, 0.0  ;;  %v6370_v53 = vpop.eup %5096 }
 0xf40   : > { %2367 = vadd.xlane.f32.xlu2 %v2366_v21  ;;  %v2369_v5 = vsel %vm982_vm1, %v6370_v53, 0.0 }
 0xf47   : > { %2370 = vadd.xlane.f32.xlu1 %v2369_v5 }
 0xf4b   : > { %2262 = vrot.lane.b32.xlu0 %v6333_v6, %s5193_s15 }
 0xf58   : > { %2688 = vrot.lane.b32.xlu2 %v6398_v34, %s5194_s16 }
 0xf60   : > { %2692 = vrot.lane.b32.xlu2 %v6398_v34, %s5193_s15  ;;  %2264 = vrot.lane.b32.xlu1 %v6333_v6, %s5195_s17  ;;  %v4900_v6 = vld [vmem:[%s7041_s2 + $0x2b8] sm:$0xf0] }
 0xf61   : > { %v4392_v37 = vor.u32 %v4900_v6, %v4391_v44 }
 0xf63   : > { %2554 = vmatpush.bf16.msrb.mxu2 %v4392_v37 }
 0xf67   : > { %2555 = vmatpush.bf16.msrb.mxu2 %v4388_v41 }
 0xf68   : > { %2694 = vrot.lane.b32.xlu2 %v6407_v35, %s5193_s15 }
 0xf6b   : > { %2556 = vmatpush.bf16.msrb.mxu2 %v4384_v45 }
 0xf6f   : > { %2557 = vmatpush.bf16.msrb.mxu2 %v4380_v55 }
 0xf70   : > { %2698 = vrot.lane.b32.xlu2 %v6407_v35, %s5195_s17 }
 0xfaa   : > { %v2374_v56 = vpop.xlane.xlu0 %2373 }
 0xfab   : > { %5098 = vrcp.f32 %v2374_v56  ;;  %v4439_v56 = vld [vmem:[%s7041_s2 + $0x564] sm:$0xf] }
 0xfb1   : > { %v5099_v7 = vpop.eup %5098 }
 0xfb2   : > { %v2377_v58 = vpop.xlane.xlu1 %2376  ;;  %v2384_v51 = vmul.f32 %v5099_v7, %v6357_v8 }
 0xfb3   : > { %v2368_v59 = vpop.xlane.xlu2 %2367 }
 0xfb4   : > { %5100 = vrcp.f32 %v2368_v59  ;;  %v2388_v16 = vpack.c.bf16 %v2384_v51, %v2384_v51 }
 0xfba   : > { %v5101_v48 = vpop.eup %5100  ;;  %v2371_v62 = vpop.xlane.xlu1 %2370 }
 0xfbb   : > { %v2382_v26 = vmul.f32 %v5101_v48, %v6364_v12  ;;  %5102 = vrcp.f32 %v2371_v62  ;;  %v6453_v31 = vpop.permute.xlu2 %2688 }
 0xfbc   : > { %5104 = vrcp.f32 %v2377_v58  ;;  %v2738_v60 = vunpack.c.l.b16 %v6453_v31  ;;  %v4911_v31 = vld [vmem:[%s7041_s2 + $0x500] sm:$0xf0] }
 0xfbd   : > { %v2386_v9 = vpack.c.bf16 %v2382_v26, %v2382_v26  ;;  %v2263_v11 = vpop.permute.xlu0 %2262  ;;  %v4436_v51 = vor.u32 %v4911_v31, %v4435_v54 }
 0xfbe   : > { %v2432_v13 = vsel %vm1034_vm2, %v2263_v11, 0  ;;  %v4910_v11 = vld [vmem:[%s7041_s2 + $0x440] sm:$0xf0] }
 0xfbf   : > { %4373 = vmatmul.msk.bf16.vlgmr.msra.gmra.mxu2 %vm982_vm1, %v2386_v9  ;;  %2441 = vmatpush.bf16.msra.mxu0 %v2432_v13  ;;  %v4431_v9 = vld [vmem:[%s7041_s2 + $0x3e4] sm:$0xf] }
 0xfc0   : > { %2866 = vmatpush.bf16.msra.mxu2 %v2854_v10  ;;  %v4432_v13 = vor.u32 %v4910_v11, %v4431_v9  ;;  %v4427_v10 = vld [vmem:[%s7041_s2 + $0x324] sm:$0xf] }
 0xfc1   : > { %v5103_v12 = vpop.eup %5102 }
 0xfc2   : > { %v2383_v20 = vmul.f32 %v5103_v12, %v6370_v53  ;;  %4375 = vmatmul.msk.bf16.vlgmr.msra.gmra.mxu0 %vm982_vm1, %v2388_v16  ;;  %v5105_v23 = vpop.eup %5104  ;;  %v4423_v12 = vld [vmem:[%s7041_s2 + $0x264] sm:$0xf] }
 0xfc3   : > { %2732 = vmatpush.bf16.xpose.msrb.mxu0 %v2723_v15  ;;  %v2693_v21 = vpop.permute.xlu2 %2692  ;;  %v2385_v27 = vmul.f32 %v5105_v23, %v6362_v18  ;;  %v4909_v15 = vld [vmem:[%s7041_s2 + $0x380] sm:$0xf0] }
 0xfc4   : > { %v2387_v8 = vpack.c.bf16 %v2383_v20, %v2383_v20  ;;  %v2760_v61 = vunpack.c.l.b16 %v2693_v21  ;;  %v4428_v16 = vor.u32 %v4909_v15, %v4427_v10  ;;  %v4908_v20 = vld [vmem:[%s7041_s2 + $0x2c0] sm:$0xf0] }
 0xfc5   : > { %v2389_v29 = vpack.c.bf16 %v2385_v27, %v2385_v27  ;;  %v4424_v21 = vor.u32 %v4908_v20, %v4423_v12  ;;  %v4906_v23 = vld [vmem:[%s7041_s2 + $0x140] sm:$0xf0] }
 0xfc6   : > { %4374 = vmatmul.msk.bf16.vlgmr.msra.gmra.mxu3 %vm982_vm1, %v2387_v8  ;;  %v4419_v8 = vld [vmem:[%s7041_s2 + $0x1a4] sm:$0xf] }
 0xfc7   : > { %v4905_v27 = vld [vmem:[%s7041_s2 + $0x80] sm:$0xf0] }
 0xfcb   : > { %v2695_v5 = vpop.permute.xlu2 %2694 }
 0xfcc   : > { %v2761_v22 = vunpack.c.l.b16 %v2695_v5  ;;  %v4907_v5 = vld [vmem:[%s7041_s2 + $0x200] sm:$0xf0] }
 0xfce   : > { %v2762_v24 = vpack.c.b16 %v2761_v22, %v2760_v61  ;;  %v4420_v61 = vor.u32 %v4907_v5, %v4419_v8  ;;  %v4415_v22 = vld [vmem:[%s7041_s2 + $0xe4] sm:$0xf] }
 0xfd0   : > { %v2767_v25 = vsel %vm905_vm0, %v2762_v24, 0  ;;  %v4411_v24 = vld [vmem:[%s7041_s2 + $0x24] sm:$0xf] }
 0xfd1   : > { %2776 = vmatpush.bf16.xpose.msra.mxu0 %v2767_v25  ;;  %v4416_v25 = vor.u32 %v4906_v23, %v4415_v22 }
 0xfd2   : > { %v2265_v28 = vpop.permute.xlu1 %2264 }
 0xfd3   : > { %v2451_v53 = vsel %vm1034_vm2, %v2265_v28, 0  ;;  %v2699_v1 = vpop.permute.xlu2 %2698  ;;  %v4412_v28 = vor.u32 %v4905_v27, %v4411_v24 }
 0xfd4   : > { %2460 = vmatpush.bf16.msrb.mxu1 %v2451_v53  ;;  %v2783_v62 = vunpack.c.l.b16 %v2699_v1 }
 0xfd7   : > { %4376 = vmatmul.msk.bf16.vlgmr.msrb.gmra.mxu1 %vm982_vm1, %v2389_v29 }
0x103f   : > { %v2443_v30 = vpop.f32.mrf.mxu0 }
0x1042   : > { %v2405_v32 = vpop.f32.mrf.mxu2 }
0x1047   : > { %v2445_v50 = vpop.f32.mrf.mxu0 }
0x1049   : > { %v2424_v0 = vpop.f32.mrf.mxu3 }
0x104a   : > { %v2407_v39 = vpop.f32.mrf.mxu2  ;;  %2484 = vrot.lane.b32.xlu0 %v2424_v0, %s5195_s17 }
0x1051   : > { %v2426_v17 = vpop.f32.mrf.mxu3 }
0x1052   : > { %2488 = vrot.lane.b32.xlu0 %v2443_v30, %s5193_s15 }
0x1054   : > { %v2462_v36 = vpop.f32.mrf.mxu1 }
0x1055   : > { %2492 = vrot.lane.b32.xlu1 %v2462_v36, %s5194_s16 }
0x105c   : > { %v2464_v18 = vpop.f32.mrf.mxu1 }
0x105d   : > { %v5041_v18 = vld [vmem:[%s7043_s4 + $0x1a] ss:$0 sm:$0xff] }
0x10bc   : > { %v2485_v52 = vpop.permute.xlu0 %2484 }
0x10bd   : > { %v2495_v6 = vsel %vm905_vm0, %v2405_v32, %v2485_v52 }
0x10c4   : > { %v2489_v44 = vpop.permute.xlu0 %2488 }
0x10c5   : > { %v2496_v37 = vsel %vm1138_vm3, %v2495_v6, %v2489_v44  ;;  %v5042_v6 = vld [vmem:[%s7043_s4 + $0x20] ss:$0 sm:$0xff] }
0x10c7   : > { %v2493_v38 = vpop.permute.xlu1 %2492 }
0x10c8   : > { %v2497_v40 = vsel %vm1140_vm4, %v2496_v37, %v2493_v38 }
0x10c9   : > { %v2498_v41 = vpack.c.bf16 %v2497_v40, %v2497_v40 }
0x10cb   : > { %2558 = vmatmul.bf16.vlgmr.msrb.gmra.mxu2 %v2498_v41  ;;  %v5043_v41 = vld [vmem:[%s7043_s4 + $0xa] ss:$0 sm:$0xff] }
0x114e   : > { %v2559_v43 = vpop.f32.mrf.mxu2 }
0x114f   : > { %v2560_v45 = vadd.f32 %v5040_v42, %v2559_v43 }
0x1151   : > { %v2563_v46 = vadd.f32 %v2560_v45, %v6326_v19  ;;  %v4440_v19 = vor.u32 %v4912_v57, %v4439_v56 }
0x1153   : > { %2566 = vadd.xlane.f32.xlu0 %v2563_v46  ;;  %2663 = vmatpush.bf16.msrb.mxu3 %v4440_v19 }
0x1156   : > { %v2561_v47 = vpop.f32.mrf.mxu2 }
0x1157   : > { %2664 = vmatpush.bf16.msrb.mxu3 %v4436_v51 }
0x115b   : > { %2665 = vmatpush.bf16.msrb.mxu3 %v4432_v13 }
0x115f   : > { %2666 = vmatpush.bf16.msrb.mxu3 %v4428_v16 }
0x1163   : > { %2667 = vmatpush.bf16.msrb.mxu3 %v4424_v21 }
0x1167   : > { %2690 = vrot.lane.b32.xlu0 %v6407_v35, %s5194_s16  ;;  %2668 = vmatpush.bf16.msrb.mxu3 %v4420_v61 }
0x116b   : > { %2669 = vmatpush.bf16.msrb.mxu3 %v4416_v25 }
0x116f   : > { %2696 = vrot.lane.b32.xlu0 %v6398_v34, %s5195_s17  ;;  %2670 = vmatpush.bf16.msrb.mxu3 %v4412_v28 }
0x11c6   : > { %v2567_v55 = vpop.xlane.xlu0 %2566 }
0x11c7   : > { %v2568_v49 = vmul.f32 %v2567_v55, %v5849_v4 }
0x11c9   : > { %v2569_v58 = vsub.f32 %v2563_v46, %v2568_v49 }
0x11cb   : > { %v2570_v59 = vmul.f32 %v2569_v58, %v2569_v58 }
0x11cd   : > { %2571 = vadd.xlane.f32.xlu1 %v2570_v59 }
0x11d9   : > { %v2691_v35 = vpop.permute.xlu0 %2690 }
0x11da   : > { %v2739_v34 = vunpack.c.l.b16 %v2691_v35 }
0x11dc   : > { %v2740_v2 = vpack.c.b16 %v2739_v34, %v2738_v60 }
0x11de   : > { %v2745_v7 = vsel %vm905_vm0, %v2740_v2, 0 }
0x11df   : > { %2754 = vmatpush.bf16.xpose.msra.mxu1 %v2745_v7 }
0x11e1   : > { %v2697_v48 = vpop.permute.xlu0 %2696 }
0x11e2   : > { %v2782_v33 = vunpack.c.l.b16 %v2697_v48 }
0x11e4   : > { %v2784_v26 = vpack.c.b16 %v2783_v62, %v2782_v33 }
0x11e6   : > { %v2789_v14 = vsel %vm905_vm0, %v2784_v26, 0 }
0x11e7   : > { %2798 = vmatpush.bf16.xpose.msrb.mxu1 %v2789_v14 }
0x1240   : > { %v2572_v53 = vpop.xlane.xlu1 %2571 }
0x1241   : > { %v2573_v29 = vmul.f32 %v2572_v53, %v5849_v4 }
0x1243   : > { %v2574_v30 = vadd.f32 1e-05, %v2573_v29 }
0x1245   : > { %5106 = vrsqrt.f32 %v2574_v30  ;;  %vm2581_vm2 = vweird.f32 %v2574_v30 }
0x124b   : > { %v5107_v32 = vpop.eup %5106 }
0x124c   : > { %v2576_v50 = vmul.f32 %v5107_v32, %v2574_v30  ;;  %vm2582_vm1 = vweird.f32 %v5107_v32 }
0x124d   : > { %vm2583_vm5 = vmor %vm2581_vm2, %vm2582_vm1 }
0x124e   : > { %v2577_v0 = vmul.f32 %v5107_v32, %v2576_v50 }
0x1250   : > { %v2578_v39 = vmul.f32 0.5, %v2577_v0 }
0x1252   : > { %v2579_v17 = vsub.f32 1.5, %v2578_v39 }
0x1254   : > { %v2580_v36 = vmul.f32 %v5107_v32, %v2579_v17 }
0x1256   : > { %v2584_v52 = vsel %vm2583_vm5, %v5107_v32, %v2580_v36 }
0x1257   : > { %v2585_v44 = vmul.f32 %v2584_v52, %v2569_v58 }
0x1259   : > { %v2589_v37 = vmul.f32 %v5041_v18, %v2585_v44 }
0x125b   : > { %v6540_v38 = vadd.f32 %v5042_v6, %v2589_v37 }
0x125d   : > { %v2611_v40 = vpack.c.bf16 %v6540_v38, %v6540_v38 }
0x125f   : > { %2671 = vmatmul.bf16.vlgmr.msrb.gmra.mxu3 %v2611_v40 }
0x12e2   : > { %v2672_v42 = vpop.f32.mrf.mxu3 }
0x12e3   : > { %v2673_v43 = vadd.f32 %v5043_v41, %v2672_v42 }
0x12e5   : > { %v2676_v45 = vpack.c.bf16 %v2673_v43, %v2673_v43 }
0x12e7   : > { %2682 = vrot.lane.b32.xlu0 %v2676_v45, %s5195_s17  ;;  %2678 = vrot.lane.b32.xlu1 %v2676_v45, %s5194_s16 }
0x12e8   : > { %4441 = vmatmul.msk.bf16.vlgmr.msrb.gmra.mxu0 %vm905_vm0, %v2676_v45 }
0x12ea   : > { %v2674_v46 = vpop.f32.mrf.mxu3 }
0x12ef   : > { %2680 = vrot.lane.b32.xlu1 %v2676_v45, %s5193_s15 }
0x1359   : > { %v2679_v47 = vpop.permute.xlu1 %2678  ;;  %v2683_v56 = vpop.permute.xlu0 %2682 }
0x135a   : > { %4442 = vmatmul.msk.bf16.vlgmr.msra.gmra.mxu1 %vm905_vm0, %v2679_v47 }
0x1361   : > { %v2681_v55 = vpop.permute.xlu1 %2680 }
0x1362   : > { %4443 = vmatmul.msk.bf16.vlgmr.msra.gmra.mxu0 %vm905_vm0, %v2681_v55 }
0x1365   : > { %v2734_v49 = vpop.f32.mrf.mxu0 }
0x1366   : > { %v2804_v34 = vsel %vm1455_vm9, %v2734_v49, -inf }
0x136a   : > { %4444 = vmatmul.msk.bf16.vlgmr.msrb.gmra.mxu1 %vm905_vm0, %v2683_v56 }
0x136d   : > { %v2736_v57 = vpop.f32.mrf.mxu0 }
0x13d7   : > { %v2756_v19 = vpop.f32.mrf.mxu1 }
0x13d8   : > { %v2807_v58 = vsel %vm1455_vm9, %v2756_v19, -inf }
0x13d9   : > { %2808 = vmax.xlane.f32.xlu2 %v2807_v58 }
0x13df   : > { %v2758_v59 = vpop.f32.mrf.mxu1  ;;  %v2778_v35 = vpop.f32.mrf.mxu0 }
0x13e0   : > { %v2810_v60 = vsel %vm1455_vm9, %v2778_v35, -inf }
0x13e1   : > { %2811 = vmax.xlane.f32.xlu1 %v2810_v60  ;;  %2805 = vmax.xlane.f32.xlu2 %v2804_v34 }
0x13e7   : > { %v2780_v2 = vpop.f32.mrf.mxu0  ;;  %v2800_v7 = vpop.f32.mrf.mxu1 }
0x13e8   : > { %v2813_v1 = vsel %vm1455_vm9, %v2800_v7, -inf }
0x13e9   : > { %2814 = vmax.xlane.f32.xlu0 %v2813_v1  ;;  %v4920_v1 = vld [vmem:[%s7041_s2 + $0x5d8] sm:$0xf0] }
0x13ef   : > { %v2802_v48 = vpop.f32.mrf.mxu1 }
0x13f0   : > { %v4475_v48 = vld [vmem:[%s7041_s2 + $0x4bc] sm:$0xf] }
0x13f9   : > { %2706 = vrot.lane.b32.xlu2 %v6445_v63, %s5194_s16 }
0x13fd   : > { %2704 = vrot.lane.b32.xlu0 %v6448_v3, %s5194_s16 }
0x1401   : > { %2712 = vrot.lane.b32.xlu2 %v6448_v3, %s5195_s17 }
0x1405   : > { %2708 = vrot.lane.b32.xlu0 %v6448_v3, %s5193_s15 }
0x140d   : > { %2714 = vrot.lane.b32.xlu0 %v6445_v63, %s5195_s17 }
0x144c   : > { %v2809_v62 = vpop.xlane.xlu2 %2808 }
0x144d   : > { %v2817_v33 = vsub.f32 %v2756_v19, %v2809_v62 }
0x144f   : > { %v2822_v26 = vmul.f32 1.442695, %v2817_v33  ;;  %v4919_v33 = vld [vmem:[%s7041_s2 + $0x518] sm:$0xf0] }
0x1451   : > { %5108 = vpow2.f32 %v2822_v26  ;;  %v4476_v26 = vor.u32 %v4919_v33, %v4475_v48  ;;  %v4928_v48 = vld [vmem:[%s7041_s2 + $0x2e4] sm:$0xf0] }
0x1454   : > { %v2812_v14 = vpop.xlane.xlu1 %2811  ;;  %v2806_v54 = vpop.xlane.xlu2 %2805 }
0x1455   : > { %v2818_v31 = vsub.f32 %v2778_v35, %v2812_v14  ;;  %v2816_v51 = vsub.f32 %v2734_v49, %v2806_v54  ;;  %v4471_v14 = vld [vmem:[%s7041_s2 + $0x3fc] sm:$0xf] }
0x1456   : > { %v4918_v54 = vld [vmem:[%s7041_s2 + $0x458] sm:$0xf0] }
0x1457   : > { %v5109_v9 = vpop.eup %5108  ;;  %v2824_v11 = vmul.f32 1.442695, %v2818_v31  ;;  %v2820_v13 = vmul.f32 1.442695, %v2816_v51  ;;  %v4467_v31 = vld [vmem:[%s7041_s2 + $0x33c] sm:$0xf]  ;;  %v4472_v51 = vor.u32 %v4918_v54, %v4471_v14 }
0x1458   : > { %v2831_v10 = vsel %vm1455_vm9, %v5109_v9, 0.0  ;;  %v4499_v54 = vld [vmem:[%s7041_s2 + $0x1c8] sm:$0xf] }
0x1459   : > { %5110 = vpow2.f32 %v2824_v11  ;;  %2832 = vadd.xlane.f32.xlu1 %v2831_v10  ;;  %v4916_v10 = vld [vmem:[%s7041_s2 + $0x2d8] sm:$0xf0] }
0x145a   : > { %5112 = vpow2.f32 %v2820_v13  ;;  %v4463_v13 = vld [vmem:[%s7041_s2 + $0x27c] sm:$0xf] }
0x145c   : > { %v2815_v3 = vpop.xlane.xlu0 %2814  ;;  %v2707_v22 = vpop.permute.xlu2 %2706 }
0x145d   : > { %v2819_v15 = vsub.f32 %v2800_v7, %v2815_v3  ;;  %v2873_v24 = vunpack.c.l.b16 %v2707_v22  ;;  %v4479_v7 = vld [vmem:[%s7041_s2 + $0x57c] sm:$0xf]  ;;  %v4464_v3 = vor.u32 %v4916_v10, %v4463_v13  ;;  %v4491_v10 = vld [vmem:[%s7041_s2 + $0x108] sm:$0xf] }
0x145e   : > { %v4480_v62 = vor.u32 %v4920_v1, %v4479_v7  ;;  %v4507_v1 = vld [vmem:[%s7041_s2 + $0x288] sm:$0xf] }
0x145f   : > { %v5111_v16 = vpop.eup %5110  ;;  %v2826_v12 = vmul.f32 1.442695, %v2819_v15  ;;  %v4459_v15 = vld [vmem:[%s7041_s2 + $0x1bc] sm:$0xf]  ;;  %v4508_v33 = vor.u32 %v4928_v48, %v4507_v1 }
0x1460   : > { %v5113_v20 = vpop.eup %5112  ;;  %v2834_v21 = vsel %vm1455_vm9, %v5111_v16, 0.0  ;;  %3016 = vmatpush.bf16.msrb.mxu2 %v4480_v62  ;;  %v4927_v62 = vld [vmem:[%s7041_s2 + $0x28c] sm:$0xf] }
0x1461   : > { %5114 = vpow2.f32 %v2826_v12  ;;  %2835 = vadd.xlane.f32.xlu1 %v2834_v21  ;;  %v2828_v8 = vsel %vm1455_vm9, %v5113_v20, 0.0  ;;  %v4914_v21 = vld [vmem:[%s7041_s2 + $0x158] sm:$0xf0] }
0x1462   : > { %2829 = vadd.xlane.f32.xlu2 %v2828_v8 }
0x1464   : > { %v2713_v53 = vpop.permute.xlu2 %2712  ;;  %3017 = vmatpush.bf16.msrb.mxu2 %v4476_v26  ;;  %v4509_v26 = vld [vmem:[%s7041_s2 + $0x2e8] sm:$0xf0] }
0x1465   : > { %v2912_v30 = vunpack.c.l.b16 %v2713_v53  ;;  %v4512_v14 = vor.u32 %v4927_v62, %v4509_v26 }
0x1467   : > { %v5115_v5 = vpop.eup %5114 }
0x1468   : > { %v2837_v61 = vsel %vm1455_vm9, %v5115_v5, 0.0  ;;  %3018 = vmatpush.bf16.msrb.mxu2 %v4472_v51  ;;  %v4925_v51 = vld [vmem:[%s7041_s2 + $0x1cc] sm:$0xf] }
0x1469   : > { %2838 = vadd.xlane.f32.xlu1 %v2837_v61  ;;  %v4913_v61 = vld [vmem:[%s7041_s2 + $0x98] sm:$0xf0] }
0x146f   : > { %v2705_v23 = vpop.permute.xlu0 %2704 }
0x1470   : > { %v2872_v25 = vunpack.c.l.b16 %v2705_v23 }
0x1472   : > { %v2874_v27 = vpack.c.b16 %v2873_v24, %v2872_v25 }
0x1474   : > { %2886 = vmatpush.bf16.msra.mxu3 %v2874_v27 }
0x1477   : > { %v2709_v28 = vpop.permute.xlu0 %2708 }
0x1478   : > { %v2892_v46 = vunpack.c.l.b16 %v2709_v28 }
0x147f   : > { %v2715_v29 = vpop.permute.xlu0 %2714 }
0x1480   : > { %v2913_v32 = vunpack.c.l.b16 %v2715_v29 }
0x1482   : > { %v2914_v50 = vpack.c.b16 %v2913_v32, %v2912_v30  ;;  %2710 = vrot.lane.b32.xlu1 %v6445_v63, %s5193_s15  ;;  %v5044_v30 = vld [vmem:[%s7043_s4 + $0x10] ss:$0 sm:$0xff] }
0x1484   : > { %2926 = vmatpush.bf16.msra.mxu1 %v2914_v50 }
0x14cc   : > { %v2833_v0 = vpop.xlane.xlu1 %2832 }
0x14cd   : > { %5116 = vrcp.f32 %v2833_v0 }
0x14d3   : > { %v5117_v39 = vpop.eup %5116 }
0x14d4   : > { %v2845_v17 = vmul.f32 %v5117_v39, %v5109_v9  ;;  %v2836_v36 = vpop.xlane.xlu1 %2835  ;;  %v4917_v9 = vld [vmem:[%s7041_s2 + $0x398] sm:$0xf0] }
0x14d5   : > { %v2830_v18 = vpop.xlane.xlu2 %2829  ;;  %v4468_v11 = vor.u32 %v4917_v9, %v4467_v31  ;;  %v4926_v31 = vld [vmem:[%s7041_s2 + $0x224] sm:$0xf0] }
0x14d6   : > { %v2849_v52 = vpack.c.bf16 %v2845_v17, %v2845_v17  ;;  %5118 = vrcp.f32 %v2830_v18  ;;  %v4539_v17 = vld [vmem:[%s7041_s2 + $0x588] sm:$0xf]  ;;  %v4935_v18 = vld [vmem:[%s7041_s2 + $0x58c] sm:$0xf]  ;;  %v4500_v9 = vor.u32 %v4926_v31, %v4499_v54  ;;  %v5047_v54 = vld [vmem:[%s7043_s4 + $0x16] ss:$0 sm:$0xff] }
0x14d7   : > { %3019 = vmatpush.bf16.msrb.mxu2 %v4468_v11  ;;  %v4501_v11 = vld [vmem:[%s7041_s2 + $0x228] sm:$0xf0] }
0x14d8   : > { %4446 = vmatmul.msk.bf16.vlgmr.msra.gmra.mxu3 %vm1455_vm9, %v2849_v52  ;;  %v4504_v13 = vor.u32 %v4925_v51, %v4501_v11 }
0x14db   : > { %3020 = vmatpush.bf16.msrb.mxu2 %v4464_v3  ;;  %v4924_v3 = vld [vmem:[%s7041_s2 + $0x164] sm:$0xf0] }
0x14dc   : > { %v5119_v44 = vpop.eup %5118  ;;  %v2839_v6 = vpop.xlane.xlu1 %2838 }
0x14dd   : > { %v2844_v37 = vmul.f32 %v5119_v44, %v5113_v20  ;;  %5120 = vrcp.f32 %v2839_v6  ;;  %v4455_v20 = vld [vmem:[%s7041_s2 + $0xfc] sm:$0xf]  ;;  %v4541_v44 = vld [vmem:[%s7041_s2 + $0x5e8] sm:$0xf0] }
0x14de   : > { %5122 = vrcp.f32 %v2836_v36  ;;  %v4456_v8 = vor.u32 %v4914_v21, %v4455_v20  ;;  %v4936_v36 = vld [vmem:[%s7041_s2 + $0x5e4] sm:$0xf0] }
0x14df   : > { %v2848_v40 = vpack.c.bf16 %v2844_v37, %v2844_v37  ;;  %v4540_v52 = vor.u32 %v4936_v36, %v4539_v17  ;;  %v4483_v21 = vld [vmem:[%s7041_s2 + $0x48] sm:$0xf] }
0x14e1   : > { %4445 = vmatmul.msk.bf16.vlgmr.msra.gmra.mxu2 %vm1455_vm9, %v2848_v40  ;;  %3163 = vmatpush.bf16.msrb.mxu3 %v4540_v52  ;;  %v4940_v52 = vld [vmem:[%s7042_s3 + $0x118] sm:$0xff] }
0x14e3   : > { %v5121_v41 = vpop.eup %5120 }
0x14e4   : > { %v2847_v63 = vmul.f32 %v5121_v41, %v5115_v5  ;;  %v5123_v43 = vpop.eup %5122  ;;  %v4451_v5 = vld [vmem:[%s7041_s2 + $0x3c] sm:$0xf] }
0x14e5   : > { %v2846_v55 = vmul.f32 %v5123_v43, %v5111_v16  ;;  %v4915_v16 = vld [vmem:[%s7041_s2 + $0x218] sm:$0xf0]  ;;  %v4452_v22 = vor.u32 %v4913_v61, %v4451_v5  ;;  %v4933_v43 = vld [vmem:[%s7041_s2 + $0x4cc] sm:$0xf] }
0x14e6   : > { %v2851_v42 = vpack.c.bf16 %v2847_v63, %v2847_v63  ;;  %v4460_v12 = vor.u32 %v4915_v16, %v4459_v15  ;;  %v4531_v63 = vld [vmem:[%s7041_s2 + $0x4c8] sm:$0xf]  ;;  %v4923_v15 = vld [vmem:[%s7041_s2 + $0x10c] sm:$0xf]  ;;  %v4492_v16 = vor.u32 %v4924_v3, %v4491_v10 }
0x14e7   : > { %v2850_v56 = vpack.c.bf16 %v2846_v55, %v2846_v55  ;;  %v4523_v55 = vld [vmem:[%s7041_s2 + $0x408] sm:$0xf]  ;;  %v4921_v5 = vld [vmem:[%s7041_s2 + $0x4c] sm:$0xf] }
0x14e8   : > { %4448 = vmatmul.msk.bf16.vlgmr.msra.gmra.mxu1 %vm1455_vm9, %v2851_v42  ;;  %3021 = vmatpush.bf16.msrb.mxu2 %v4460_v12  ;;  %v4934_v42 = vld [vmem:[%s7041_s2 + $0x524] sm:$0xf0]  ;;  %v4493_v12 = vld [vmem:[%s7041_s2 + $0x168] sm:$0xf0] }
0x14e9   : > { %v4496_v20 = vor.u32 %v4923_v15, %v4493_v12  ;;  %v4723_v15 = vld [vmem:[%s7041_s2 + $0x590] sm:$0xf]  ;;  %v4981_v12 = vld [vmem:[%s7041_s2 + $0x594] sm:$0xf] }
0x14ec   : > { %3022 = vmatpush.bf16.msrb.mxu2 %v4456_v8  ;;  %v4922_v8 = vld [vmem:[%s7041_s2 + $0xa4] sm:$0xf0] }
0x14ed   : > { %v4484_v61 = vor.u32 %v4922_v8, %v4483_v21  ;;  %v4725_v21 = vld [vmem:[%s7041_s2 + $0x5f0] sm:$0xf0]  ;;  %v4731_v8 = vld [vmem:[%s7041_s2 + $0x598] sm:$0xf] }
0x14f0   : > { %3023 = vmatpush.bf16.msrb.mxu2 %v4452_v22  ;;  %v4485_v22 = vld [vmem:[%s7041_s2 + $0xa8] sm:$0xf0] }
0x14f4   : > { %v2711_v45 = vpop.permute.xlu1 %2710 }
0x14f5   : > { %v2893_v47 = vunpack.c.l.b16 %v2711_v45  ;;  %v4532_v45 = vor.u32 %v4934_v42, %v4531_v63  ;;  %v5045_v63 = vld [vmem:[%s7043_s4 + $0x1b] ss:$0 sm:$0xff] }
0x14f7   : > { %v2894_v49 = vpack.c.b16 %v2893_v47, %v2892_v46  ;;  %v4533_v46 = vld [vmem:[%s7041_s2 + $0x528] sm:$0xf0]  ;;  %3164 = vmatpush.bf16.msrb.mxu3 %v4532_v45 }
0x14f8   : > { %v4536_v47 = vor.u32 %v4933_v43, %v4533_v46  ;;  %v5046_v43 = vld [vmem:[%s7043_s4 + $0x21] ss:$0 sm:$0xff] }
0x14f9   : > { %2906 = vmatpush.bf16.msrb.mxu0 %v2894_v49  ;;  %v4932_v49 = vld [vmem:[%s7041_s2 + $0x464] sm:$0xf0] }
0x14fc   : > { %4447 = vmatmul.msk.bf16.vlgmr.msrb.gmra.mxu0 %vm1455_vm9, %v2850_v56  ;;  %v4931_v56 = vld [vmem:[%s7041_s2 + $0x40c] sm:$0xf] }
0x155b   : > { %v2888_v57 = vpop.f32.mrf.mxu3 }
0x155c   : > { %2950 = vrot.lane.b32.xlu0 %v2888_v57, %s5195_s17  ;;  %v4524_v57 = vor.u32 %v4932_v49, %v4523_v55  ;;  %v4946_v49 = vld [vmem:[%s7042_s3 + $0x148] sm:$0xff] }
0x155e   : > { %3165 = vmatpush.bf16.msrb.mxu3 %v4524_v57  ;;  %v4945_v57 = vld [vmem:[%s7042_s3 + $0x140] sm:$0xff] }
0x1563   : > { %v2890_v19 = vpop.f32.mrf.mxu3 }
0x1564   : > { %v2868_v58 = vpop.f32.mrf.mxu2  ;;  %v4525_v19 = vld [vmem:[%s7041_s2 + $0x468] sm:$0xf0] }
0x1565   : > { %v2928_v59 = vpop.f32.mrf.mxu1 }
0x1566   : > { %2958 = vrot.lane.b32.xlu1 %v2928_v59, %s5194_s16  ;;  %v4515_v59 = vld [vmem:[%s7041_s2 + $0x348] sm:$0xf]  ;;  %s230_s16 = scalar_lea.vmem [#allocation2], %s3733_s8 }
0x1567   : > { %s3655_s11 = sshll.u32 %s230_s16, 4  ;;  %s3656_s11 = int_to_ptr.vmem [resolvable:$true] %s3655_s11 }
0x156c   : > { %v2870_v35 = vpop.f32.mrf.mxu2 }
0x156d   : > { %v2930_v60 = vpop.f32.mrf.mxu1  ;;  %v4930_v35 = vld [vmem:[%s7041_s2 + $0x3a4] sm:$0xf0] }
0x156e   : > { %v4929_v60 = vld [vmem:[%s7041_s2 + $0x34c] sm:$0xf] }
0x1579   : > { %v2908_v34 = vpop.f32.mrf.mxu0 }
0x157a   : > { %2954 = vrot.lane.b32.xlu0 %v2908_v34, %s5193_s15  ;;  %v4516_v34 = vor.u32 %v4930_v35, %v4515_v59  ;;  %s3657_s15 = sshll.u32 %s3653_s10, 4  ;;  %s3658_s15 = int_to_ptr.hbm [resolvable:$true] %s3657_s15 }
0x157b   : > { %s5143_s12 = sshra.s32 %s3658_s15, 4  ;;  %s5144_s12 = int_to_ptr.hbm [resolvable:$true] %s5143_s12 }
0x157c   : > { %3166 = vmatpush.bf16.msrb.mxu3 %v4516_v34  ;;  %s5145_s30 = scalar_lea.hbm %s5144_s12, 32  ;;  %p5150_p0 = scmp.lt.s32.totalorder %s5144_s12, %s7044_s5 }
0x157d   : > { %p5146_p11 = scmp.ne.s32.totalorder %s5144_s12, %s5145_s30  ;;  %p5151_p1 = scmp.lt.s32.totalorder %s5149_s14, %s5145_s30 }
0x157f   : > { %p5147_p12 = pnand %p5146_p11, %p5265_p5  ;;  %p5152_p2 = por %p5151_p1, %p5150_p0 }
0x1580   : > { %3167 = vmatpush.bf16.msrb.mxu3 %v4508_v33 }
0x1581   : > { %v2910_v2 = vpop.f32.mrf.mxu0  ;;  %p5148_p13 = pneg %p5147_p12 }
0x1582   : > { %v4517_v2 = vld [vmem:[%s7041_s2 + $0x3a8] sm:$0xf0] }
0x1583   : > { %v4520_v7 = vor.u32 %v4929_v60, %v4517_v2  ;;  %p5153_p3 = pnand %p5152_p2, %p5148_p13 }
0x1584   : > { %3168 = vmatpush.bf16.msrb.mxu3 %v4500_v9 }
0x1588   : > { %3169 = vmatpush.bf16.msrb.mxu3 %v4492_v16  ;;  %v4983_v16 = vld [vmem:[%s7041_s2 + $0x5ec] sm:$0xf0] }
0x158c   : > { %3170 = vmatpush.bf16.msrb.mxu3 %v4484_v61  ;;  %v4728_v61 = vor.u32 %v4981_v12, %v4725_v21  ;;  %v4963_v12 = vld [vmem:[%s7041_s2 + $0x22c] sm:$0xf0] }
0x15ce   : > { %v2951_v23 = vpop.permute.xlu0 %2950 }
0x15cf   : > { %v2961_v24 = vsel %vm905_vm0, %v2868_v58, %v2951_v23  ;;  %v4528_v58 = vor.u32 %v4931_v56, %v4525_v19  ;;  %v4488_v23 = vor.u32 %v4921_v5, %v4485_v22  ;;  %v4939_v56 = vld [vmem:[%s7042_s3 + $0x110] sm:$0xff]  ;;  %v4937_v19 = vld [vmem:[%s7042_s3 + $0x100] sm:$0xff]  ;;  %v4984_v5 = vld [vmem:[%s7041_s2 + $0x5f4] sm:$0xf0] }
0x15d0   : > { %v4732_v22 = vor.u32 %v4984_v5, %v4731_v8  ;;  %v4645_v8 = vld [vmem:[%s7041_s2 + $0x230] sm:$0xf0]  ;;  %v4651_v5 = vld [vmem:[%s7041_s2 + $0x1d8] sm:$0xf] }
0x15d8   : > { %v2959_v27 = vpop.permute.xlu1 %2958 }
0x15ec   : > { %v2955_v25 = vpop.permute.xlu0 %2954 }
0x15ed   : > { %v2962_v28 = vsel %vm1138_vm3, %v2961_v24, %v2955_v25  ;;  %v4952_v24 = vld [vmem:[%s7042_s3 + $0x178] sm:$0xff] }
0x15ee   : > { %v2963_v53 = vsel %vm1140_vm4, %v2962_v28, %v2959_v27  ;;  %v4944_v25 = vld [vmem:[%s7042_s3 + $0x138] sm:$0xff]  ;;  %3338 = vmatpush.bf16.msra.mxu2 %v4952_v24 }
0x15ef   : > { %v2964_v29 = vpack.c.bf16 %v2963_v53, %v2963_v53  ;;  %v4951_v53 = vld [vmem:[%s7042_s3 + $0x170] sm:$0xff]  ;;  %3325 = vmatpush.bf16.msrb.mxu1 %v4944_v25  ;;  %v4733_v24 = vld [vmem:[%s7041_s2 + $0x5f8] sm:$0xf0] }
0x15f1   : > { %3024 = vmatmul.bf16.vlgmr.msrb.gmra.mxu2 %v2964_v29  ;;  %v4943_v29 = vld [vmem:[%s7042_s3 + $0x130] sm:$0xff] }
0x15f2   : > { %3339 = vmatpush.bf16.msra.mxu2 %v4951_v53 }
0x15f3   : > { %3326 = vmatpush.bf16.msrb.mxu1 %v4943_v29 }
0x1674   : > { %v3025_v32 = vpop.f32.mrf.mxu2 }
0x1675   : > { %v3026_v50 = vadd.f32 %v5044_v30, %v3025_v32  ;;  %v4950_v32 = vld [vmem:[%s7042_s3 + $0x168] sm:$0xff] }
0x1676   : > { %3340 = vmatpush.bf16.msra.mxu2 %v4950_v32  ;;  %v4979_v32 = vld [vmem:[%s7041_s2 + $0x52c] sm:$0xf0] }
0x1677   : > { %v3029_v0 = vadd.f32 %v3026_v50, %v6540_v38  ;;  %v4544_v38 = vor.u32 %v4935_v18, %v4541_v44  ;;  %v4942_v50 = vld [vmem:[%s7042_s3 + $0x128] sm:$0xff]  ;;  %v4948_v18 = vld [vmem:[%s7042_s3 + $0x158] sm:$0xff] }
0x1678   : > { %3327 = vmatpush.bf16.msrb.mxu1 %v4942_v50  ;;  %v4977_v50 = vld [vmem:[%s7041_s2 + $0x4d4] sm:$0xf] }
0x1679   : > { %3032 = vadd.xlane.f32.xlu0 %v3029_v0  ;;  %3176 = vmatpush.bf16.msra.mxu0 %v4544_v38 }
0x167c   : > { %v3027_v39 = vpop.f32.mrf.mxu2 }
0x167d   : > { %3177 = vmatpush.bf16.msra.mxu0 %v4536_v47  ;;  %v4941_v39 = vld [vmem:[%s7042_s3 + $0x120] sm:$0xff] }
0x167e   : > { %3328 = vmatpush.bf16.msrb.mxu1 %v4941_v39  ;;  %v4709_v39 = vld [vmem:[%s7041_s2 + $0x530] sm:$0xf0] }
0x1681   : > { %3178 = vmatpush.bf16.msra.mxu0 %v4528_v58  ;;  %v3076_v58 = vld [vmem:[%s7043_s4 + $0x13] sm:$0x3] }
0x1682   : > { %3329 = vmatpush.bf16.msrb.mxu1 %v4940_v52  ;;  %v3080_v59 = vperm.slane %v3076_v58, 1  ;;  %v3079_v2 = vperm.slane %v3076_v58, 0  ;;  %v4969_v58 = vld [vmem:[%s7041_s2 + $0x354] sm:$0xf] }
0x1685   : > { %3179 = vmatpush.bf16.msra.mxu0 %v4520_v7 }
0x1686   : > { %3330 = vmatpush.bf16.msrb.mxu1 %v4939_v56  ;;  %v4701_v56 = vld [vmem:[%s7041_s2 + $0x478] sm:$0xf0] }
0x1689   : > { %3180 = vmatpush.bf16.msra.mxu0 %v4512_v14 }
0x168d   : > { %3181 = vmatpush.bf16.msra.mxu0 %v4504_v13 }
0x1691   : > { %3182 = vmatpush.bf16.msra.mxu0 %v4496_v20  ;;  %v4724_v20 = vor.u32 %v4983_v16, %v4723_v15  ;;  %v4643_v16 = vld [vmem:[%s7041_s2 + $0x1d0] sm:$0xf] }
0x1692   : > { %v4644_v21 = vor.u32 %v4963_v12, %v4643_v16 }
0x1693   : > { %3585 = vmatpush.bf16.msra.mxu3 %v4724_v20  ;;  %v4961_v20 = vld [vmem:[%s7041_s2 + $0x1d4] sm:$0xf] }
0x1695   : > { %3183 = vmatpush.bf16.msra.mxu0 %v4488_v23  ;;  %v4982_v23 = vld [vmem:[%s7041_s2 + $0x59c] sm:$0xf] }
0x1696   : > { %v4736_v25 = vor.u32 %v4982_v23, %v4733_v24  ;;  %v4962_v24 = vld [vmem:[%s7041_s2 + $0x1dc] sm:$0xf] }
0x1699   : > { %3598 = vmatpush.bf16.msrb.mxu0 %v4728_v61  ;;  %v4964_v61 = vld [vmem:[%s7041_s2 + $0x234] sm:$0xf0] }
0x169a   : > { %v4652_v23 = vor.u32 %v4964_v61, %v4651_v5 }
0x16ec   : > { %v3033_v6 = vpop.xlane.xlu0 %3032 }
0x16ed   : > { %v3034_v37 = vmul.f32 %v3033_v6, %v5849_v4  ;;  %v4947_v6 = vld [vmem:[%s7042_s3 + $0x150] sm:$0xff] }
0x16ef   : > { %v6649_v40 = vsub.f32 %v3029_v0, %v3034_v37  ;;  %v4949_v0 = vld [vmem:[%s7042_s3 + $0x160] sm:$0xff] }
0x16f0   : > { %3341 = vmatpush.bf16.msra.mxu2 %v4949_v0 }
0x16f1   : > { %v3036_v41 = vmul.f32 %v6649_v40, %v6649_v40 }
0x16f3   : > { %3037 = vadd.xlane.f32.xlu1 %v3036_v41 }
0x16f4   : > { %3342 = vmatpush.bf16.msra.mxu2 %v4948_v18  ;;  %v4712_v18 = vor.u32 %v4977_v50, %v4709_v39  ;;  %v4629_v50 = vld [vmem:[%s7041_s2 + $0x170] sm:$0xf0]  ;;  %v4960_v39 = vld [vmem:[%s7041_s2 + $0x174] sm:$0xf0] }
0x16f6   : > { %3599 = vmatpush.bf16.msrb.mxu0 %v4712_v18  ;;  %v4958_v18 = vld [vmem:[%s7041_s2 + $0x11c] sm:$0xf] }
0x16f8   : > { %3343 = vmatpush.bf16.msra.mxu2 %v4947_v6 }
0x16fc   : > { %3344 = vmatpush.bf16.msra.mxu2 %v4946_v49  ;;  %v4974_v49 = vld [vmem:[%s7041_s2 + $0x41c] sm:$0xf] }
0x1700   : > { %3345 = vmatpush.bf16.msra.mxu2 %v4945_v57  ;;  %v4704_v57 = vor.u32 %v4974_v49, %v4701_v56 }
0x1704   : > { %3624 = vmatpush.bf16.msrb.mxu2 %v4736_v25  ;;  %v4653_v25 = vld [vmem:[%s7041_s2 + $0x238] sm:$0xf0] }
0x1766   : > { %v3038_v27 = vpop.xlane.xlu1 %3037 }
0x1767   : > { %v3039_v28 = vmul.f32 %v3038_v27, %v5849_v4 }
0x1769   : > { %v3040_v30 = vadd.f32 1e-05, %v3039_v28 }
0x176b   : > { %5124 = vrsqrt.f32 %v3040_v30  ;;  %vm3047_vm3 = vweird.f32 %v3040_v30 }
0x1771   : > { %v5125_v17 = vpop.eup %5124 }
0x1772   : > { %v3042_v36 = vmul.f32 %v5125_v17, %v3040_v30  ;;  %vm3048_vm0 = vweird.f32 %v5125_v17  ;;  %v4707_v30 = vld [vmem:[%s7041_s2 + $0x4d0] sm:$0xf] }
0x1773   : > { %vm3049_vm4 = vmor %vm3047_vm3, %vm3048_vm0  ;;  %v4708_v0 = vor.u32 %v4979_v32, %v4707_v30  ;;  %v4957_v30 = vld [vmem:[%s7041_s2 + $0x114] sm:$0xf] }
0x1774   : > { %v3043_v44 = vmul.f32 %v5125_v17, %v3042_v36  ;;  %v4980_v36 = vld [vmem:[%s7041_s2 + $0x534] sm:$0xf0] }
0x1775   : > { %3586 = vmatpush.bf16.msra.mxu3 %v4708_v0  ;;  %v4635_v0 = vld [vmem:[%s7041_s2 + $0x118] sm:$0xf] }
0x1776   : > { %v3044_v38 = vmul.f32 0.5, %v3043_v44  ;;  %v4978_v44 = vld [vmem:[%s7041_s2 + $0x4dc] sm:$0xf] }
0x1778   : > { %v3045_v37 = vsub.f32 1.5, %v3044_v38  ;;  %v4717_v38 = vld [vmem:[%s7041_s2 + $0x538] sm:$0xf0] }
0x1779   : > { %v4720_v6 = vor.u32 %v4978_v44, %v4717_v38  ;;  %v4611_v44 = vld [vmem:[%s7041_s2 + $0x50] sm:$0xf] }
0x177a   : > { %v3046_v41 = vmul.f32 %v5125_v17, %v3045_v37  ;;  %v4691_v37 = vld [vmem:[%s7041_s2 + $0x410] sm:$0xf] }
0x177b   : > { %3625 = vmatpush.bf16.msrb.mxu2 %v4720_v6  ;;  %v4955_v6 = vld [vmem:[%s7041_s2 + $0xac] sm:$0xf0] }
0x177c   : > { %v3050_v42 = vsel %vm3049_vm4, %v5125_v17, %v3046_v41  ;;  %v4715_v17 = vld [vmem:[%s7041_s2 + $0x4d8] sm:$0xf]  ;;  %v4975_v41 = vld [vmem:[%s7041_s2 + $0x46c] sm:$0xf0] }
0x177d   : > { %v3051_v45 = vmul.f32 %v3050_v42, %v6649_v40  ;;  %v4938_v40 = vld [vmem:[%s7042_s3 + $0x108] sm:$0xff]  ;;  %v4716_v52 = vor.u32 %v4980_v36, %v4715_v17  ;;  %v4692_v42 = vor.u32 %v4975_v41, %v4691_v37  ;;  %v4632_v17 = vor.u32 %v4957_v30, %v4629_v50  ;;  %v4953_v37 = vld [vmem:[%s7041_s2 + $0x54] sm:$0xf] }
0x177e   : > { %3331 = vmatpush.bf16.msrb.mxu1 %v4938_v40  ;;  %v4675_v40 = vld [vmem:[%s7041_s2 + $0x350] sm:$0xf]  ;;  %v4636_v36 = vor.u32 %v4960_v39, %v4635_v0  ;;  %v4613_v41 = vld [vmem:[%s7041_s2 + $0xb0] sm:$0xf0] }
0x177f   : > { %v3055_v46 = vmul.f32 %v5045_v63, %v3051_v45  ;;  %v4973_v63 = vld [vmem:[%s7041_s2 + $0x414] sm:$0xf]  ;;  %v4699_v45 = vld [vmem:[%s7041_s2 + $0x418] sm:$0xf]  ;;  %3587 = vmatpush.bf16.msra.mxu3 %v4692_v42  ;;  %3626 = vmatpush.bf16.msrb.mxu2 %v4704_v57  ;;  %v4616_v42 = vor.u32 %v4953_v37, %v4613_v41 }
0x1781   : > { %v3059_v47 = vadd.f32 %v5046_v43, %v3055_v46  ;;  %v4693_v43 = vld [vmem:[%s7041_s2 + $0x470] sm:$0xf0]  ;;  %v4976_v46 = vld [vmem:[%s7041_s2 + $0x474] sm:$0xf0] }
0x1782   : > { %3332 = vmatpush.bf16.msrb.mxu1 %v4937_v19  ;;  %v4971_v19 = vld [vmem:[%s7041_s2 + $0x3ac] sm:$0xf0] }
0x1783   : > { %v3077_v55 = vpack.c.bf16 %v3059_v47, %v3059_v47 }
0x1785   : > { %3171 = vmatmul.bf16.vlgmr.msrb.gmra.mxu3 %v3077_v55  ;;  %3184 = vmatmul.bf16.vlgmr.msra.gmra.mxu0 %v3077_v55  ;;  %v4700_v55 = vor.u32 %v4976_v46, %v4699_v45  ;;  %v4956_v45 = vld [vmem:[%s7041_s2 + $0xb4] sm:$0xf0]  ;;  %v4954_v46 = vld [vmem:[%s7041_s2 + $0x5c] sm:$0xf] }
0x1786   : > { %3611 = vmatpush.bf16.msra.mxu1 %v4732_v22  ;;  %v4648_v22 = vor.u32 %v4961_v20, %v4645_v8 }
0x178a   : > { %3612 = vmatpush.bf16.msra.mxu1 %v4716_v52  ;;  %v4637_v52 = vld [vmem:[%s7041_s2 + $0x178] sm:$0xf0] }
0x178b   : > { %v4640_v38 = vor.u32 %v4958_v18, %v4637_v52 }
0x178e   : > { %3613 = vmatpush.bf16.msra.mxu1 %v4700_v55  ;;  %v4621_v55 = vld [vmem:[%s7041_s2 + $0xb8] sm:$0xf0] }
0x178f   : > { %v4624_v49 = vor.u32 %v4954_v46, %v4621_v55 }
0x1802   : > { %v3185_v35 = vpop.f32.mrf.mxu0 }
0x1803   : > { %v3186_v60 = vadd.f32 %v3185_v35, %v3080_v59  ;;  %v4676_v59 = vor.u32 %v4971_v19, %v4675_v40  ;;  %v4677_v35 = vld [vmem:[%s7041_s2 + $0x3b0] sm:$0xf0] }
0x1805   : > { %v3190_v34 = vmax.f32 %v3186_v60, 0.0  ;;  %v4683_v60 = vld [vmem:[%s7041_s2 + $0x358] sm:$0xf]  ;;  %3588 = vmatpush.bf16.msra.mxu3 %v4676_v59 }
0x1807   : > { %v3225_v7 = vpack.c.bf16 %v3190_v34, %v3190_v34  ;;  %v4972_v34 = vld [vmem:[%s7041_s2 + $0x3b4] sm:$0xf0] }
0x1808   : > { %v3172_v1 = vpop.f32.mrf.mxu3 }
0x1809   : > { %v3173_v48 = vadd.f32 %v3172_v1, %v3079_v2  ;;  %3346 = vmatmul.bf16.vlgmr.msra.gmra.mxu2 %v3225_v7  ;;  %v4680_v2 = vor.u32 %v4969_v58, %v4677_v35  ;;  %v4684_v7 = vor.u32 %v4972_v34, %v4683_v60  ;;  %v4970_v1 = vld [vmem:[%s7041_s2 + $0x35c] sm:$0xf] }
0x180a   : > { %v3187_v62 = vpop.f32.mrf.mxu0 }
0x180b   : > { %v3189_v33 = vmax.f32 %v3173_v48, 0.0  ;;  %v4685_v48 = vld [vmem:[%s7041_s2 + $0x3b8] sm:$0xf0]  ;;  %3614 = vmatpush.bf16.msra.mxu1 %v4684_v7 }
0x180c   : > { %v4688_v62 = vor.u32 %v4970_v1, %v4685_v48  ;;  %v5049_v1 = vld [vmem:[%s7043_s4 + $0x22] ss:$0 sm:$0xff] }
0x180d   : > { %v3224_v26 = vpack.c.bf16 %v3189_v33, %v3189_v33  ;;  %v4659_v33 = vld [vmem:[%s7041_s2 + $0x290] sm:$0xf] }
0x180e   : > { %3627 = vmatpush.bf16.msrb.mxu2 %v4688_v62 }
0x180f   : > { %3333 = vmatmul.bf16.vlgmr.msrb.gmra.mxu1 %v3224_v26  ;;  %v4967_v26 = vld [vmem:[%s7041_s2 + $0x2ec] sm:$0xf0] }
0x1810   : > { %v3174_v14 = vpop.f32.mrf.mxu3 }
0x1811   : > { %v4965_v14 = vld [vmem:[%s7041_s2 + $0x294] sm:$0xf] }
0x188c   : > { %v3334_v31 = vpop.f32.mrf.mxu1  ;;  %v3347_v51 = vpop.f32.mrf.mxu2 }
0x188d   : > { %v3335_v9 = vadd.f32 %v5047_v54, %v3334_v31  ;;  %v4660_v54 = vor.u32 %v4967_v26, %v4659_v33  ;;  %v4661_v31 = vld [vmem:[%s7041_s2 + $0x2f0] sm:$0xf0]  ;;  %v3414_v26 = vld [vmem:[%s7043_s4 + $0x23] sm:$0xf] }
0x188f   : > { %v3348_v11 = vadd.f32 %v3347_v51, %v3335_v9  ;;  %v4667_v51 = vld [vmem:[%s7041_s2 + $0x298] sm:$0xf]  ;;  %3589 = vmatpush.bf16.msra.mxu3 %v4660_v54  ;;  %v3419_v54 = vperm.slane %v3414_v26, 2 }
0x1890   : > { %v4968_v9 = vld [vmem:[%s7041_s2 + $0x2f4] sm:$0xf0] }
0x1891   : > { %v3351_v13 = vadd.f32 %v3348_v11, %v3059_v47  ;;  %v4696_v47 = vor.u32 %v4973_v63, %v4693_v43  ;;  %v4664_v11 = vor.u32 %v4965_v14, %v4661_v31  ;;  %v4612_v63 = vor.u32 %v4955_v6, %v4611_v44  ;;  %v4619_v43 = vld [vmem:[%s7041_s2 + $0x58] sm:$0xf] }
0x1892   : > { %v3418_v14 = vperm.slane %v3414_v26, 1 }
0x1893   : > { %3354 = vadd.xlane.f32.xlu2 %v3351_v13  ;;  %3600 = vmatpush.bf16.msrb.mxu0 %v4696_v47  ;;  %v4620_v47 = vor.u32 %v4956_v45, %v4619_v43 }
0x1894   : > { %v3336_v10 = vpop.f32.mrf.mxu1  ;;  %v3349_v3 = vpop.f32.mrf.mxu2  ;;  %3590 = vmatpush.bf16.msra.mxu3 %v4644_v21 }
0x1895   : > { %v4966_v10 = vld [vmem:[%s7041_s2 + $0x29c] sm:$0xf] }
0x1896   : > { %v4669_v3 = vld [vmem:[%s7041_s2 + $0x2f8] sm:$0xf0] }
0x1897   : > { %3601 = vmatpush.bf16.msrb.mxu0 %v4680_v2  ;;  %v4672_v15 = vor.u32 %v4966_v10, %v4669_v3  ;;  %v5048_v2 = vld [vmem:[%s7043_s4 + $0x1c] ss:$0 sm:$0xff] }
0x1899   : > { %3628 = vmatpush.bf16.msrb.mxu2 %v4672_v15 }
0x189b   : > { %3602 = vmatpush.bf16.msrb.mxu0 %v4664_v11  ;;  %v3417_v11 = vperm.slane %v3414_v26, 0 }
0x189f   : > { %3603 = vmatpush.bf16.msrb.mxu0 %v4648_v22 }
0x18a3   : > { %3604 = vmatpush.bf16.msrb.mxu0 %v4632_v17 }
0x18a7   : > { %3605 = vmatpush.bf16.msrb.mxu0 %v4616_v42 }
0x1906   : > { %v3355_v27 = vpop.xlane.xlu2 %3354 }
0x1907   : > { %v3356_v28 = vmul.f32 %v3355_v27, %v5849_v4  ;;  %v4656_v27 = vor.u32 %v4962_v24, %v4653_v25 }
0x1909   : > { %v6824_v53 = vsub.f32 %v3351_v13, %v3356_v28  ;;  %v4668_v13 = vor.u32 %v4968_v9, %v4667_v51  ;;  %v4627_v28 = vld [vmem:[%s7041_s2 + $0x110] sm:$0xf]  ;;  %3629 = vmatpush.bf16.msrb.mxu2 %v4656_v27 }
0x190b   : > { %v3358_v29 = vmul.f32 %v6824_v53, %v6824_v53  ;;  %3615 = vmatpush.bf16.msra.mxu1 %v4668_v13  ;;  %v3420_v13 = vperm.slane %v3414_v26, 3 }
0x190d   : > { %3359 = vadd.xlane.f32.xlu2 %v3358_v29  ;;  %v4959_v29 = vld [vmem:[%s7041_s2 + $0x16c] sm:$0xf0]  ;;  %3630 = vmatpush.bf16.msrb.mxu2 %v4640_v38 }
0x190e   : > { %v4628_v32 = vor.u32 %v4959_v29, %v4627_v28 }
0x190f   : > { %3616 = vmatpush.bf16.msra.mxu1 %v4652_v23 }
0x1910   : > { %3591 = vmatpush.bf16.msra.mxu3 %v4628_v32 }
0x1911   : > { %3631 = vmatpush.bf16.msrb.mxu2 %v4624_v49 }
0x1913   : > { %3617 = vmatpush.bf16.msra.mxu1 %v4636_v36 }
0x1914   : > { %3592 = vmatpush.bf16.msra.mxu3 %v4612_v63 }
0x1917   : > { %3618 = vmatpush.bf16.msra.mxu1 %v4620_v47 }
0x1980   : > { %v3360_v56 = vpop.xlane.xlu2 %3359 }
0x1981   : > { %v3361_v57 = vmul.f32 %v3360_v56, %v5849_v4 }
0x1983   : > { %v3362_v40 = vadd.f32 1e-05, %v3361_v57 }
0x1985   : > { %5126 = vrsqrt.f32 %v3362_v40  ;;  %vm3369_vm7 = vweird.f32 %v3362_v40 }
0x198b   : > { %v5127_v19 = vpop.eup %5126 }
0x198c   : > { %v3364_v58 = vmul.f32 %v5127_v19, %v3362_v40  ;;  %vm3370_vm6 = vweird.f32 %v5127_v19 }
0x198d   : > { %vm3371_vm8 = vmor %vm3369_vm7, %vm3370_vm6 }
0x198e   : > { %v3365_v59 = vmul.f32 %v5127_v19, %v3364_v58 }
0x1990   : > { %v3366_v35 = vmul.f32 0.5, %v3365_v59 }
0x1992   : > { %v3367_v60 = vsub.f32 1.5, %v3366_v35 }
0x1994   : > { %v3368_v34 = vmul.f32 %v5127_v19, %v3367_v60 }
0x1996   : > { %v3372_v7 = vsel %vm3371_vm8, %v5127_v19, %v3368_v34 }
0x1997   : > { %v3373_v4 = vmul.f32 %v3372_v7, %v6824_v53 }
0x1999   : > { %v3377_v48 = vmul.f32 %v5048_v2, %v3373_v4 }
0x199b   : > { %v3381_v62 = vadd.f32 %v5049_v1, %v3377_v48 }
0x199d   : > { %v3415_v33 = vpack.c.bf16 %v3381_v62, %v3381_v62 }
0x199f   : > { %3593 = vmatmul.bf16.vlgmr.msra.gmra.mxu3 %v3415_v33  ;;  %3606 = vmatmul.bf16.vlgmr.msrb.gmra.mxu0 %v3415_v33 }
0x19a0   : > { %3619 = vmatmul.bf16.vlgmr.msra.gmra.mxu1 %v3415_v33  ;;  %3632 = vmatmul.bf16.vlgmr.msrb.gmra.mxu2 %v3415_v33 }
0x1a1c   : > { %v3607_v53 = vpop.f32.mrf.mxu0 }
0x1a1d   : > { %v3608_v31 = vadd.f32 %v3607_v53, %v3418_v14  ;;  %v3620_v51 = vpop.f32.mrf.mxu1 }
0x1a1e   : > { %v3621_v9 = vadd.f32 %v3620_v51, %v3419_v54 }
0x1a1f   : > { %3638 = vst [vmem:[%s230_s16 + $0x8] sm:$0xff] %v3608_v31 }
0x1a20   : > { %3639 = vst [vmem:[%s230_s16 + $0x10] sm:$0xff] %v3621_v9 }
0x1a22   : > { %v3594_v10 = vpop.f32.mrf.mxu3 }
0x1a23   : > { %v3595_v3 = vadd.f32 %v3594_v10, %v3417_v11  ;;  %v3633_v15 = vpop.f32.mrf.mxu2 }
0x1a24   : > { %v3634_v16 = vadd.f32 %v3633_v15, %v3420_v13  ;;  %v3609_v12 = vpop.f32.mrf.mxu0 }
0x1a25   : > { %3637 = vst [vmem:[%s230_s16] sm:$0xff] %v3595_v3  ;;  %v3622_v20 = vpop.f32.mrf.mxu1 }
0x1a26   : > { %3640 = vst [vmem:[%s230_s16 + $0x18] sm:$0xff] %v3634_v16 }
0x1a27   : > { %5156 = shalt.err (!%p5153_p3)
}
0x1a28   : > { %4986 = dma.vmem_to_hbm [thread:$0]  (%p5265_p5), %s3656_s11, 512, %s3658_s15, %s3642_s22  }
0x1a2a   : > { %v3596_v21 = vpop.f32.mrf.mxu3 }
0x1a2b   : > { %v3635_v8 = vpop.f32.mrf.mxu2 }
0x1a2c PF: > { %p4992_p4 = scmp.ge.s32.totalorder %s5191_s21, 2  ;;  %s3669_s26 = sand.u32 1, %s5179_s18  }
0x1a2d   : > { %s3670_s8 = scalar_lea.sflag [#allocation3], %s3669_s26 }
0x1a2e   : > { %p4989_p7 = pnand %p4992_p4, %p5269_p6 }
0x1a30   : > { %p4990_p8 = pneg %p4989_p7 }
0x1a32   : > { %5174 = dma.done.wait (%p4990_p8), %s3670_s8, 512  }
0x1a33   : > { %5176 = vsyncadd (%p4990_p8), %s3670_s8, 4294966784  ;;  %p15_p5 = scmp.ge.s32.totalorder %s5252_s24, 4   ;;  %s7047_s18 = smov %s5183_s19 }
0x1a34   : > { %s7048_s19 = smov %s5187_s20  ;;  %s7049_s20 = smov %s5263_s27 }
0x1a35   : > { %s7050_s21 = smov %s5252_s24  ;;  %17 = sbr.rel (!%p15_p5) target bundleno = 3 (0x3), region = 78 }
0x1a3a   :  { %3676 = vsyncpa [#allocation3], 1 }
0x1a3b   :  { %3678 = vsyncpa [#allocation3 + $0x1], 1 }

</bundles_post_ra>
